<compile_context>
chip_gen: v7x
topology: tpu7x:2x2x1
jax: 0.10.0
libtpu: 0.0.40
codegen_flags: <defaults>
</compile_context>

<pallas_src>
import jax
import jax.numpy as jnp
from jax.experimental import pallas as pl
from jax.experimental.pallas import tpu as pltpu

BN_EPS = 1e-5
COMPUTE_DTYPE = jnp.float32   # set to jnp.bfloat16 for large C (keep f32 accum)


def _im2col_3x3(pad_ref, H, W, C):
    """(H+2, W+2, C) zero-padded VMEM ref -> (H*W, 9*C) patch matrix.

    Nine shifted static slices concatenated along the lane dim; feeds a single
    K=9*C MXU matmul instead of 9 K=C matmuls + 9 VALU accumulates.
    """
    taps = [
        pad_ref[dy:dy + H, dx:dx + W, :].reshape(H * W, C)
        for dy in range(3) for dx in range(3)
    ]
    return jnp.concatenate(taps, axis=-1).astype(COMPUTE_DTYPE)


def _residual_block_kernel(x_ref, w1_ref, b1_ref, w2_ref, b2_ref, o_ref,
                           xpad, midpad):
    """Fully fused ResidualBlock for one image.

    x_ref  : (1, C, H*W)  NCHW image with spatial dims flattened (lane dense)
    w1_ref : (9*C, C)     conv1 weights, BN1 scale folded, im2col row order
    b1_ref : (1, C)       folded BN1 bias
    w2_ref : (9*C, C)     conv2 weights, BN2 scale folded
    b2_ref : (1, C)       folded BN2 bias
    o_ref  : (1, C, H*W)  output, same flattened-NCHW layout (lane dense)
    xpad   : (H+2, W+2, C) f32 VMEM scratch (zero-padded conv1 input)
    midpad : (H+2, W+2, C) f32 VMEM scratch (zero-padded conv2 input; the
                           intermediate activation never leaves VMEM)
    """
    Hp, Wp, C = xpad.shape
    H, W = Hp - 2, Wp - 2

    # Re-zero scratch each grid step (cheap at this size and megacore-safe;
    # the interior is fully rewritten below, only the halo must stay zero).
    xpad[...] = jnp.zeros_like(xpad)
    midpad[...] = jnp.zeros_like(midpad)

    # (C, H*W) -> (H*W, C): 2-D flip runs on the XLU, which is otherwise idle.
    x_hwc = jnp.transpose(x_ref[0].astype(jnp.float32))            # (H*W, C)
    xpad[1:H + 1, 1:W + 1, :] = x_hwc.reshape(H, W, C)

    # conv1 (+ folded BN1 scale) + bias + ReLU  -- one K=9*C matmul.
    p1 = _im2col_3x3(xpad, H, W, C)                                # (H*W, 9C)
    mid = jnp.dot(p1, w1_ref[...].astype(COMPUTE_DTYPE),
                  preferred_element_type=jnp.float32)              # (H*W, C)
    mid = jnp.maximum(mid + b1_ref[...], 0.0)

    midpad[1:H + 1, 1:W + 1, :] = mid.reshape(H, W, C)

    # conv2 (+ folded BN2 scale) + bias + residual + ReLU.
    p2 = _im2col_3x3(midpad, H, W, C)
    out = jnp.dot(p2, w2_ref[...].astype(COMPUTE_DTYPE),
                  preferred_element_type=jnp.float32)              # (H*W, C)
    out = jnp.maximum(out + b2_ref[...] + x_hwc, 0.0)

    # Lane-dense store: (H*W, C) -> (C, H*W); last dim is a multiple of 128.
    o_ref[0] = jnp.transpose(out).astype(o_ref.dtype)


def _fold_bn_into_conv(w, gamma, beta, mean, var):
    """Fold eval-mode BatchNorm into the conv feeding it.

    Returns im2col-layout weights (9*Cin, Cout) — row order (dy, dx, ci),
    matching _im2col_3x3 — and a (1, Cout) bias.
    """
    s = gamma / jnp.sqrt(var + BN_EPS)                 # (Cout,)
    b = beta - mean * s
    w_scaled = w * s[:, None, None, None]              # scale output channels
    cout = w.shape[0]
    w_im2col = jnp.transpose(w_scaled, (2, 3, 1, 0)).reshape(-1, cout)
    return w_im2col.astype(jnp.float32), b[None, :].astype(jnp.float32)


def residual_block_forward(x_nchw, params):
    """Pallas-backed ResidualBlock forward.  x_nchw: (N, C, H, W) float32."""
    N, C, H, W = x_nchw.shape
    HW = H * W

    w1, b1 = _fold_bn_into_conv(params["conv1_w"], params["bn1_gamma"],
                                params["bn1_beta"], params["bn1_mean"],
                                params["bn1_var"])
    w2, b2 = _fold_bn_into_conv(params["conv2_w"], params["bn2_gamma"],
                                params["bn2_beta"], params["bn2_mean"],
                                params["bn2_var"])

    # Free reshape (contiguous): NCHW -> (N, C, H*W) lane-dense slabs.
    x_flat = x_nchw.reshape(N, C, HW)

    flops = N * 2 * (2 * HW * (9 * C) * C)          # two im2col matmuls/image
    bytes_accessed = (2 * N * C * HW + 2 * 9 * C * C + 2 * C) * 4

    out_flat = pl.pallas_call(
        _residual_block_kernel,
        out_shape=jax.ShapeDtypeStruct((N, C, HW), x_nchw.dtype),
        grid=(N,),
        in_specs=[
            pl.BlockSpec((1, C, HW), lambda n: (n, 0, 0)),
            pl.BlockSpec((9 * C, C), lambda n: (0, 0)),
            pl.BlockSpec((1, C), lambda n: (0, 0)),
            pl.BlockSpec((9 * C, C), lambda n: (0, 0)),
            pl.BlockSpec((1, C), lambda n: (0, 0)),
        ],
        out_specs=pl.BlockSpec((1, C, HW), lambda n: (n, 0, 0)),
        scratch_shapes=[
            pltpu.VMEM((H + 2, W + 2, C), jnp.float32),
            pltpu.VMEM((H + 2, W + 2, C), jnp.float32),
        ],
        compiler_params=pltpu.CompilerParams(
            dimension_semantics=("parallel",)),
        cost_estimate=pl.CostEstimate(flops=flops, transcendentals=0,
                                      bytes_accessed=bytes_accessed),
    )(x_flat, w1, b1, w2, b2)

    # Free reshape back to NCHW.
    return out_flat.reshape(N, C, H, W)


def _reference(x_nchw, params):
    """Pure-JAX reference matching the PyTorch forward (eval-mode BN)."""
    def conv(x, w):
        return jax.lax.conv_general_dilated(
            x, w, (1, 1), ((1, 1), (1, 1)),
            dimension_numbers=("NCHW", "OIHW", "NCHW"))

    def bn(x, g, b, m, v):
        g, b, m, v = (t[None, :, None, None] for t in (g, b, m, v))
        return g * (x - m) / jnp.sqrt(v + BN_EPS) + b

    out = conv(x_nchw, params["conv1_w"])
    out = jnp.maximum(bn(out, params["bn1_gamma"], params["bn1_beta"],
                         params["bn1_mean"], params["bn1_var"]), 0.0)
    out = conv(out, params["conv2_w"])
    out = bn(out, params["bn2_gamma"], params["bn2_beta"],
             params["bn2_mean"], params["bn2_var"])
    return jnp.maximum(out + x_nchw, 0.0)


if __name__ == "__main__":
    N, C, H, W = 2, 4, 16, 16   # in_channels = out_channels = 4, stride = 1

    key = jax.random.PRNGKey(0)
    kx, k1, k2, k3, k4, k5, k6 = jax.random.split(key, 7)
    params = {
        "conv1_w": 0.1 * jax.random.normal(k1, (C, C, 3, 3), jnp.float32),
        "conv2_w": 0.1 * jax.random.normal(k2, (C, C, 3, 3), jnp.float32),
        "bn1_gamma": 1.0 + 0.1 * jax.random.normal(k3, (C,), jnp.float32),
        "bn1_beta": 0.1 * jax.random.normal(k4, (C,), jnp.float32),
        "bn1_mean": jnp.zeros((C,), jnp.float32),
        "bn1_var": jnp.ones((C,), jnp.float32),
        "bn2_gamma": 1.0 + 0.1 * jax.random.normal(k5, (C,), jnp.float32),
        "bn2_beta": 0.1 * jax.random.normal(k6, (C,), jnp.float32),
        "bn2_mean": jnp.zeros((C,), jnp.float32),
        "bn2_var": jnp.ones((C,), jnp.float32),
    }
    x = jax.random.normal(kx, (N, C, H, W), jnp.float32)

    out = jax.block_until_ready(residual_block_forward(x, params))
    ref = _reference(x, params)

    assert out.shape == (N, C, H, W), out.shape
    assert jnp.allclose(out, ref, atol=1e-3, rtol=1e-3), \
        float(jnp.max(jnp.abs(out - ref)))
    print("KERNEL_OK")
</pallas_src>

<mosaic_0001>
module attributes {stable_mosaic.version = 11 : i64} {
  func.func @_residual_block_kernel(%arg0: i32, %arg1: memref<1x4x256xf32, #tpu.memory_space<vmem>>, %arg2: memref<36x4xf32, #tpu.memory_space<vmem>>, %arg3: memref<1x4xf32, #tpu.memory_space<vmem>>, %arg4: memref<36x4xf32, #tpu.memory_space<vmem>>, %arg5: memref<1x4xf32, #tpu.memory_space<vmem>>, %arg6: memref<1x4x256xf32, #tpu.memory_space<vmem>>, %arg7: memref<18x18x4xf32, #tpu.memory_space<vmem>>, %arg8: memref<18x18x4xf32, #tpu.memory_space<vmem>>) attributes {dimension_semantics = [#tpu.dimension_semantics<parallel>], iteration_bounds = array<i64: 2>, scalar_prefetch = 0 : i64, scratch_operands = 2 : i64, tpu.core_type = #tpu.core_type<tc>, window_params = [{transform_indices = @transform_0, window_bounds = array<i64: 1, 4, 256>}, {pipeline_mode = #tpu.pipeline_mode<synchronous>, transform_indices = @transform_1, window_bounds = array<i64: 36, 4>}, {pipeline_mode = #tpu.pipeline_mode<synchronous>, transform_indices = @transform_2, window_bounds = array<i64: 1, 4>}, {pipeline_mode = #tpu.pipeline_mode<synchronous>, transform_indices = @transform_3, window_bounds = array<i64: 36, 4>}, {pipeline_mode = #tpu.pipeline_mode<synchronous>, transform_indices = @transform_4, window_bounds = array<i64: 1, 4>}, {transform_indices = @transform_5, window_bounds = array<i64: 1, 4, 256>}]} {
    %cst = arith.constant 0.000000e+00 : f32
    %0 = vector.broadcast %cst : f32 to vector<18x18x4xf32>
    %c0 = arith.constant 0 : index
    %c0_0 = arith.constant 0 : index
    %c0_1 = arith.constant 0 : index
    %1 = vector.load %arg7[%c0, %c0_0, %c0_1] : memref<18x18x4xf32, #tpu.memory_space<vmem>>, vector<18x18x4xf32>
    tpu.vector_store %arg7[%c0, %c0_0, %c0_1], %0 {strides = array<i32>} : memref<18x18x4xf32, #tpu.memory_space<vmem>>, vector<18x18x4xf32>,
    %cst_2 = arith.constant 0.000000e+00 : f32
    %2 = vector.broadcast %cst_2 : f32 to vector<18x18x4xf32>
    %c0_3 = arith.constant 0 : index
    %c0_4 = arith.constant 0 : index
    %c0_5 = arith.constant 0 : index
    %3 = vector.load %arg8[%c0_3, %c0_4, %c0_5] : memref<18x18x4xf32, #tpu.memory_space<vmem>>, vector<18x18x4xf32>
    tpu.vector_store %arg8[%c0_3, %c0_4, %c0_5], %2 {strides = array<i32>} : memref<18x18x4xf32, #tpu.memory_space<vmem>>, vector<18x18x4xf32>,
    %c0_6 = arith.constant 0 : index
    %c0_7 = arith.constant 0 : index
    %c0_8 = arith.constant 0 : index
    %4 = vector.load %arg1[%c0_6, %c0_7, %c0_8] : memref<1x4x256xf32, #tpu.memory_space<vmem>>, vector<1x4x256xf32>
    %5 = vector.shape_cast %4 : vector<1x4x256xf32> to vector<4x256xf32>
    %6 = tpu.transpose %5, [1, 0] : vector<4x256xf32> -> vector<256x4xf32>
    %7 = vector.shape_cast %6 : vector<256x4xf32> to vector<16x16x4xf32>
    %c1 = arith.constant 1 : index
    %c1_9 = arith.constant 1 : index
    %c0_10 = arith.constant 0 : index
    %8 = vector.load %arg7[%c1, %c1_9, %c0_10] : memref<18x18x4xf32, #tpu.memory_space<vmem>>, vector<16x16x4xf32>
    tpu.vector_store %arg7[%c1, %c1_9, %c0_10], %7 {strides = array<i32>} : memref<18x18x4xf32, #tpu.memory_space<vmem>>, vector<16x16x4xf32>,
    %c0_11 = arith.constant 0 : index
    %c0_12 = arith.constant 0 : index
    %c0_13 = arith.constant 0 : index
    %9 = vector.load %arg7[%c0_11, %c0_12, %c0_13] : memref<18x18x4xf32, #tpu.memory_space<vmem>>, vector<16x16x4xf32>
    %10 = vector.shape_cast %9 : vector<16x16x4xf32> to vector<256x4xf32>
    %c0_14 = arith.constant 0 : index
    %c1_15 = arith.constant 1 : index
    %c0_16 = arith.constant 0 : index
    %11 = vector.load %arg7[%c0_14, %c1_15, %c0_16] : memref<18x18x4xf32, #tpu.memory_space<vmem>>, vector<16x16x4xf32>
    %12 = vector.shape_cast %11 : vector<16x16x4xf32> to vector<256x4xf32>
    %c0_17 = arith.constant 0 : index
    %c2 = arith.constant 2 : index
    %c0_18 = arith.constant 0 : index
    %13 = vector.load %arg7[%c0_17, %c2, %c0_18] : memref<18x18x4xf32, #tpu.memory_space<vmem>>, vector<16x16x4xf32>
    %14 = vector.shape_cast %13 : vector<16x16x4xf32> to vector<256x4xf32>
    %c1_19 = arith.constant 1 : index
    %c0_20 = arith.constant 0 : index
    %c0_21 = arith.constant 0 : index
    %15 = vector.load %arg7[%c1_19, %c0_20, %c0_21] : memref<18x18x4xf32, #tpu.memory_space<vmem>>, vector<16x16x4xf32>
    %16 = vector.shape_cast %15 : vector<16x16x4xf32> to vector<256x4xf32>
    %c1_22 = arith.constant 1 : index
    %c1_23 = arith.constant 1 : index
    %c0_24 = arith.constant 0 : index
    %17 = vector.load %arg7[%c1_22, %c1_23, %c0_24] : memref<18x18x4xf32, #tpu.memory_space<vmem>>, vector<16x16x4xf32>
    %18 = vector.shape_cast %17 : vector<16x16x4xf32> to vector<256x4xf32>
    %c1_25 = arith.constant 1 : index
    %c2_26 = arith.constant 2 : index
    %c0_27 = arith.constant 0 : index
    %19 = vector.load %arg7[%c1_25, %c2_26, %c0_27] : memref<18x18x4xf32, #tpu.memory_space<vmem>>, vector<16x16x4xf32>
    %20 = vector.shape_cast %19 : vector<16x16x4xf32> to vector<256x4xf32>
    %c2_28 = arith.constant 2 : index
    %c0_29 = arith.constant 0 : index
    %c0_30 = arith.constant 0 : index
    %21 = vector.load %arg7[%c2_28, %c0_29, %c0_30] : memref<18x18x4xf32, #tpu.memory_space<vmem>>, vector<16x16x4xf32>
    %22 = vector.shape_cast %21 : vector<16x16x4xf32> to vector<256x4xf32>
    %c2_31 = arith.constant 2 : index
    %c1_32 = arith.constant 1 : index
    %c0_33 = arith.constant 0 : index
    %23 = vector.load %arg7[%c2_31, %c1_32, %c0_33] : memref<18x18x4xf32, #tpu.memory_space<vmem>>, vector<16x16x4xf32>
    %24 = vector.shape_cast %23 : vector<16x16x4xf32> to vector<256x4xf32>
    %c2_34 = arith.constant 2 : index
    %c2_35 = arith.constant 2 : index
    %c0_36 = arith.constant 0 : index
    %25 = vector.load %arg7[%c2_34, %c2_35, %c0_36] : memref<18x18x4xf32, #tpu.memory_space<vmem>>, vector<16x16x4xf32>
    %26 = vector.shape_cast %25 : vector<16x16x4xf32> to vector<256x4xf32>
    %27 = tpu.concatenate %10, %12, %14, %16, %18, %20, %22, %24, %26 in 1 : vector<256x4xf32>, vector<256x4xf32>, vector<256x4xf32>, vector<256x4xf32>, vector<256x4xf32>, vector<256x4xf32>, vector<256x4xf32>, vector<256x4xf32>, vector<256x4xf32> -> vector<256x36xf32>
    %c0_37 = arith.constant 0 : index
    %c0_38 = arith.constant 0 : index
    %28 = vector.load %arg2[%c0_37, %c0_38] : memref<36x4xf32, #tpu.memory_space<vmem>>, vector<36x4xf32>
    %cst_39 = arith.constant dense<0.000000e+00> : vector<256x4xf32>
    %29 = tpu.matmul %27, %28, %cst_39 {dimension_numbers = #tpu.dot_dimension_numbers<[1], [0], [0], [1], [0, 0, 1, 1], [], []>} : vector<256x36xf32>, vector<36x4xf32>, vector<256x4xf32> -> vector<256x4xf32>
    %c0_40 = arith.constant 0 : index
    %c0_41 = arith.constant 0 : index
    %30 = vector.load %arg3[%c0_40, %c0_41] : memref<1x4xf32, #tpu.memory_space<vmem>>, vector<1x4xf32>
    %31 = vector.broadcast %30 : vector<1x4xf32> to vector<256x4xf32>
    %32 = arith.addf %29, %31 : vector<256x4xf32>
    %cst_42 = arith.constant 0.000000e+00 : f32
    %33 = vector.broadcast %cst_42 : f32 to vector<256x4xf32>
    %34 = arith.maximumf %32, %33 : vector<256x4xf32>
    %35 = vector.shape_cast %34 : vector<256x4xf32> to vector<16x16x4xf32>
    %c1_43 = arith.constant 1 : index
    %c1_44 = arith.constant 1 : index
    %c0_45 = arith.constant 0 : index
    %36 = vector.load %arg8[%c1_43, %c1_44, %c0_45] : memref<18x18x4xf32, #tpu.memory_space<vmem>>, vector<16x16x4xf32>
    tpu.vector_store %arg8[%c1_43, %c1_44, %c0_45], %35 {strides = array<i32>} : memref<18x18x4xf32, #tpu.memory_space<vmem>>, vector<16x16x4xf32>,
    %c0_46 = arith.constant 0 : index
    %c0_47 = arith.constant 0 : index
    %c0_48 = arith.constant 0 : index
    %37 = vector.load %arg8[%c0_46, %c0_47, %c0_48] : memref<18x18x4xf32, #tpu.memory_space<vmem>>, vector<16x16x4xf32>
    %38 = vector.shape_cast %37 : vector<16x16x4xf32> to vector<256x4xf32>
    %c0_49 = arith.constant 0 : index
    %c1_50 = arith.constant 1 : index
    %c0_51 = arith.constant 0 : index
    %39 = vector.load %arg8[%c0_49, %c1_50, %c0_51] : memref<18x18x4xf32, #tpu.memory_space<vmem>>, vector<16x16x4xf32>
    %40 = vector.shape_cast %39 : vector<16x16x4xf32> to vector<256x4xf32>
    %c0_52 = arith.constant 0 : index
    %c2_53 = arith.constant 2 : index
    %c0_54 = arith.constant 0 : index
    %41 = vector.load %arg8[%c0_52, %c2_53, %c0_54] : memref<18x18x4xf32, #tpu.memory_space<vmem>>, vector<16x16x4xf32>
    %42 = vector.shape_cast %41 : vector<16x16x4xf32> to vector<256x4xf32>
    %c1_55 = arith.constant 1 : index
    %c0_56 = arith.constant 0 : index
    %c0_57 = arith.constant 0 : index
    %43 = vector.load %arg8[%c1_55, %c0_56, %c0_57] : memref<18x18x4xf32, #tpu.memory_space<vmem>>, vector<16x16x4xf32>
    %44 = vector.shape_cast %43 : vector<16x16x4xf32> to vector<256x4xf32>
    %c1_58 = arith.constant 1 : index
    %c1_59 = arith.constant 1 : index
    %c0_60 = arith.constant 0 : index
    %45 = vector.load %arg8[%c1_58, %c1_59, %c0_60] : memref<18x18x4xf32, #tpu.memory_space<vmem>>, vector<16x16x4xf32>
    %46 = vector.shape_cast %45 : vector<16x16x4xf32> to vector<256x4xf32>
    %c1_61 = arith.constant 1 : index
    %c2_62 = arith.constant 2 : index
    %c0_63 = arith.constant 0 : index
    %47 = vector.load %arg8[%c1_61, %c2_62, %c0_63] : memref<18x18x4xf32, #tpu.memory_space<vmem>>, vector<16x16x4xf32>
    %48 = vector.shape_cast %47 : vector<16x16x4xf32> to vector<256x4xf32>
    %c2_64 = arith.constant 2 : index
    %c0_65 = arith.constant 0 : index
    %c0_66 = arith.constant 0 : index
    %49 = vector.load %arg8[%c2_64, %c0_65, %c0_66] : memref<18x18x4xf32, #tpu.memory_space<vmem>>, vector<16x16x4xf32>
    %50 = vector.shape_cast %49 : vector<16x16x4xf32> to vector<256x4xf32>
    %c2_67 = arith.constant 2 : index
    %c1_68 = arith.constant 1 : index
    %c0_69 = arith.constant 0 : index
    %51 = vector.load %arg8[%c2_67, %c1_68, %c0_69] : memref<18x18x4xf32, #tpu.memory_space<vmem>>, vector<16x16x4xf32>
    %52 = vector.shape_cast %51 : vector<16x16x4xf32> to vector<256x4xf32>
    %c2_70 = arith.constant 2 : index
    %c2_71 = arith.constant 2 : index
    %c0_72 = arith.constant 0 : index
    %53 = vector.load %arg8[%c2_70, %c2_71, %c0_72] : memref<18x18x4xf32, #tpu.memory_space<vmem>>, vector<16x16x4xf32>
    %54 = vector.shape_cast %53 : vector<16x16x4xf32> to vector<256x4xf32>
    %55 = tpu.concatenate %38, %40, %42, %44, %46, %48, %50, %52, %54 in 1 : vector<256x4xf32>, vector<256x4xf32>, vector<256x4xf32>, vector<256x4xf32>, vector<256x4xf32>, vector<256x4xf32>, vector<256x4xf32>, vector<256x4xf32>, vector<256x4xf32> -> vector<256x36xf32>
    %c0_73 = arith.constant 0 : index
    %c0_74 = arith.constant 0 : index
    %56 = vector.load %arg4[%c0_73, %c0_74] : memref<36x4xf32, #tpu.memory_space<vmem>>, vector<36x4xf32>
    %cst_75 = arith.constant dense<0.000000e+00> : vector<256x4xf32>
    %57 = tpu.matmul %55, %56, %cst_75 {dimension_numbers = #tpu.dot_dimension_numbers<[1], [0], [0], [1], [0, 0, 1, 1], [], []>} : vector<256x36xf32>, vector<36x4xf32>, vector<256x4xf32> -> vector<256x4xf32>
    %c0_76 = arith.constant 0 : index
    %c0_77 = arith.constant 0 : index
    %58 = vector.load %arg5[%c0_76, %c0_77] : memref<1x4xf32, #tpu.memory_space<vmem>>, vector<1x4xf32>
    %59 = vector.broadcast %58 : vector<1x4xf32> to vector<256x4xf32>
    %60 = arith.addf %57, %59 : vector<256x4xf32>
    %61 = arith.addf %60, %6 : vector<256x4xf32>
    %cst_78 = arith.constant 0.000000e+00 : f32
    %62 = vector.broadcast %cst_78 : f32 to vector<256x4xf32>
    %63 = arith.maximumf %61, %62 : vector<256x4xf32>
    %64 = tpu.transpose %63, [1, 0] : vector<256x4xf32> -> vector<4x256xf32>
    %c0_79 = arith.constant 0 : index
    %c0_80 = arith.constant 0 : index
    %c0_81 = arith.constant 0 : index
    %65 = vector.load %arg6[%c0_79, %c0_80, %c0_81] : memref<1x4x256xf32, #tpu.memory_space<vmem>>, vector<1x4x256xf32>
    %66 = vector.shape_cast %65 : vector<1x4x256xf32> to vector<4x256xf32>
    %67 = vector.shape_cast %64 : vector<4x256xf32> to vector<1x4x256xf32>
    tpu.vector_store %arg6[%c0_79, %c0_80, %c0_81], %67 {strides = array<i32>} : memref<1x4x256xf32, #tpu.memory_space<vmem>>, vector<1x4x256xf32>,
    return
  }
  func.func @transform_0(%arg0: i32) -> (i32, i32, i32) {
    %c0_i32 = arith.constant 0 : i32
    %c0_i32_0 = arith.constant 0 : i32
    %c0_i32_1 = arith.constant 0 : i32
    return %arg0, %c0_i32, %c0_i32_0 : i32, i32, i32
  }
  func.func @transform_1(%arg0: i32) -> (i32, i32) {
    %c0_i32 = arith.constant 0 : i32
    %c0_i32_0 = arith.constant 0 : i32
    %c0_i32_1 = arith.constant 0 : i32
    return %c0_i32, %c0_i32_0 : i32, i32
  }
  func.func @transform_2(%arg0: i32) -> (i32, i32) {
    %c0_i32 = arith.constant 0 : i32
    %c0_i32_0 = arith.constant 0 : i32
    %c0_i32_1 = arith.constant 0 : i32
    return %c0_i32, %c0_i32_0 : i32, i32
  }
  func.func @transform_3(%arg0: i32) -> (i32, i32) {
    %c0_i32 = arith.constant 0 : i32
    %c0_i32_0 = arith.constant 0 : i32
    %c0_i32_1 = arith.constant 0 : i32
    return %c0_i32, %c0_i32_0 : i32, i32
  }
  func.func @transform_4(%arg0: i32) -> (i32, i32) {
    %c0_i32 = arith.constant 0 : i32
    %c0_i32_0 = arith.constant 0 : i32
    %c0_i32_1 = arith.constant 0 : i32
    return %c0_i32, %c0_i32_0 : i32, i32
  }
  func.func @transform_5(%arg0: i32) -> (i32, i32, i32) {
    %c0_i32 = arith.constant 0 : i32
    %c0_i32_0 = arith.constant 0 : i32
    %c0_i32_1 = arith.constant 0 : i32
    return %arg0, %c0_i32, %c0_i32_0 : i32, i32, i32
  }
}

</mosaic_0001>

<bundles_post_ra>
// kernel: tpu_custom_call.1
= control target key start
LH: loop header
LB: loop body
LE: loop exit
PB: predicated region body
PF: predicated region fallthrough
CT: control target
= control target key end

     0   :  { %10 = vsyncpa [#allocation5], 0  ;;  %s8292_s0 = inlined_call_operand.vmem [shape: f32[2,4,256], index: 0, kind: input, shape index: {}]   ;;  %s8293_s1 = inlined_call_operand.vmem [shape: f32[36,4], index: 1, kind: input, shape index: {}]   ;;  %s8294_s2 = inlined_call_operand.vmem [shape: f32[1,4], index: 2, kind: input, shape index: {}]   ;;  %s8295_s3 = inlined_call_operand.vmem [shape: f32[36,4], index: 3, kind: input, shape index: {}]   ;;  %s8296_s4 = inlined_call_operand.vmem [shape: f32[1,4], index: 4, kind: input, shape index: {}]   ;;  %s8297_s5 = inlined_call_operand.hbm [shape: f32[2,4,256], index: 5, kind: output, shape index: {}]  }
   0x1   :  { %12 = vsyncpa [#allocation5 + $0x1], 0  ;;  %s5010_s18 = smov 0   ;;  %s5012_s19 = smov 0  }
   0x2   :  { %s5014_s20 = smov 0   ;;  %s5016_s21 = smov 0  }
   0x3 LB: > { %s5031_s22 = sadd.s32 4294967295, %s4968_s21   ;;  %s4525_s23 = sadd.s32 4294967294, %s4968_s21   ;;  %s4968_s21 = sphi %s5016_s21, %s8937_s21   ;;  %s4964_s20 = sphi %s5014_s20, %s8936_s20   ;;  %s4960_s19 = sphi %s5012_s19, %s8935_s19   ;;  %s4956_s18 = sphi %s5010_s18, %s8934_s18  }
   0x4   : > { %s5035_s24 = sadd.s32 1, %s4968_s21   ;;  %s135_s25 = sadd.s32 1, %s4964_s20 }
   0x5   : > { %s132_s26 = ssub.s32 %s4968_s21, %s5035_s24  ;;  %p145_p0 = scmp.ne.s32.totalorder %s4964_s20, %s4960_s19 }
   0x6   : > { %p133_p1 = scmp.eq.s32.totalorder %s132_s26, 0  ;;  %p146_p2 = scmp.eq.s32.totalorder %s5031_s22, 1 }
   0x7   : > { %p151_p3 = scmp.ne.s32.totalorder %s4960_s19, %s4956_s18  ;;  %p152_p4 = scmp.eq.s32.totalorder %s4525_s23, 1 }
   0x8   : > { %s5046_s27 = scalar_select %p133_p1, %s4964_s20, %s135_s25  }
   0x9   : > { %p5048_p5 = por %p146_p2, %p145_p0  ;;  %p5052_p6 = por %p152_p4, %p151_p3 }
   0xa   : > { %p4528_p7 = scmp.ge.s32.totalorder %s4968_s21, 1  ;;  %p190_p8 = scmp.lt.s32.totalorder %s4968_s21, 3 }
   0xc   : > { %p191_p9 = pnand %p4528_p7, %p190_p8 }
   0xe   : > { %194 = sbr.rel (%p191_p9) target bundleno = 1957 (0x7a5), region = 40 }
  0x15   : > { %p218_p10 = scmp.lt.s32.totalorder %s5031_s22, 1  ;;  %vm223_vm0 = vcmask 31744   ;;  %v4970_v0 = vmov 0.0   ;;  %vm226_vm1 = vcmask 25600   ;;  %s4971_s10 = smov 4   ;;  %vm2119_vm2 = vcmask 1043456  }
  0x16   : > { %228 = vst.msk [vmem:[#allocation2 + $0x18] sm:$0xff] %vm223_vm0, %v4970_v0  ;;  %229 = vst.msk [vmem:[#allocation2 + $0x20] sm:$0xff] %vm223_vm0, %v4970_v0  ;;  %s4972_s11 = smov 8   ;;  %s4973_s12 = smov 12   ;;  %vm1779_vm3 = vcmask 64512   ;;  %vm1812_vm4 = vcmask 97280  }
  0x17   : > { %224 = vst.msk [vmem:[#allocation2] sm:$0xff] %vm223_vm0, %v4970_v0  ;;  %225 = vst.msk [vmem:[#allocation2 + $0x8] sm:$0xff] %vm223_vm0, %v4970_v0  ;;  %s5206_s30 = scalar_select %p218_p10, %s5031_s22, 1  ;;  %vm1845_vm5 = vcmask 130048   ;;  %vm1878_vm6 = vcmask 162816   ;;  %vm1911_vm7 = vcmask 195584  }
  0x18   : > { %231 = vst.msk [vmem:[#allocation2 + $0x30] sm:$0xff] %vm223_vm0, %v4970_v0  ;;  %232 = vst.msk [vmem:[#allocation2 + $0x38] sm:$0xff] %vm223_vm0, %v4970_v0  ;;  %s4974_s13 = smov 16   ;;  %s4975_s14 = smov 20   ;;  %vm1944_vm8 = vcmask 228352   ;;  %vm1977_vm9 = vcmask 261120  }
  0x19   : > { %234 = vst.msk [vmem:[#allocation2 + $0x48] sm:$0xff] %vm223_vm0, %v4970_v0  ;;  %235 = vst.msk [vmem:[#allocation2 + $0x50] sm:$0xff] %vm223_vm0, %v4970_v0  ;;  %s4605_s6 = sshll.u32 %s5206_s30, 3  ;;  %s4976_s15 = smov 24   ;;  %vm2022_vm10 = vcmask 293888  }
  0x1a   : > { %237 = vst.msk [vmem:[#allocation2 + $0x60] sm:$0xff] %vm223_vm0, %v4970_v0  ;;  %238 = vst.msk [vmem:[#allocation2 + $0x68] sm:$0xff] %vm223_vm0, %v4970_v0  ;;  %s222_s9 = scalar_lea.vmem %s8292_s0, %s4605_s6  ;;  %s4977_s16 = smov 28  }
  0x1b   : > { %240 = vst.msk [vmem:[#allocation2 + $0x78] sm:$0xff] %vm223_vm0, %v4970_v0  ;;  %241 = vst.msk [vmem:[#allocation2 + $0x80] sm:$0xff] %vm223_vm0, %v4970_v0  ;;  %v333_v1 = vld [vmem:[%s222_s9] sm:$0xff]  ;;  %s4978_s17 = smov 32  }
  0x1c   : > { %243 = vst.msk [vmem:[#allocation2 + $0x90] sm:$0xff] %vm223_vm0, %v4970_v0  ;;  %244 = vst.msk [vmem:[#allocation2 + $0x98] sm:$0xff] %vm223_vm0, %v4970_v0  ;;  %337 = vxpose.xlu0.b32.start.end [1/1] (short) %v333_v1, 128  ;;  %v335_v4 = vcombine.high %v333_v1, %v333_v1 }
  0x1d   : > { %246 = vst.msk [vmem:[#allocation2 + $0xa8] sm:$0xff] %vm223_vm0, %v4970_v0  ;;  %247 = vst.msk [vmem:[#allocation2 + $0xb0] sm:$0xff] %vm223_vm0, %v4970_v0 }
  0x1e   : > { %249 = vst.msk [vmem:[#allocation2 + $0xc0] sm:$0xff] %vm223_vm0, %v4970_v0  ;;  %250 = vst.msk [vmem:[#allocation2 + $0xc8] sm:$0xff] %vm223_vm0, %v4970_v0  ;;  %v466_v2 = vld [vmem:[#allocation2 + $0x1] sm:$0xff] }
  0x1f   : > { %252 = vst.msk [vmem:[#allocation2 + $0xd8] sm:$0xff] %vm223_vm0, %v4970_v0  ;;  %253 = vst.msk [vmem:[#allocation2 + $0xe0] sm:$0xff] %vm223_vm0, %v4970_v0  ;;  %755 = vrot.lane.b32.xlu1 %v466_v2, %s4971_s10 }
  0x20   : > { %255 = vst.msk [vmem:[#allocation2 + $0xf0] sm:$0xff] %vm223_vm0, %v4970_v0  ;;  %256 = vst.msk [vmem:[#allocation2 + $0xf8] sm:$0xff] %vm223_vm0, %v4970_v0 }
  0x21   : > { %258 = vst.msk [vmem:[#allocation2 + $0x108] sm:$0xff] %vm223_vm0, %v4970_v0  ;;  %259 = vst.msk [vmem:[#allocation2 + $0x110] sm:$0xff] %vm223_vm0, %v4970_v0 }
  0x22   : > { %261 = vst.msk [vmem:[#allocation2 + $0x120] sm:$0xff] %vm223_vm0, %v4970_v0  ;;  %262 = vst.msk [vmem:[#allocation2 + $0x128] sm:$0xff] %vm223_vm0, %v4970_v0 }
  0x23   : > { %264 = vst.msk [vmem:[#allocation2 + $0x138] sm:$0xff] %vm223_vm0, %v4970_v0  ;;  %265 = vst.msk [vmem:[#allocation2 + $0x140] sm:$0xff] %vm223_vm0, %v4970_v0 }
  0x24   : > { %267 = vst.msk [vmem:[#allocation2 + $0x150] sm:$0xff] %vm223_vm0, %v4970_v0  ;;  %268 = vst.msk [vmem:[#allocation2 + $0x158] sm:$0xff] %vm223_vm0, %v4970_v0 }
  0x25   : > { %270 = vst.msk [vmem:[#allocation2 + $0x168] sm:$0xff] %vm223_vm0, %v4970_v0  ;;  %271 = vst.msk [vmem:[#allocation2 + $0x170] sm:$0xff] %vm223_vm0, %v4970_v0 }
  0x26   : > { %273 = vst.msk [vmem:[#allocation2 + $0x180] sm:$0xff] %vm223_vm0, %v4970_v0  ;;  %274 = vst.msk [vmem:[#allocation2 + $0x188] sm:$0xff] %vm223_vm0, %v4970_v0 }
  0x27   : > { %276 = vst.msk [vmem:[#allocation2 + $0x198] sm:$0xff] %vm223_vm0, %v4970_v0  ;;  %277 = vst.msk [vmem:[#allocation2 + $0x1a0] sm:$0xff] %vm223_vm0, %v4970_v0 }
  0x28   : > { %279 = vst.msk [vmem:[#allocation3] sm:$0xff] %vm223_vm0, %v4970_v0  ;;  %280 = vst.msk [vmem:[#allocation3 + $0x8] sm:$0xff] %vm223_vm0, %v4970_v0 }
  0x29   : > { %282 = vst.msk [vmem:[#allocation3 + $0x18] sm:$0xff] %vm223_vm0, %v4970_v0  ;;  %283 = vst.msk [vmem:[#allocation3 + $0x20] sm:$0xff] %vm223_vm0, %v4970_v0 }
  0x2a   : > { %285 = vst.msk [vmem:[#allocation3 + $0x30] sm:$0xff] %vm223_vm0, %v4970_v0  ;;  %286 = vst.msk [vmem:[#allocation3 + $0x38] sm:$0xff] %vm223_vm0, %v4970_v0 }
  0x2b   : > { %288 = vst.msk [vmem:[#allocation3 + $0x48] sm:$0xff] %vm223_vm0, %v4970_v0  ;;  %289 = vst.msk [vmem:[#allocation3 + $0x50] sm:$0xff] %vm223_vm0, %v4970_v0 }
  0x2c   : > { %291 = vst.msk [vmem:[#allocation3 + $0x60] sm:$0xff] %vm223_vm0, %v4970_v0  ;;  %292 = vst.msk [vmem:[#allocation3 + $0x68] sm:$0xff] %vm223_vm0, %v4970_v0 }
  0x2d   : > { %294 = vst.msk [vmem:[#allocation3 + $0x78] sm:$0xff] %vm223_vm0, %v4970_v0  ;;  %295 = vst.msk [vmem:[#allocation3 + $0x80] sm:$0xff] %vm223_vm0, %v4970_v0 }
  0x2e   : > { %297 = vst.msk [vmem:[#allocation3 + $0x90] sm:$0xff] %vm223_vm0, %v4970_v0  ;;  %298 = vst.msk [vmem:[#allocation3 + $0x98] sm:$0xff] %vm223_vm0, %v4970_v0 }
  0x2f   : > { %300 = vst.msk [vmem:[#allocation3 + $0xa8] sm:$0xff] %vm223_vm0, %v4970_v0  ;;  %301 = vst.msk [vmem:[#allocation3 + $0xb0] sm:$0xff] %vm223_vm0, %v4970_v0 }
  0x30   : > { %303 = vst.msk [vmem:[#allocation3 + $0xc0] sm:$0xff] %vm223_vm0, %v4970_v0  ;;  %304 = vst.msk [vmem:[#allocation3 + $0xc8] sm:$0xff] %vm223_vm0, %v4970_v0 }
  0x31   : > { %306 = vst.msk [vmem:[#allocation3 + $0xd8] sm:$0xff] %vm223_vm0, %v4970_v0  ;;  %307 = vst.msk [vmem:[#allocation3 + $0xe0] sm:$0xff] %vm223_vm0, %v4970_v0 }
  0x32   : > { %309 = vst.msk [vmem:[#allocation3 + $0xf0] sm:$0xff] %vm223_vm0, %v4970_v0  ;;  %310 = vst.msk [vmem:[#allocation3 + $0xf8] sm:$0xff] %vm223_vm0, %v4970_v0 }
  0x33   : > { %312 = vst.msk [vmem:[#allocation3 + $0x108] sm:$0xff] %vm223_vm0, %v4970_v0  ;;  %313 = vst.msk [vmem:[#allocation3 + $0x110] sm:$0xff] %vm223_vm0, %v4970_v0 }
  0x34   : > { %315 = vst.msk [vmem:[#allocation3 + $0x120] sm:$0xff] %vm223_vm0, %v4970_v0  ;;  %316 = vst.msk [vmem:[#allocation3 + $0x128] sm:$0xff] %vm223_vm0, %v4970_v0 }
  0x35   : > { %318 = vst.msk [vmem:[#allocation3 + $0x138] sm:$0xff] %vm223_vm0, %v4970_v0  ;;  %319 = vst.msk [vmem:[#allocation3 + $0x140] sm:$0xff] %vm223_vm0, %v4970_v0 }
  0x36   : > { %321 = vst.msk [vmem:[#allocation3 + $0x150] sm:$0xff] %vm223_vm0, %v4970_v0  ;;  %322 = vst.msk [vmem:[#allocation3 + $0x158] sm:$0xff] %vm223_vm0, %v4970_v0 }
  0x37   : > { %324 = vst.msk [vmem:[#allocation3 + $0x168] sm:$0xff] %vm223_vm0, %v4970_v0  ;;  %325 = vst.msk [vmem:[#allocation3 + $0x170] sm:$0xff] %vm223_vm0, %v4970_v0 }
  0x38   : > { %327 = vst.msk [vmem:[#allocation3 + $0x180] sm:$0xff] %vm223_vm0, %v4970_v0  ;;  %328 = vst.msk [vmem:[#allocation3 + $0x188] sm:$0xff] %vm223_vm0, %v4970_v0 }
  0x39   : > { %330 = vst.msk [vmem:[#allocation3 + $0x198] sm:$0xff] %vm223_vm0, %v4970_v0  ;;  %331 = vst.msk [vmem:[#allocation3 + $0x1a0] sm:$0xff] %vm223_vm0, %v4970_v0 }
  0x3a   : > { %230 = vst.msk [vmem:[#allocation2 + $0x28] sm:$0x3] %vm226_vm1, %v4970_v0  ;;  %227 = vst.msk [vmem:[#allocation2 + $0x10] sm:$0x3] %vm226_vm1, %v4970_v0 }
  0x3b   : > { %233 = vst.msk [vmem:[#allocation2 + $0x40] sm:$0x3] %vm226_vm1, %v4970_v0  ;;  %236 = vst.msk [vmem:[#allocation2 + $0x58] sm:$0x3] %vm226_vm1, %v4970_v0 }
  0x3c   : > { %239 = vst.msk [vmem:[#allocation2 + $0x70] sm:$0x3] %vm226_vm1, %v4970_v0  ;;  %242 = vst.msk [vmem:[#allocation2 + $0x88] sm:$0x3] %vm226_vm1, %v4970_v0 }
  0x3d   : > { %245 = vst.msk [vmem:[#allocation2 + $0xa0] sm:$0x3] %vm226_vm1, %v4970_v0  ;;  %248 = vst.msk [vmem:[#allocation2 + $0xb8] sm:$0x3] %vm226_vm1, %v4970_v0 }
  0x3e   : > { %251 = vst.msk [vmem:[#allocation2 + $0xd0] sm:$0x3] %vm226_vm1, %v4970_v0  ;;  %254 = vst.msk [vmem:[#allocation2 + $0xe8] sm:$0x3] %vm226_vm1, %v4970_v0 }
  0x3f   : > { %257 = vst.msk [vmem:[#allocation2 + $0x100] sm:$0x3] %vm226_vm1, %v4970_v0  ;;  %260 = vst.msk [vmem:[#allocation2 + $0x118] sm:$0x3] %vm226_vm1, %v4970_v0 }
  0x40   : > { %263 = vst.msk [vmem:[#allocation2 + $0x130] sm:$0x3] %vm226_vm1, %v4970_v0  ;;  %266 = vst.msk [vmem:[#allocation2 + $0x148] sm:$0x3] %vm226_vm1, %v4970_v0 }
  0x41   : > { %269 = vst.msk [vmem:[#allocation2 + $0x160] sm:$0x3] %vm226_vm1, %v4970_v0  ;;  %272 = vst.msk [vmem:[#allocation2 + $0x178] sm:$0x3] %vm226_vm1, %v4970_v0  ;;  %v467_v3 = vld [vmem:[#allocation2 + $0x9] sm:$0xff] }
  0x42   : > { %275 = vst.msk [vmem:[#allocation2 + $0x190] sm:$0x3] %vm226_vm1, %v4970_v0  ;;  %278 = vst.msk [vmem:[#allocation2 + $0x1a8] sm:$0x3] %vm226_vm1, %v4970_v0  ;;  %757 = vrot.lane.b32.xlu1 %v467_v3, %s4971_s10 }
  0x43   : > { %281 = vst.msk [vmem:[#allocation3 + $0x10] sm:$0x3] %vm226_vm1, %v4970_v0  ;;  %284 = vst.msk [vmem:[#allocation3 + $0x28] sm:$0x3] %vm226_vm1, %v4970_v0 }
  0x44   : > { %287 = vst.msk [vmem:[#allocation3 + $0x40] sm:$0x3] %vm226_vm1, %v4970_v0  ;;  %290 = vst.msk [vmem:[#allocation3 + $0x58] sm:$0x3] %vm226_vm1, %v4970_v0 }
  0x45   : > { %293 = vst.msk [vmem:[#allocation3 + $0x70] sm:$0x3] %vm226_vm1, %v4970_v0  ;;  %296 = vst.msk [vmem:[#allocation3 + $0x88] sm:$0x3] %vm226_vm1, %v4970_v0 }
  0x46   : > { %299 = vst.msk [vmem:[#allocation3 + $0xa0] sm:$0x3] %vm226_vm1, %v4970_v0  ;;  %302 = vst.msk [vmem:[#allocation3 + $0xb8] sm:$0x3] %vm226_vm1, %v4970_v0 }
  0x47   : > { %305 = vst.msk [vmem:[#allocation3 + $0xd0] sm:$0x3] %vm226_vm1, %v4970_v0  ;;  %308 = vst.msk [vmem:[#allocation3 + $0xe8] sm:$0x3] %vm226_vm1, %v4970_v0 }
  0x48   : > { %311 = vst.msk [vmem:[#allocation3 + $0x100] sm:$0x3] %vm226_vm1, %v4970_v0  ;;  %314 = vst.msk [vmem:[#allocation3 + $0x118] sm:$0x3] %vm226_vm1, %v4970_v0 }
  0x49   : > { %317 = vst.msk [vmem:[#allocation3 + $0x130] sm:$0x3] %vm226_vm1, %v4970_v0  ;;  %320 = vst.msk [vmem:[#allocation3 + $0x148] sm:$0x3] %vm226_vm1, %v4970_v0 }
  0x4a   : > { %323 = vst.msk [vmem:[#allocation3 + $0x160] sm:$0x3] %vm226_vm1, %v4970_v0  ;;  %326 = vst.msk [vmem:[#allocation3 + $0x178] sm:$0x3] %vm226_vm1, %v4970_v0 }
  0x4b   : > { %329 = vst.msk [vmem:[#allocation3 + $0x190] sm:$0x3] %vm226_vm1, %v4970_v0  ;;  %332 = vst.msk [vmem:[#allocation3 + $0x1a8] sm:$0x3] %vm226_vm1, %v4970_v0 }
  0x59   : > { %369 = vxpose.xlu0.b32.start.end [1/1] (short) %v335_v4, 128 }
  0x91   : > { %v5540_v4 = vpop.permute.xlu1 %755 }
  0x92   : > { %8378 = vst [vmem:[#allocation35_spill] sm:$0xff] %v5540_v4 }
  0x9c   : > { %v5288_v5 = vpop.trf.xlu0 }
  0x9d   : > { %8350 = vst [vmem:[#allocation7_spill] sm:$0xff] %v5288_v5  ;;  %402 = vst.msk [vmem:[#allocation2 + $0x19] sm:$0xff] %vm223_vm0, %v5288_v5 }
  0xa0   : > { %v5292_v6 = vpop.trf.xlu0 }
  0xa1   : > { %8351 = vst [vmem:[#allocation8_spill] sm:$0xff] %v5292_v6  ;;  %403 = vst.msk [vmem:[#allocation2 + $0x21] sm:$0xff] %vm223_vm0, %v5292_v6 }
  0xa4   : > { %v5296_v7 = vpop.trf.xlu0  ;;  %v5298_v8 = vld [vmem:[#allocation2 + $0x19] sm:$0xff] }
  0xa5   : > { %8352 = vst [vmem:[#allocation9_spill] sm:$0xff] %v5296_v7  ;;  %404 = vst.msk [vmem:[#allocation2 + $0x31] sm:$0xff] %vm223_vm0, %v5296_v7  ;;  %759 = vrot.lane.b32.xlu1 %v5298_v8, %s4971_s10 }
  0xa8   : > { %v5304_v9 = vpop.trf.xlu0  ;;  %v5306_v10 = vld [vmem:[#allocation2 + $0x21] sm:$0xff] }
  0xa9   : > { %8353 = vst [vmem:[#allocation10_spill] sm:$0xff] %v5304_v9  ;;  %405 = vst.msk [vmem:[#allocation2 + $0x39] sm:$0xff] %vm223_vm0, %v5304_v9  ;;  %761 = vrot.lane.b32.xlu1 %v5306_v10, %s4971_s10 }
  0xac   : > { %v5312_v11 = vpop.trf.xlu0  ;;  %v5314_v12 = vld [vmem:[#allocation2 + $0x31] sm:$0xff] }
  0xad   : > { %8354 = vst [vmem:[#allocation11_spill] sm:$0xff] %v5312_v11  ;;  %406 = vst.msk [vmem:[#allocation2 + $0x49] sm:$0xff] %vm223_vm0, %v5312_v11  ;;  %763 = vrot.lane.b32.xlu1 %v5314_v12, %s4971_s10 }
  0xb0   : > { %v5320_v13 = vpop.trf.xlu0  ;;  %v5322_v14 = vld [vmem:[#allocation2 + $0x39] sm:$0xff] }
  0xb1   : > { %8355 = vst [vmem:[#allocation12_spill] sm:$0xff] %v5320_v13  ;;  %407 = vst.msk [vmem:[#allocation2 + $0x51] sm:$0xff] %vm223_vm0, %v5320_v13  ;;  %765 = vrot.lane.b32.xlu1 %v5322_v14, %s4971_s10  ;;  %v5631_v13 = vld [vmem:[#allocation2 + $0x3a] sm:$0xff] }
  0xb4   : > { %v5328_v15 = vpop.trf.xlu0  ;;  %v5330_v16 = vld [vmem:[#allocation2 + $0x49] sm:$0xff] }
  0xb5   : > { %8356 = vst [vmem:[#allocation13_spill] sm:$0xff] %v5328_v15  ;;  %408 = vst.msk [vmem:[#allocation2 + $0x61] sm:$0xff] %vm223_vm0, %v5328_v15  ;;  %767 = vrot.lane.b32.xlu1 %v5330_v16, %s4971_s10 }
  0xb8   : > { %v5336_v17 = vpop.trf.xlu0  ;;  %v5338_v18 = vld [vmem:[#allocation2 + $0x51] sm:$0xff] }
  0xb9   : > { %8357 = vst [vmem:[#allocation14_spill] sm:$0xff] %v5336_v17  ;;  %409 = vst.msk [vmem:[#allocation2 + $0x69] sm:$0xff] %vm223_vm0, %v5336_v17  ;;  %769 = vrot.lane.b32.xlu1 %v5338_v18, %s4971_s10  ;;  %v5641_v7 = vld [vmem:[#allocation2 + $0x4a] sm:$0xff] }
  0xbc   : > { %v5344_v19 = vpop.trf.xlu0  ;;  %v5346_v20 = vld [vmem:[#allocation2 + $0x61] sm:$0xff] }
  0xbd   : > { %8358 = vst [vmem:[#allocation15_spill] sm:$0xff] %v5344_v19  ;;  %410 = vst.msk [vmem:[#allocation2 + $0x79] sm:$0xff] %vm223_vm0, %v5344_v19  ;;  %771 = vrot.lane.b32.xlu1 %v5346_v20, %s4971_s10  ;;  %v5621_v19 = vld [vmem:[#allocation2 + $0x32] sm:$0xff] }
  0xc0   : > { %v5352_v21 = vpop.trf.xlu0  ;;  %v5354_v22 = vld [vmem:[#allocation2 + $0x69] sm:$0xff] }
  0xc1   : > { %8359 = vst [vmem:[#allocation16_spill] sm:$0xff] %v5352_v21  ;;  %411 = vst.msk [vmem:[#allocation2 + $0x81] sm:$0xff] %vm223_vm0, %v5352_v21  ;;  %773 = vrot.lane.b32.xlu1 %v5354_v22, %s4971_s10 }
  0xc4   : > { %v5360_v23 = vpop.trf.xlu0  ;;  %v5362_v24 = vld [vmem:[#allocation2 + $0x79] sm:$0xff] }
  0xc5   : > { %8360 = vst [vmem:[#allocation17_spill] sm:$0xff] %v5360_v23  ;;  %412 = vst.msk [vmem:[#allocation2 + $0x91] sm:$0xff] %vm223_vm0, %v5360_v23  ;;  %775 = vrot.lane.b32.xlu1 %v5362_v24, %s4971_s10  ;;  %v5611_v23 = vld [vmem:[#allocation2 + $0x22] sm:$0xff] }
  0xc8   : > { %v5368_v25 = vpop.trf.xlu0  ;;  %v5370_v26 = vld [vmem:[#allocation2 + $0x81] sm:$0xff] }
  0xc9   : > { %8361 = vst [vmem:[#allocation18_spill] sm:$0xff] %v5368_v25  ;;  %413 = vst.msk [vmem:[#allocation2 + $0x99] sm:$0xff] %vm223_vm0, %v5368_v25  ;;  %777 = vrot.lane.b32.xlu1 %v5370_v26, %s4971_s10  ;;  %v5426_v40 = vld [vmem:[#allocation2 + $0x82] sm:$0xff]  ;;  %v5601_v25 = vld [vmem:[#allocation2 + $0x1a] sm:$0xff] }
  0xca   : > { %v5619_v21 = vld [vmem:[#allocation2 + $0x80] sm:$0xff] }
  0xcc   : > { %v5376_v27 = vpop.trf.xlu0  ;;  %v5378_v28 = vld [vmem:[#allocation2 + $0x91] sm:$0xff] }
  0xcd   : > { %8362 = vst [vmem:[#allocation19_spill] sm:$0xff] %v5376_v27  ;;  %414 = vst.msk [vmem:[#allocation2 + $0xa9] sm:$0xff] %vm223_vm0, %v5376_v27  ;;  %779 = vrot.lane.b32.xlu1 %v5378_v28, %s4971_s10  ;;  %v5599_v27 = vld [vmem:[#allocation2 + $0x50] sm:$0xff] }
  0xd0   : > { %v5384_v29 = vpop.trf.xlu0  ;;  %v5386_v30 = vld [vmem:[#allocation2 + $0x99] sm:$0xff] }
  0xd1   : > { %8363 = vst [vmem:[#allocation20_spill] sm:$0xff] %v5384_v29  ;;  %415 = vst.msk [vmem:[#allocation2 + $0xb1] sm:$0xff] %vm223_vm0, %v5384_v29  ;;  %781 = vrot.lane.b32.xlu1 %v5386_v30, %s4971_s10  ;;  %v5438_v43 = vld [vmem:[#allocation2 + $0x9a] sm:$0xff] }
  0xd2   : > { %v5592_v29 = vld [vmem:[#allocation2 + $0x38] sm:$0xff] }
  0xd3   : > { %v5629_v15 = vld [vmem:[#allocation2 + $0x98] sm:$0xff] }
  0xd4   : > { %v5392_v31 = vpop.trf.xlu0  ;;  %v5394_v32 = vld [vmem:[#allocation2 + $0xa9] sm:$0xff] }
  0xd5   : > { %8364 = vst [vmem:[#allocation21_spill] sm:$0xff] %v5392_v31  ;;  %416 = vst.msk [vmem:[#allocation2 + $0xc1] sm:$0xff] %vm223_vm0, %v5392_v31  ;;  %783 = vrot.lane.b32.xlu1 %v5394_v32, %s4971_s10 }
  0xd8   : > { %v5400_v33 = vpop.trf.xlu0  ;;  %v5402_v34 = vld [vmem:[#allocation2 + $0xb1] sm:$0xff] }
  0xd9   : > { %8365 = vst [vmem:[#allocation22_spill] sm:$0xff] %v5400_v33  ;;  %417 = vst.msk [vmem:[#allocation2 + $0xc9] sm:$0xff] %vm223_vm0, %v5400_v33  ;;  %785 = vrot.lane.b32.xlu1 %v5402_v34, %s4971_s10  ;;  %v5450_v46 = vld [vmem:[#allocation2 + $0xb2] sm:$0xff]  ;;  %v499_v33 = vld [vmem:[#allocation2 + $0xa] sm:$0xff] }
  0xda   : > { %v5639_v9 = vld [vmem:[#allocation2 + $0xb0] sm:$0xff] }
  0xdc   : > { %v5408_v35 = vpop.trf.xlu0  ;;  %v5410_v36 = vld [vmem:[#allocation2 + $0xc1] sm:$0xff] }
  0xdd   : > { %8366 = vst [vmem:[#allocation23_spill] sm:$0xff] %v5408_v35  ;;  %418 = vst.msk [vmem:[#allocation2 + $0xd9] sm:$0xff] %vm223_vm0, %v5408_v35  ;;  %787 = vrot.lane.b32.xlu1 %v5410_v36, %s4971_s10 }
  0xe0   : > { %v5416_v37 = vpop.trf.xlu0  ;;  %v5418_v38 = vld [vmem:[#allocation2 + $0xc9] sm:$0xff] }
  0xe1   : > { %8367 = vst [vmem:[#allocation24_spill] sm:$0xff] %v5416_v37  ;;  %419 = vst.msk [vmem:[#allocation2 + $0xe1] sm:$0xff] %vm223_vm0, %v5416_v37  ;;  %789 = vrot.lane.b32.xlu0 %v5418_v38, %s4971_s10  ;;  %v5462_v49 = vld [vmem:[#allocation2 + $0xca] sm:$0xff]  ;;  %v498_v37 = vld [vmem:[#allocation2 + $0x2] sm:$0xff] }
  0xe2   : > { %v5649_v5 = vld [vmem:[#allocation2 + $0xc8] sm:$0xff] }
  0xe4   : > { %v5424_v39 = vpop.trf.xlu0  ;;  %v5428_v41 = vld [vmem:[#allocation2 + $0xd9] sm:$0xff] }
  0xe5   : > { %8368 = vst [vmem:[#allocation25_spill] sm:$0xff] %v5424_v39  ;;  %420 = vst.msk [vmem:[#allocation2 + $0xf1] sm:$0xff] %vm223_vm0, %v5424_v39  ;;  %905 = vrot.lane.b32.xlu0 %v5426_v40, %s4972_s11  ;;  %791 = vrot.lane.b32.xlu1 %v5428_v41, %s4971_s10 }
  0xe8   : > { %v5436_v42 = vpop.trf.xlu0  ;;  %v5440_v44 = vld [vmem:[#allocation2 + $0xe1] sm:$0xff] }
  0xe9   : > { %8369 = vst [vmem:[#allocation26_spill] sm:$0xff] %v5436_v42  ;;  %421 = vst.msk [vmem:[#allocation2 + $0xf9] sm:$0xff] %vm223_vm0, %v5436_v42  ;;  %909 = vrot.lane.b32.xlu0 %v5438_v43, %s4972_s11  ;;  %793 = vrot.lane.b32.xlu1 %v5440_v44, %s4971_s10  ;;  %v5474_v52 = vld [vmem:[#allocation2 + $0xe2] sm:$0xff] }
  0xec   : > { %v5448_v45 = vpop.trf.xlu0  ;;  %v5452_v47 = vld [vmem:[#allocation2 + $0xf1] sm:$0xff] }
  0xed   : > { %8370 = vst [vmem:[#allocation27_spill] sm:$0xff] %v5448_v45  ;;  %422 = vst.msk [vmem:[#allocation2 + $0x109] sm:$0xff] %vm223_vm0, %v5448_v45  ;;  %913 = vrot.lane.b32.xlu0 %v5450_v46, %s4972_s11  ;;  %795 = vrot.lane.b32.xlu1 %v5452_v47, %s4971_s10 }
  0xf0   : > { %v5460_v48 = vpop.trf.xlu0  ;;  %v5464_v50 = vld [vmem:[#allocation2 + $0xf9] sm:$0xff] }
  0xf1   : > { %8371 = vst [vmem:[#allocation28_spill] sm:$0xff] %v5460_v48  ;;  %423 = vst.msk [vmem:[#allocation2 + $0x111] sm:$0xff] %vm223_vm0, %v5460_v48  ;;  %917 = vrot.lane.b32.xlu0 %v5462_v49, %s4972_s11  ;;  %797 = vrot.lane.b32.xlu1 %v5464_v50, %s4971_s10  ;;  %v5486_v55 = vld [vmem:[#allocation2 + $0xfa] sm:$0xff] }
  0xf4   : > { %v5472_v51 = vpop.trf.xlu0  ;;  %v5476_v53 = vld [vmem:[#allocation2 + $0x109] sm:$0xff] }
  0xf5   : > { %8372 = vst [vmem:[#allocation29_spill] sm:$0xff] %v5472_v51  ;;  %424 = vst.msk [vmem:[#allocation2 + $0x121] sm:$0xff] %vm223_vm0, %v5472_v51  ;;  %921 = vrot.lane.b32.xlu0 %v5474_v52, %s4972_s11  ;;  %799 = vrot.lane.b32.xlu1 %v5476_v53, %s4971_s10  ;;  %v5562_v51 = vpop.permute.xlu1 %757 }
  0xf6   : > { %8381 = vst [vmem:[#allocation38_spill] sm:$0xff] %v5562_v51  ;;  %v5691_v51 = vld [vmem:[#allocation2 + $0x92] sm:$0xff] }
  0xf7   : > { %8402 = vst [vmem:[#allocation59_spill] sm:$0xff] %v5691_v51 }
  0xf8   : > { %v5484_v54 = vpop.trf.xlu0  ;;  %v5488_v56 = vld [vmem:[#allocation2 + $0x111] sm:$0xff] }
  0xf9   : > { %8373 = vst [vmem:[#allocation30_spill] sm:$0xff] %v5484_v54  ;;  %425 = vst.msk [vmem:[#allocation2 + $0x129] sm:$0xff] %vm223_vm0, %v5484_v54  ;;  %925 = vrot.lane.b32.xlu0 %v5486_v55, %s4972_s11  ;;  %801 = vrot.lane.b32.xlu1 %v5488_v56, %s4971_s10  ;;  %v5498_v58 = vld [vmem:[#allocation2 + $0x112] sm:$0xff] }
  0xfc   : > { %v5496_v57 = vpop.trf.xlu0  ;;  %v5500_v59 = vld [vmem:[#allocation2 + $0x121] sm:$0xff] }
  0xfd   : > { %8374 = vst [vmem:[#allocation31_spill] sm:$0xff] %v5496_v57  ;;  %426 = vst.msk [vmem:[#allocation2 + $0x139] sm:$0xff] %vm223_vm0, %v5496_v57  ;;  %929 = vrot.lane.b32.xlu0 %v5498_v58, %s4972_s11  ;;  %803 = vrot.lane.b32.xlu1 %v5500_v59, %s4971_s10 }
 0x100   : > { %v5508_v60 = vpop.trf.xlu0  ;;  %v5510_v61 = vld [vmem:[#allocation2 + $0x12a] sm:$0xff] }
 0x101   : > { %8375 = vst [vmem:[#allocation32_spill] sm:$0xff] %v5508_v60  ;;  %v5512_v62 = vld [vmem:[#allocation2 + $0x129] sm:$0xff]  ;;  %427 = vst.msk [vmem:[#allocation2 + $0x141] sm:$0xff] %vm223_vm0, %v5508_v60  ;;  %933 = vrot.lane.b32.xlu0 %v5510_v61, %s4972_s11 }
 0x102   : > { %805 = vrot.lane.b32.xlu1 %v5512_v62, %s4971_s10  ;;  %v5689_v4 = vld [vmem:[#allocation2 + $0x128] sm:$0xff] }
 0x103   : > { %8401 = vst [vmem:[#allocation58_spill] sm:$0xff] %v5689_v4 }
 0x104   : > { %v5520_v63 = vpop.trf.xlu0  ;;  %v5522_v0 = vld [vmem:[#allocation2 + $0x139] sm:$0xff] }
 0x105   : > { %8376 = vst [vmem:[#allocation33_spill] sm:$0xff] %v5520_v63  ;;  %428 = vst.msk [vmem:[#allocation2 + $0x151] sm:$0xff] %vm223_vm0, %v5520_v63 }
 0x106   : > { %807 = vrot.lane.b32.xlu1 %v5522_v0, %s4971_s10 }
 0x108   : > { %v5528_v1 = vpop.trf.xlu0  ;;  %v5530_v2 = vld [vmem:[#allocation2 + $0x142] sm:$0xff] }
 0x109   : > { %8377 = vst [vmem:[#allocation34_spill] sm:$0xff] %v5528_v1  ;;  %v5532_v3 = vld [vmem:[#allocation2 + $0x141] sm:$0xff]  ;;  %429 = vst.msk [vmem:[#allocation2 + $0x159] sm:$0xff] %vm223_vm0, %v5528_v1  ;;  %937 = vrot.lane.b32.xlu0 %v5530_v2, %s4972_s11 }
 0x10a   : > { %809 = vrot.lane.b32.xlu1 %v5532_v3, %s4971_s10 }
 0x10c   : > { %v5542_v63 = vpop.trf.xlu0  ;;  %v5544_v60 = vld [vmem:[#allocation2 + $0x151] sm:$0xff] }
 0x10d   : > { %8379 = vst [vmem:[#allocation36_spill] sm:$0xff] %v5542_v63  ;;  %430 = vst.msk [vmem:[#allocation2 + $0x169] sm:$0xff] %vm223_vm0, %v5542_v63 }
 0x10e   : > { %811 = vrot.lane.b32.xlu1 %v5544_v60, %s4971_s10 }
 0x110   : > { %v5550_v57 = vpop.trf.xlu0  ;;  %v5552_v1 = vld [vmem:[#allocation2 + $0x15a] sm:$0xff] }
 0x111   : > { %8380 = vst [vmem:[#allocation37_spill] sm:$0xff] %v5550_v57  ;;  %v5554_v54 = vld [vmem:[#allocation2 + $0x159] sm:$0xff]  ;;  %431 = vst.msk [vmem:[#allocation2 + $0x171] sm:$0xff] %vm223_vm0, %v5550_v57  ;;  %941 = vrot.lane.b32.xlu0 %v5552_v1, %s4972_s11 }
 0x112   : > { %813 = vrot.lane.b32.xlu1 %v5554_v54, %s4971_s10 }
 0x114   : > { %v5564_v63 = vld [vmem:[#allocation2 + $0x169] sm:$0xff]  ;;  %v5566_v48 = vpop.trf.xlu0 }
 0x115   : > { %8382 = vst [vmem:[#allocation39_spill] sm:$0xff] %v5566_v48  ;;  %432 = vst.msk [vmem:[#allocation2 + $0x181] sm:$0xff] %vm223_vm0, %v5566_v48  ;;  %v437_v48 = vld [vmem:[#allocation2 + $0x20] sm:$0xff] }
 0x116   : > { %815 = vrot.lane.b32.xlu1 %v5564_v63, %s4971_s10 }
 0x117   : > { %v5572_v45 = vpop.permute.xlu1 %759 }
 0x118   : > { %8383 = vst [vmem:[#allocation40_spill] sm:$0xff] %v5572_v45  ;;  %v5574_v57 = vld [vmem:[#allocation2 + $0x172] sm:$0xff]  ;;  %v5578_v39 = vpop.trf.xlu0  ;;  %v5681_v45 = vld [vmem:[#allocation2 + $0x7a] sm:$0xff] }
 0x119   : > { %v5576_v42 = vld [vmem:[#allocation2 + $0x171] sm:$0xff]  ;;  %8384 = vst [vmem:[#allocation41_spill] sm:$0xff] %v5578_v39  ;;  %945 = vrot.lane.b32.xlu0 %v5574_v57, %s4972_s11  ;;  %433 = vst.msk [vmem:[#allocation2 + $0x189] sm:$0xff] %vm223_vm0, %v5578_v39 }
 0x11a   : > { %817 = vrot.lane.b32.xlu1 %v5576_v42, %s4971_s10  ;;  %8399 = vst [vmem:[#allocation56_spill] sm:$0xff] %v5681_v45 }
 0x11b   : > { %v5586_v35 = vpop.permute.xlu1 %761 }
 0x11c   : > { %8385 = vst [vmem:[#allocation42_spill] sm:$0xff] %v5586_v35  ;;  %v5679_v35 = vld [vmem:[#allocation2 + $0x110] sm:$0xff] }
 0x11d   : > { %1013 = vrot.lane.b32.xlu0 %v437_v48, %s4973_s12  ;;  %v5609_v48 = vld [vmem:[#allocation2 + $0x68] sm:$0xff]  ;;  %8398 = vst [vmem:[#allocation55_spill] sm:$0xff] %v5679_v35 }
 0x11e   : > { %883 = vrot.lane.b32.xlu1 %v498_v37, %s4972_s11 }
 0x11f   : > { %v5590_v31 = vpop.permute.xlu1 %763 }
 0x120   : > { %8386 = vst [vmem:[#allocation43_spill] sm:$0xff] %v5590_v31  ;;  %v5671_v31 = vld [vmem:[#allocation2 + $0x6a] sm:$0xff] }
 0x121   : > { %1017 = vrot.lane.b32.xlu0 %v5592_v29, %s4973_s12 }
 0x122   : > { %885 = vrot.lane.b32.xlu1 %v499_v33, %s4972_s11 }
 0x123   : > { %v5597_v39 = vpop.permute.xlu1 %765 }
 0x124   : > { %8387 = vst [vmem:[#allocation44_spill] sm:$0xff] %v5597_v39  ;;  %v5669_v39 = vld [vmem:[#allocation2 + $0xf8] sm:$0xff] }
 0x125   : > { %1021 = vrot.lane.b32.xlu0 %v5599_v27, %s4973_s12  ;;  %8396 = vst [vmem:[#allocation53_spill] sm:$0xff] %v5669_v39 }
 0x126   : > { %887 = vrot.lane.b32.xlu1 %v5601_v25, %s4972_s11 }
 0x127   : > { %v5607_v37 = vpop.permute.xlu1 %767 }
 0x128   : > { %8388 = vst [vmem:[#allocation45_spill] sm:$0xff] %v5607_v37  ;;  %v5661_v37 = vld [vmem:[#allocation2 + $0x62] sm:$0xff] }
 0x129   : > { %1025 = vrot.lane.b32.xlu0 %v5609_v48, %s4973_s12  ;;  %8394 = vst [vmem:[#allocation51_spill] sm:$0xff] %v5661_v37 }
 0x12a   : > { %889 = vrot.lane.b32.xlu1 %v5611_v23, %s4972_s11 }
 0x12b   : > { %v5617_v33 = vpop.permute.xlu1 %769 }
 0x12c   : > { %8389 = vst [vmem:[#allocation46_spill] sm:$0xff] %v5617_v33  ;;  %v5659_v33 = vld [vmem:[#allocation2 + $0xe0] sm:$0xff] }
 0x12d   : > { %1029 = vrot.lane.b32.xlu0 %v5619_v21, %s4973_s12 }
 0x12e   : > { %891 = vrot.lane.b32.xlu1 %v5621_v19, %s4972_s11 }
 0x12f   : > { %v5627_v17 = vpop.permute.xlu1 %771 }
 0x130   : > { %8390 = vst [vmem:[#allocation47_spill] sm:$0xff] %v5627_v17  ;;  %v5651_v17 = vld [vmem:[#allocation2 + $0x52] sm:$0xff] }
 0x131   : > { %1033 = vrot.lane.b32.xlu0 %v5629_v15, %s4973_s12 }
 0x132   : > { %893 = vrot.lane.b32.xlu1 %v5631_v13, %s4972_s11 }
 0x133   : > { %v5637_v11 = vpop.permute.xlu1 %773 }
 0x134   : > { %8391 = vst [vmem:[#allocation48_spill] sm:$0xff] %v5637_v11 }
 0x135   : > { %1037 = vrot.lane.b32.xlu0 %v5639_v9, %s4973_s12 }
 0x136   : > { %895 = vrot.lane.b32.xlu1 %v5641_v7, %s4972_s11 }
 0x137   : > { %v5647_v6 = vpop.permute.xlu1 %775 }
 0x138   : > { %8392 = vst [vmem:[#allocation49_spill] sm:$0xff] %v5647_v6 }
 0x139   : > { %1041 = vrot.lane.b32.xlu0 %v5649_v5, %s4973_s12 }
 0x13a   : > { %897 = vrot.lane.b32.xlu1 %v5651_v17, %s4972_s11 }
 0x13b   : > { %v5657_v11 = vpop.permute.xlu1 %777 }
 0x13c   : > { %8393 = vst [vmem:[#allocation50_spill] sm:$0xff] %v5657_v11 }
 0x13d   : > { %1045 = vrot.lane.b32.xlu0 %v5659_v33, %s4973_s12 }
 0x13e   : > { %899 = vrot.lane.b32.xlu1 %v5661_v37, %s4972_s11 }
 0x13f   : > { %v5667_v6 = vpop.permute.xlu1 %779 }
 0x140   : > { %8395 = vst [vmem:[#allocation52_spill] sm:$0xff] %v5667_v6 }
 0x141   : > { %1049 = vrot.lane.b32.xlu0 %v5669_v39, %s4973_s12  ;;  %v5699_v39 = vld [vmem:[#allocation2 + $0xaa] sm:$0xff] }
 0x142   : > { %901 = vrot.lane.b32.xlu1 %v5671_v31, %s4972_s11  ;;  %8404 = vst [vmem:[#allocation61_spill] sm:$0xff] %v5699_v39 }
 0x143   : > { %v5677_v11 = vpop.permute.xlu1 %781 }
 0x144   : > { %8397 = vst [vmem:[#allocation54_spill] sm:$0xff] %v5677_v11  ;;  %v5697_v11 = vld [vmem:[#allocation2 + $0x140] sm:$0xff] }
 0x145   : > { %1053 = vrot.lane.b32.xlu0 %v5679_v35, %s4973_s12  ;;  %8403 = vst [vmem:[#allocation60_spill] sm:$0xff] %v5697_v11 }
 0x146   : > { %903 = vrot.lane.b32.xlu1 %v5681_v45, %s4972_s11  ;;  %v5709_v45 = vld [vmem:[#allocation2 + $0xc2] sm:$0xff] }
 0x147   : > { %v5687_v6 = vpop.permute.xlu1 %783  ;;  %8407 = vst [vmem:[#allocation64_spill] sm:$0xff] %v5709_v45 }
 0x148   : > { %8400 = vst [vmem:[#allocation57_spill] sm:$0xff] %v5687_v6  ;;  %v5707_v6 = vld [vmem:[#allocation2 + $0x158] sm:$0xff] }
 0x149   : > { %1057 = vrot.lane.b32.xlu0 %v5689_v4, %s4973_s12  ;;  %8406 = vst [vmem:[#allocation63_spill] sm:$0xff] %v5707_v6 }
 0x14a   : > { %907 = vrot.lane.b32.xlu1 %v5691_v51, %s4972_s11 }
 0x14b   : > { %v5701_v35 = vpop.permute.xlu1 %785 }
 0x14c   : > { %8405 = vst [vmem:[#allocation62_spill] sm:$0xff] %v5701_v35  ;;  %v5719_v35 = vld [vmem:[#allocation2 + $0x170] sm:$0xff] }
 0x14d   : > { %1061 = vrot.lane.b32.xlu0 %v5697_v11, %s4973_s12  ;;  %8410 = vst [vmem:[#allocation67_spill] sm:$0xff] %v5719_v35  ;;  %v5721_v11 = vld [vmem:[#allocation2 + $0xda] sm:$0xff] }
 0x14e   : > { %911 = vrot.lane.b32.xlu1 %v5699_v39, %s4972_s11  ;;  %v5727_v39 = vld [vmem:[#allocation2 + $0x188] sm:$0xff] }
 0x14f   : > { %v5715_v4 = vpop.permute.xlu1 %787 }
 0x150   : > { %8408 = vst [vmem:[#allocation65_spill] sm:$0xff] %v5715_v4 }
 0x151   : > { %1065 = vrot.lane.b32.xlu0 %v5707_v6, %s4973_s12 }
 0x152   : > { %915 = vrot.lane.b32.xlu1 %v5709_v45, %s4972_s11  ;;  %v5733_v45 = vld [vmem:[#allocation2 + $0xf2] sm:$0xff] }
 0x153   : > { %v5717_v51 = vpop.permute.xlu0 %789  ;;  %8413 = vst [vmem:[#allocation70_spill] sm:$0xff] %v5733_v45 }
 0x154   : > { %8409 = vst [vmem:[#allocation66_spill] sm:$0xff] %v5717_v51 }
 0x155   : > { %1069 = vrot.lane.b32.xlu0 %v5719_v35, %s4973_s12  ;;  %v5743_v35 = vld [vmem:[#allocation2 + $0x10a] sm:$0xff] }
 0x156   : > { %919 = vrot.lane.b32.xlu1 %v5721_v11, %s4972_s11 }
 0x157   : > { %v5729_v6 = vpop.permute.xlu1 %791  ;;  %v5731_v37 = vpop.permute.xlu0 %905 }
 0x158   : > { %8411 = vst [vmem:[#allocation68_spill] sm:$0xff] %v5729_v6  ;;  %8412 = vst [vmem:[#allocation69_spill] sm:$0xff] %v5731_v37  ;;  %v5751_v37 = vld [vmem:[#allocation2 + $0x122] sm:$0xff] }
 0x159   : > { %1073 = vrot.lane.b32.xlu0 %v5727_v39, %s4973_s12 }
 0x15a   : > { %923 = vrot.lane.b32.xlu1 %v5733_v45, %s4972_s11 }
 0x15b   : > { %v5739_v51 = vpop.permute.xlu1 %793  ;;  %v5741_v4 = vpop.permute.xlu0 %909 }
 0x15c   : > { %8414 = vst [vmem:[#allocation71_spill] sm:$0xff] %v5739_v51  ;;  %8415 = vst [vmem:[#allocation72_spill] sm:$0xff] %v5741_v4  ;;  %v5761_v4 = vld [vmem:[#allocation2 + $0x13a] sm:$0xff] }
 0x15d   : > { %1141 = vrot.lane.b32.xlu0 %v5306_v10, %s4974_s13  ;;  %8419 = vst [vmem:[#allocation76_spill] sm:$0xff] %v5761_v4 }
 0x15e   : > { %927 = vrot.lane.b32.xlu1 %v5743_v35, %s4972_s11 }
 0x15f   : > { %v5749_v6 = vpop.permute.xlu1 %795  ;;  %v5753_v45 = vpop.permute.xlu0 %913 }
 0x160   : > { %8416 = vst [vmem:[#allocation73_spill] sm:$0xff] %v5749_v6  ;;  %8417 = vst [vmem:[#allocation74_spill] sm:$0xff] %v5753_v45  ;;  %v5771_v45 = vld [vmem:[#allocation2 + $0x152] sm:$0xff] }
 0x161   : > { %1145 = vrot.lane.b32.xlu0 %v5322_v14, %s4974_s13 }
 0x162   : > { %931 = vrot.lane.b32.xlu1 %v5751_v37, %s4972_s11 }
 0x163   : > { %v5759_v51 = vpop.permute.xlu1 %797  ;;  %v5767_v10 = vpop.permute.xlu0 %917 }
 0x164   : > { %8418 = vst [vmem:[#allocation75_spill] sm:$0xff] %v5759_v51  ;;  %8420 = vst [vmem:[#allocation77_spill] sm:$0xff] %v5767_v10  ;;  %v5779_v51 = vld [vmem:[#allocation2 + $0x16a] sm:$0xff] }
 0x165   : > { %1149 = vrot.lane.b32.xlu0 %v5338_v18, %s4974_s13 }
 0x166   : > { %935 = vrot.lane.b32.xlu1 %v5761_v4, %s4972_s11 }
 0x167   : > { %v5769_v6 = vpop.permute.xlu1 %799  ;;  %v5781_v4 = vpop.permute.xlu0 %921 }
 0x168   : > { %8421 = vst [vmem:[#allocation78_spill] sm:$0xff] %v5769_v6  ;;  %8423 = vst [vmem:[#allocation80_spill] sm:$0xff] %v5781_v4  ;;  %v5789_v6 = vld [vmem:[#allocation2 + $0x18] sm:$0xff]  ;;  %v5799_v4 = vld [vmem:[#allocation2 + $0x30] sm:$0xff] }
 0x169   : > { %1153 = vrot.lane.b32.xlu0 %v5354_v22, %s4974_s13 }
 0x16a   : > { %939 = vrot.lane.b32.xlu1 %v5771_v45, %s4972_s11 }
 0x16b   : > { %v5777_v14 = vpop.permute.xlu1 %801  ;;  %v5795_v22 = vpop.permute.xlu0 %925 }
 0x16c   : > { %8422 = vst [vmem:[#allocation79_spill] sm:$0xff] %v5777_v14  ;;  %8425 = vst [vmem:[#allocation82_spill] sm:$0xff] %v5795_v22  ;;  %v444_v22 = vld [vmem:[#allocation2 + $0x78] sm:$0xff] }
 0x16d   : > { %1157 = vrot.lane.b32.xlu0 %v5370_v26, %s4974_s13 }
 0x16e   : > { %943 = vrot.lane.b32.xlu1 %v5779_v51, %s4972_s11 }
 0x16f   : > { %v5787_v18 = vpop.permute.xlu1 %803  ;;  %v5809_v10 = vpop.permute.xlu0 %929 }
 0x170   : > { %8424 = vst [vmem:[#allocation81_spill] sm:$0xff] %v5787_v18  ;;  %v5807_v18 = vld [vmem:[#allocation2 + $0x48] sm:$0xff]  ;;  %8429 = vst [vmem:[#allocation86_spill] sm:$0xff] %v5809_v10 }
 0x171   : > { %1161 = vrot.lane.b32.xlu0 %v5386_v30, %s4974_s13  ;;  %8428 = vst [vmem:[#allocation85_spill] sm:$0xff] %v5807_v18 }
 0x172   : > { %1011 = vrot.lane.b32.xlu1 %v5789_v6, %s4973_s12 }
 0x174   : > { %v5797_v14 = vpop.permute.xlu1 %805 }
 0x175   : > { %8426 = vst [vmem:[#allocation83_spill] sm:$0xff] %v5797_v14  ;;  %1165 = vrot.lane.b32.xlu0 %v5402_v34, %s4974_s13  ;;  %v442_v14 = vld [vmem:[#allocation2 + $0x60] sm:$0xff]  ;;  %v5820_v34 = vpop.permute.xlu0 %933 }
 0x176   : > { %1015 = vrot.lane.b32.xlu1 %v5799_v4, %s4973_s12  ;;  %8431 = vst [vmem:[#allocation88_spill] sm:$0xff] %v5820_v34  ;;  %v5884_v34 = vld [vmem:[#allocation2 + $0x120] sm:$0xff] }
 0x178   : > { %v5805_v26 = vpop.permute.xlu1 %807 }
 0x179   : > { %8427 = vst [vmem:[#allocation84_spill] sm:$0xff] %v5805_v26  ;;  %1169 = vrot.lane.b32.xlu0 %v5418_v38, %s4974_s13 }
 0x17a   : > { %1019 = vrot.lane.b32.xlu1 %v5807_v18, %s4973_s12  ;;  %v5894_v18 = vld [vmem:[#allocation2 + $0x138] sm:$0xff] }
 0x17b   : > { %v5827_v10 = vpop.permute.xlu0 %937 }
 0x17c   : > { %v5815_v30 = vpop.permute.xlu1 %809  ;;  %8433 = vst [vmem:[#allocation90_spill] sm:$0xff] %v5827_v10 }
 0x17d   : > { %8430 = vst [vmem:[#allocation87_spill] sm:$0xff] %v5815_v30  ;;  %1173 = vrot.lane.b32.xlu0 %v5440_v44, %s4974_s13  ;;  %v446_v30 = vld [vmem:[#allocation2 + $0x90] sm:$0xff] }
 0x17e   : > { %1023 = vrot.lane.b32.xlu1 %v442_v14, %s4973_s12 }
 0x180   : > { %v5822_v26 = vpop.permute.xlu1 %811 }
 0x181   : > { %8432 = vst [vmem:[#allocation89_spill] sm:$0xff] %v5822_v26  ;;  %1177 = vrot.lane.b32.xlu0 %v5464_v50, %s4974_s13  ;;  %v448_v26 = vld [vmem:[#allocation2 + $0xa8] sm:$0xff] }
 0x182   : > { %1027 = vrot.lane.b32.xlu1 %v444_v22, %s4973_s12 }
 0x183   : > { %v5834_v44 = vpop.permute.xlu0 %941 }
 0x184   : > { %v5829_v38 = vpop.permute.xlu1 %813  ;;  %8435 = vst [vmem:[#allocation92_spill] sm:$0xff] %v5834_v44  ;;  %v5874_v44 = vld [vmem:[#allocation2 + $0x108] sm:$0xff] }
 0x185   : > { %8434 = vst [vmem:[#allocation91_spill] sm:$0xff] %v5829_v38  ;;  %1181 = vrot.lane.b32.xlu0 %v5488_v56, %s4974_s13  ;;  %v450_v38 = vld [vmem:[#allocation2 + $0xc0] sm:$0xff] }
 0x186   : > { %1031 = vrot.lane.b32.xlu1 %v446_v30, %s4973_s12 }
 0x188   : > { %v5836_v14 = vpop.permute.xlu1 %815 }
 0x189   : > { %8436 = vst [vmem:[#allocation93_spill] sm:$0xff] %v5836_v14  ;;  %1185 = vrot.lane.b32.xlu0 %v5512_v62, %s4974_s13  ;;  %v5852_v14 = vld [vmem:[#allocation2 + $0xd8] sm:$0xff] }
 0x18a   : > { %1035 = vrot.lane.b32.xlu1 %v448_v26, %s4973_s12 }
 0x18b   : > { %v5843_v22 = vpop.permute.xlu0 %945 }
 0x18c   : > { %v5841_v50 = vpop.permute.xlu1 %817  ;;  %8438 = vst [vmem:[#allocation95_spill] sm:$0xff] %v5843_v22 }
 0x18d   : > { %8437 = vst [vmem:[#allocation94_spill] sm:$0xff] %v5841_v50  ;;  %1189 = vrot.lane.b32.xlu0 %v5532_v3, %s4974_s13  ;;  %v5868_v3 = vld [vmem:[#allocation2 + $0x189] sm:$0xff] }
 0x18e   : > { %1039 = vrot.lane.b32.xlu1 %v450_v38, %s4973_s12  ;;  %v5862_v38 = vld [vmem:[#allocation2 + $0xf0] sm:$0xff] }
 0x18f   : > { %v5850_v30 = vpop.permute.xlu0 %1013 }
 0x190   : > { %v5848_v56 = vpop.permute.xlu1 %883 }
 0x191   : > { %1193 = vrot.lane.b32.xlu0 %v5554_v54, %s4974_s13 }
 0x192   : > { %1043 = vrot.lane.b32.xlu1 %v5852_v14, %s4973_s12 }
 0x193   : > { %v5860_v26 = vpop.permute.xlu0 %1017 }
 0x194   : > { %v5858_v62 = vpop.permute.xlu1 %885  ;;  %8439 = vst [vmem:[#allocation96_spill] sm:$0xff] %v5860_v26 }
 0x195   : > { %1197 = vrot.lane.b32.xlu0 %v5576_v42, %s4974_s13 }
 0x196   : > { %1047 = vrot.lane.b32.xlu1 %v5862_v38, %s4973_s12 }
 0x197   : > { %v5872_v50 = vpop.permute.xlu0 %1021 }
 0x198   : > { %v5870_v22 = vpop.permute.xlu1 %887  ;;  %8440 = vst [vmem:[#allocation97_spill] sm:$0xff] %v5872_v50 }
 0x199   : > { %1201 = vrot.lane.b32.xlu0 %v5868_v3, %s4974_s13 }
 0x19a   : > { %1051 = vrot.lane.b32.xlu1 %v5874_v44, %s4973_s12 }
 0x19b   : > { %v5882_v10 = vpop.permute.xlu0 %1025 }
 0x19c   : > { %v5880_v54 = vpop.permute.xlu1 %889  ;;  %8442 = vst [vmem:[#allocation99_spill] sm:$0xff] %v5882_v10 }
 0x19d   : > { %8441 = vst [vmem:[#allocation98_spill] sm:$0xff] %v5880_v54  ;;  %1269 = vrot.lane.b32.xlu0 %v5611_v23, %s4975_s14  ;;  %v5904_v54 = vld [vmem:[#allocation2 + $0x150] sm:$0xff] }
 0x19e   : > { %1055 = vrot.lane.b32.xlu1 %v5884_v34, %s4973_s12 }
 0x19f   : > { %v5892_v50 = vpop.permute.xlu0 %1029 }
 0x1a0   : > { %v5890_v42 = vpop.permute.xlu1 %891  ;;  %8444 = vst [vmem:[#allocation101_spill] sm:$0xff] %v5892_v50 }
 0x1a1   : > { %8443 = vst [vmem:[#allocation100_spill] sm:$0xff] %v5890_v42  ;;  %1273 = vrot.lane.b32.xlu0 %v5631_v13, %s4975_s14  ;;  %v5914_v42 = vld [vmem:[#allocation2 + $0x168] sm:$0xff] }
 0x1a2   : > { %1059 = vrot.lane.b32.xlu1 %v5894_v18, %s4973_s12 }
 0x1a3   : > { %v5902_v26 = vpop.permute.xlu0 %1033 }
 0x1a4   : > { %v5900_v10 = vpop.permute.xlu1 %893  ;;  %8446 = vst [vmem:[#allocation103_spill] sm:$0xff] %v5902_v26 }
 0x1a5   : > { %8445 = vst [vmem:[#allocation102_spill] sm:$0xff] %v5900_v10  ;;  %1277 = vrot.lane.b32.xlu0 %v5651_v17, %s4975_s14  ;;  %v5924_v10 = vld [vmem:[#allocation2 + $0x180] sm:$0xff] }
 0x1a6   : > { %1063 = vrot.lane.b32.xlu1 %v5904_v54, %s4973_s12 }
 0x1a7   : > { %v5912_v50 = vpop.permute.xlu0 %1037 }
 0x1a8   : > { %v5910_v23 = vpop.permute.xlu1 %895  ;;  %8447 = vst [vmem:[#allocation104_spill] sm:$0xff] %v5912_v50 }
 0x1a9   : > { %1281 = vrot.lane.b32.xlu0 %v5671_v31, %s4975_s14 }
 0x1aa   : > { %1067 = vrot.lane.b32.xlu1 %v5914_v42, %s4973_s12 }
 0x1ab   : > { %v5922_v26 = vpop.permute.xlu0 %1041 }
 0x1ac   : > { %v5920_v13 = vpop.permute.xlu1 %897  ;;  %8448 = vst [vmem:[#allocation105_spill] sm:$0xff] %v5922_v26 }
 0x1ad   : > { %1285 = vrot.lane.b32.xlu0 %v5426_v40, %s4975_s14 }
 0x1ae   : > { %1071 = vrot.lane.b32.xlu1 %v5924_v10, %s4973_s12 }
 0x1af   : > { %v5932_v50 = vpop.permute.xlu0 %1045 }
 0x1b0   : > { %v5930_v17 = vpop.permute.xlu1 %899  ;;  %8450 = vst [vmem:[#allocation107_spill] sm:$0xff] %v5932_v50  ;;  %v674_v50 = vld [vmem:[#allocation2 + $0xe1] sm:$0xff] }
 0x1b1   : > { %8449 = vst [vmem:[#allocation106_spill] sm:$0xff] %v5930_v17  ;;  %1289 = vrot.lane.b32.xlu0 %v5438_v43, %s4975_s14 }
 0x1b2   : > { %1139 = vrot.lane.b32.xlu1 %v5298_v8, %s4974_s13 }
 0x1b3   : > { %v5940_v26 = vpop.permute.xlu0 %1049 }
 0x1b4   : > { %v5938_v31 = vpop.permute.xlu1 %901  ;;  %8451 = vst [vmem:[#allocation108_spill] sm:$0xff] %v5940_v26 }
 0x1b5   : > { %1293 = vrot.lane.b32.xlu0 %v5450_v46, %s4975_s14 }
 0x1b6   : > { %1143 = vrot.lane.b32.xlu1 %v5314_v12, %s4974_s13 }
 0x1b7   : > { %v5948_v17 = vpop.permute.xlu0 %1053 }
 0x1b8   : > { %v5946_v40 = vpop.permute.xlu1 %903  ;;  %8453 = vst [vmem:[#allocation110_spill] sm:$0xff] %v5948_v17  ;;  %v664_v17 = vld [vmem:[#allocation2 + $0x69] sm:$0xff] }
 0x1b9   : > { %8452 = vst [vmem:[#allocation109_spill] sm:$0xff] %v5946_v40  ;;  %1297 = vrot.lane.b32.xlu0 %v5462_v49, %s4975_s14 }
 0x1ba   : > { %1147 = vrot.lane.b32.xlu1 %v5330_v16, %s4974_s13 }
 0x1bb   : > { %v5956_v43 = vpop.permute.xlu0 %1057 }
 0x1bc   : > { %v5954_v8 = vpop.permute.xlu1 %907  ;;  %8455 = vst [vmem:[#allocation112_spill] sm:$0xff] %v5956_v43 }
 0x1bd   : > { %8454 = vst [vmem:[#allocation111_spill] sm:$0xff] %v5954_v8  ;;  %1301 = vrot.lane.b32.xlu0 %v5474_v52, %s4975_s14 }
 0x1be   : > { %1151 = vrot.lane.b32.xlu1 %v5346_v20, %s4974_s13 }
 0x1bf   : > { %v5964_v46 = vpop.permute.xlu0 %1061 }
 0x1c0   : > { %v5962_v12 = vpop.permute.xlu1 %911  ;;  %8457 = vst [vmem:[#allocation114_spill] sm:$0xff] %v5964_v46  ;;  %v8482_v46 = vld [vmem:[#allocation56_spill] sm:$0xff] }
 0x1c1   : > { %8456 = vst [vmem:[#allocation113_spill] sm:$0xff] %v5962_v12  ;;  %1305 = vrot.lane.b32.xlu0 %v5486_v55, %s4975_s14  ;;  %v716_v12 = vld [vmem:[#allocation2 + $0x15a] sm:$0xff] }
 0x1c2   : > { %1155 = vrot.lane.b32.xlu1 %v5362_v24, %s4974_s13 }
 0x1c3   : > { %v5972_v49 = vpop.permute.xlu0 %1065 }
 0x1c4   : > { %v5970_v16 = vpop.permute.xlu1 %915  ;;  %8459 = vst [vmem:[#allocation116_spill] sm:$0xff] %v5972_v49  ;;  %v8478_v49 = vld [vmem:[#allocation51_spill] sm:$0xff] }
 0x1c5   : > { %8458 = vst [vmem:[#allocation115_spill] sm:$0xff] %v5970_v16  ;;  %1309 = vrot.lane.b32.xlu0 %v5498_v58, %s4975_s14  ;;  %v680_v16 = vld [vmem:[#allocation2 + $0x129] sm:$0xff] }
 0x1c6   : > { %1159 = vrot.lane.b32.xlu1 %v5378_v28, %s4974_s13 }
 0x1c7   : > { %v5980_v52 = vpop.permute.xlu0 %1069 }
 0x1c8   : > { %v5978_v20 = vpop.permute.xlu1 %919  ;;  %8461 = vst [vmem:[#allocation118_spill] sm:$0xff] %v5980_v52 }
 0x1c9   : > { %8460 = vst [vmem:[#allocation117_spill] sm:$0xff] %v5978_v20  ;;  %1313 = vrot.lane.b32.xlu0 %v5510_v61, %s4975_s14  ;;  %v672_v20 = vld [vmem:[#allocation2 + $0xc9] sm:$0xff] }
 0x1ca   : > { %1163 = vrot.lane.b32.xlu1 %v5394_v32, %s4974_s13 }
 0x1cb   : > { %v5988_v55 = vpop.permute.xlu0 %1073 }
 0x1cc   : > { %v5986_v24 = vpop.permute.xlu1 %923  ;;  %8463 = vst [vmem:[#allocation120_spill] sm:$0xff] %v5988_v55  ;;  %v6014_v55 = vld [vmem:[#allocation2 + $0x18a] sm:$0xff] }
 0x1cd   : > { %8462 = vst [vmem:[#allocation119_spill] sm:$0xff] %v5986_v24  ;;  %1317 = vrot.lane.b32.xlu0 %v5530_v2, %s4975_s14  ;;  %v668_v24 = vld [vmem:[#allocation2 + $0x99] sm:$0xff] }
 0x1ce   : > { %1167 = vrot.lane.b32.xlu1 %v5410_v36, %s4974_s13 }
 0x1cf   : > { %v5996_v58 = vpop.permute.xlu0 %1141 }
 0x1d0   : > { %v5994_v28 = vpop.permute.xlu1 %927 }
 0x1d1   : > { %8464 = vst [vmem:[#allocation121_spill] sm:$0xff] %v5994_v28  ;;  %1321 = vrot.lane.b32.xlu0 %v5552_v1, %s4975_s14 }
 0x1d2   : > { %1171 = vrot.lane.b32.xlu1 %v5428_v41, %s4974_s13 }
 0x1d3   : > { %v6004_v61 = vpop.permute.xlu0 %1145 }
 0x1d4   : > { %v6002_v32 = vpop.permute.xlu1 %931 }
 0x1d5   : > { %8465 = vst [vmem:[#allocation122_spill] sm:$0xff] %v6002_v32  ;;  %1325 = vrot.lane.b32.xlu0 %v5574_v57, %s4975_s14 }
 0x1d6   : > { %1175 = vrot.lane.b32.xlu1 %v5452_v47, %s4974_s13 }
 0x1d7   : > { %v6012_v2 = vpop.permute.xlu0 %1149 }
 0x1d8   : > { %v6010_v36 = vpop.permute.xlu1 %935 }
 0x1d9   : > { %8466 = vst [vmem:[#allocation123_spill] sm:$0xff] %v6010_v36  ;;  %1329 = vrot.lane.b32.xlu0 %v6014_v55, %s4975_s14 }
 0x1da   : > { %1179 = vrot.lane.b32.xlu1 %v5476_v53, %s4974_s13 }
 0x1db   : > { %v6022_v1 = vpop.permute.xlu0 %1153 }
 0x1dc   : > { %v6020_v41 = vpop.permute.xlu1 %939 }
 0x1dd   : > { %8467 = vst [vmem:[#allocation124_spill] sm:$0xff] %v6020_v41  ;;  %1397 = vrot.lane.b32.xlu0 %v5592_v29, %s4976_s15 }
 0x1de   : > { %1183 = vrot.lane.b32.xlu1 %v5500_v59, %s4974_s13 }
 0x1df   : > { %v6030_v57 = vpop.permute.xlu0 %1157 }
 0x1e0   : > { %v6028_v47 = vpop.permute.xlu1 %943 }
 0x1e1   : > { %8468 = vst [vmem:[#allocation125_spill] sm:$0xff] %v6028_v47  ;;  %1401 = vrot.lane.b32.xlu0 %v5599_v27, %s4976_s15  ;;  %v6056_v47 = vld [vmem:[#allocation2 + $0x181] sm:$0xff] }
 0x1e2   : > { %1187 = vrot.lane.b32.xlu1 %v5522_v0, %s4974_s13 }
 0x1e3   : > { %v6038_v52 = vpop.permute.xlu0 %1161 }
 0x1e4   : > { %v6036_v53 = vpop.permute.xlu1 %1011  ;;  %8469 = vst [vmem:[#allocation126_spill] sm:$0xff] %v6038_v52 }
 0x1e5   : > { %1405 = vrot.lane.b32.xlu0 %v5609_v48, %s4976_s15 }
 0x1e6   : > { %1191 = vrot.lane.b32.xlu1 %v5544_v60, %s4974_s13 }
 0x1e7   : > { %v6046_v59 = vpop.permute.xlu0 %1165 }
 0x1e8   : > { %v6044_v29 = vpop.permute.xlu1 %1015  ;;  %8470 = vst [vmem:[#allocation127_spill] sm:$0xff] %v6046_v59 }
 0x1e9   : > { %1409 = vrot.lane.b32.xlu0 %v5619_v21, %s4976_s15 }
 0x1ea   : > { %1195 = vrot.lane.b32.xlu1 %v5564_v63, %s4974_s13 }
 0x1eb   : > { %v6054_v0 = vpop.permute.xlu0 %1169 }
 0x1ec   : > { %v6052_v27 = vpop.permute.xlu1 %1019  ;;  %8471 = vst [vmem:[#allocation128_spill] sm:$0xff] %v6054_v0  ;;  %v682_v0 = vld [vmem:[#allocation2 + $0x141] sm:$0xff] }
 0x1ed   : > { %1413 = vrot.lane.b32.xlu0 %v5629_v15, %s4976_s15 }
 0x1ee   : > { %1199 = vrot.lane.b32.xlu1 %v6056_v47, %s4974_s13 }
 0x1ef   : > { %v6064_v48 = vpop.permute.xlu0 %1173 }
 0x1f0   : > { %v6062_v60 = vpop.permute.xlu1 %1023  ;;  %8472 = vst [vmem:[#allocation129_spill] sm:$0xff] %v6064_v48 }
 0x1f1   : > { %1417 = vrot.lane.b32.xlu0 %v5639_v9, %s4976_s15 }
 0x1f2   : > { %1267 = vrot.lane.b32.xlu1 %v5601_v25, %s4975_s14 }
 0x1f3   : > { %v6072_v63 = vpop.permute.xlu0 %1177 }
 0x1f4   : > { %v6070_v21 = vpop.permute.xlu1 %1027  ;;  %8473 = vst [vmem:[#allocation130_spill] sm:$0xff] %v6072_v63  ;;  %v627_v63 = vld [vmem:[#allocation2 + $0x30] sm:$0xff] }
 0x1f5   : > { %1421 = vrot.lane.b32.xlu0 %v5649_v5, %s4976_s15 }
 0x1f6   : > { %1271 = vrot.lane.b32.xlu1 %v5621_v19, %s4975_s14  ;;  %v8479_v19 = vld [vmem:[#allocation53_spill] sm:$0xff] }
 0x1f7   : > { %v6080_v41 = vpop.permute.xlu0 %1181 }
 0x1f8   : > { %v6078_v15 = vpop.permute.xlu1 %1031  ;;  %8475 = vst [vmem:[#allocation132_spill] sm:$0xff] %v6080_v41 }
 0x1f9   : > { %8474 = vst [vmem:[#allocation131_spill] sm:$0xff] %v6078_v15  ;;  %1425 = vrot.lane.b32.xlu0 %v5659_v33, %s4976_s15  ;;  %v435_v15 = vld [vmem:[#allocation2 + $0x8] sm:$0xff] }
 0x1fa   : > { %1275 = vrot.lane.b32.xlu1 %v5641_v7, %s4975_s14  ;;  %v8483_v7 = vld [vmem:[#allocation55_spill] sm:$0xff] }
 0x1fb   : > { %v6088_v25 = vpop.permute.xlu0 %1185 }
 0x1fc   : > { %v6086_v9 = vpop.permute.xlu1 %1035  ;;  %8477 = vst [vmem:[#allocation134_spill] sm:$0xff] %v6088_v25  ;;  %v8486_v25 = vld [vmem:[#allocation59_spill] sm:$0xff] }
 0x1fd   : > { %8476 = vst [vmem:[#allocation133_spill] sm:$0xff] %v6086_v9  ;;  %1429 = vrot.lane.b32.xlu0 %v8479_v19, %s4976_s15  ;;  %v705_v9 = vld [vmem:[#allocation2 + $0xda] sm:$0xff] }
 0x1fe   : > { %1279 = vrot.lane.b32.xlu1 %v8478_v49, %s4975_s14  ;;  %v8487_v49 = vld [vmem:[#allocation58_spill] sm:$0xff] }
 0x1ff   : > { %v6096_v36 = vpop.permute.xlu0 %1189 }
 0x200   : > { %v6094_v5 = vpop.permute.xlu1 %1039  ;;  %8481 = vst [vmem:[#allocation53_spill] sm:$0xff] %v6096_v36  ;;  %v8490_v36 = vld [vmem:[#allocation61_spill] sm:$0xff] }
 0x201   : > { %8480 = vst [vmem:[#allocation51_spill] sm:$0xff] %v6094_v5  ;;  %1433 = vrot.lane.b32.xlu0 %v8483_v7, %s4976_s15  ;;  %v665_v5 = vld [vmem:[#allocation2 + $0x79] sm:$0xff] }
 0x202   : > { %1283 = vrot.lane.b32.xlu1 %v8482_v46, %s4975_s14  ;;  %v8491_v46 = vld [vmem:[#allocation60_spill] sm:$0xff] }
 0x203   : > { %v6104_v32 = vpop.permute.xlu0 %1193 }
 0x204   : > { %v6102_v33 = vpop.permute.xlu1 %1043  ;;  %8485 = vst [vmem:[#allocation55_spill] sm:$0xff] %v6104_v32  ;;  %v8494_v32 = vld [vmem:[#allocation64_spill] sm:$0xff] }
 0x205   : > { %8484 = vst [vmem:[#allocation56_spill] sm:$0xff] %v6102_v33  ;;  %1437 = vrot.lane.b32.xlu0 %v8487_v49, %s4976_s15  ;;  %v676_v33 = vld [vmem:[#allocation2 + $0xf9] sm:$0xff] }
 0x206   : > { %1287 = vrot.lane.b32.xlu1 %v8486_v25, %s4975_s14  ;;  %v8495_v25 = vld [vmem:[#allocation63_spill] sm:$0xff] }
 0x207   : > { %v6112_v43 = vpop.permute.xlu0 %1197 }
 0x208   : > { %v6110_v19 = vpop.permute.xlu1 %1047  ;;  %8489 = vst [vmem:[#allocation58_spill] sm:$0xff] %v6112_v43 }
 0x209   : > { %8488 = vst [vmem:[#allocation59_spill] sm:$0xff] %v6110_v19  ;;  %1441 = vrot.lane.b32.xlu0 %v8491_v46, %s4976_s15  ;;  %v629_v19 = vld [vmem:[#allocation2 + $0x48] sm:$0xff] }
 0x20a   : > { %1291 = vrot.lane.b32.xlu1 %v8490_v36, %s4975_s14  ;;  %v8497_v36 = vld [vmem:[#allocation67_spill] sm:$0xff] }
 0x20b   : > { %v6120_v28 = vpop.permute.xlu0 %1201 }
 0x20c   : > { %v6118_v7 = vpop.permute.xlu1 %1051  ;;  %8493 = vst [vmem:[#allocation60_spill] sm:$0xff] %v6120_v28  ;;  %v8499_v28 = vld [vmem:[#allocation70_spill] sm:$0xff] }
 0x20d   : > { %8492 = vst [vmem:[#allocation61_spill] sm:$0xff] %v6118_v7  ;;  %1445 = vrot.lane.b32.xlu0 %v8495_v25, %s4976_s15  ;;  %v6181_v7 = vld [vmem:[#allocation2 + $0x182] sm:$0xff] }
 0x20e   : > { %1295 = vrot.lane.b32.xlu1 %v8494_v32, %s4975_s14  ;;  %v658_v32 = vld [vmem:[#allocation2 + $0x1a0] sm:$0xff] }
 0x20f   : > { %v6128_v41 = vpop.permute.xlu0 %1269 }
 0x210   : > { %v6126_v49 = vpop.permute.xlu1 %1055 }
 0x211   : > { %8496 = vst [vmem:[#allocation64_spill] sm:$0xff] %v6126_v49  ;;  %1449 = vrot.lane.b32.xlu0 %v8497_v36, %s4976_s15 }
 0x212   : > { %1299 = vrot.lane.b32.xlu1 %v5721_v11, %s4975_s14 }
 0x213   : > { %v6136_v43 = vpop.permute.xlu0 %1273 }
 0x214   : > { %v6134_v46 = vpop.permute.xlu1 %1059 }
 0x215   : > { %8498 = vst [vmem:[#allocation63_spill] sm:$0xff] %v6134_v46  ;;  %1453 = vrot.lane.b32.xlu0 %v5727_v39, %s4976_s15  ;;  %v660_v46 = vld [vmem:[#allocation2 + $0x39] sm:$0xff] }
 0x216   : > { %1303 = vrot.lane.b32.xlu1 %v8499_v28, %s4975_s14 }
 0x217   : > { %v6144_v49 = vpop.permute.xlu0 %1277 }
 0x218   : > { %v6142_v25 = vpop.permute.xlu1 %1063 }
 0x219   : > { %8500 = vst [vmem:[#allocation67_spill] sm:$0xff] %v6142_v25  ;;  %1457 = vrot.lane.b32.xlu0 %v658_v32, %s4976_s15  ;;  %v662_v25 = vld [vmem:[#allocation2 + $0x51] sm:$0xff] }
 0x21a   : > { %1307 = vrot.lane.b32.xlu1 %v5743_v35, %s4975_s14  ;;  %v8504_v35 = vld [vmem:[#allocation76_spill] sm:$0xff] }
 0x21b   : > { %v6151_v36 = vpop.permute.xlu0 %1281 }
 0x21c   : > { %v6149_v11 = vpop.permute.xlu1 %1067 }
 0x21d   : > { %8501 = vst [vmem:[#allocation70_spill] sm:$0xff] %v6149_v11  ;;  %1525 = vrot.lane.b32.xlu0 %v660_v46, %s4977_s16 }
 0x21e   : > { %1311 = vrot.lane.b32.xlu1 %v5751_v37, %s4975_s14 }
 0x21f   : > { %v6158_v28 = vpop.permute.xlu0 %1285 }
 0x220   : > { %v6156_v39 = vpop.permute.xlu1 %1071  ;;  %8503 = vst [vmem:[#allocation136_spill] sm:$0xff] %v6158_v28 }
 0x221   : > { %8502 = vst [vmem:[#allocation135_spill] sm:$0xff] %v6156_v39  ;;  %1529 = vrot.lane.b32.xlu0 %v662_v25, %s4977_s16  ;;  %v666_v39 = vld [vmem:[#allocation2 + $0x81] sm:$0xff] }
 0x222   : > { %1315 = vrot.lane.b32.xlu1 %v8504_v35, %s4975_s14 }
 0x223   : > { %v6165_v11 = vpop.permute.xlu0 %1289 }
 0x224   : > { %v6163_v32 = vpop.permute.xlu1 %1139  ;;  %8505 = vst [vmem:[#allocation76_spill] sm:$0xff] %v6165_v11  ;;  %v707_v11 = vld [vmem:[#allocation2 + $0xf2] sm:$0xff] }
 0x225   : > { %1533 = vrot.lane.b32.xlu0 %v664_v17, %s4977_s16 }
 0x226   : > { %1319 = vrot.lane.b32.xlu1 %v5771_v45, %s4975_s14 }
 0x227   : > { %v6172_v46 = vpop.permute.xlu0 %1293 }
 0x228   : > { %v6170_v37 = vpop.permute.xlu1 %1143  ;;  %8506 = vst [vmem:[#allocation137_spill] sm:$0xff] %v6172_v46  ;;  %v667_v46 = vld [vmem:[#allocation2 + $0x91] sm:$0xff] }
 0x229   : > { %1537 = vrot.lane.b32.xlu0 %v666_v39, %s4977_s16 }
 0x22a   : > { %1323 = vrot.lane.b32.xlu1 %v5779_v51, %s4975_s14  ;;  %v670_v51 = vld [vmem:[#allocation2 + $0xb1] sm:$0xff] }
 0x22b   : > { %v6179_v35 = vpop.permute.xlu0 %1297 }
 0x22c   : > { %v6177_v25 = vpop.permute.xlu1 %1147  ;;  %8507 = vst [vmem:[#allocation138_spill] sm:$0xff] %v6179_v35  ;;  %v678_v35 = vld [vmem:[#allocation2 + $0x111] sm:$0xff] }
 0x22d   : > { %1541 = vrot.lane.b32.xlu0 %v668_v24, %s4977_s16 }
 0x22e   : > { %1327 = vrot.lane.b32.xlu1 %v6181_v7, %s4975_s14 }
 0x22f   : > { %v6188_v17 = vpop.permute.xlu0 %1301 }
 0x230   : > { %v6186_v45 = vpop.permute.xlu1 %1151  ;;  %8508 = vst [vmem:[#allocation139_spill] sm:$0xff] %v6188_v17  ;;  %v631_v17 = vld [vmem:[#allocation2 + $0x60] sm:$0xff] }
 0x231   : > { %1545 = vrot.lane.b32.xlu0 %v670_v51, %s4977_s16 }
 0x232   : > { %1395 = vrot.lane.b32.xlu1 %v627_v63, %s4976_s15 }
 0x233   : > { %v6194_v26 = vpop.permute.xlu0 %1305 }
 0x234   : > { %v6192_v39 = vpop.permute.xlu1 %1155  ;;  %8509 = vst [vmem:[#allocation140_spill] sm:$0xff] %v6194_v26  ;;  %v633_v26 = vld [vmem:[#allocation2 + $0x78] sm:$0xff] }
 0x235   : > { %1549 = vrot.lane.b32.xlu0 %v672_v20, %s4977_s16 }
 0x236   : > { %1399 = vrot.lane.b32.xlu1 %v629_v19, %s4976_s15 }
 0x237   : > { %v6200_v48 = vpop.permute.xlu0 %1309 }
 0x238   : > { %v6198_v24 = vpop.permute.xlu1 %1159  ;;  %8511 = vst [vmem:[#allocation142_spill] sm:$0xff] %v6200_v48  ;;  %v635_v48 = vld [vmem:[#allocation2 + $0x90] sm:$0xff] }
 0x239   : > { %8510 = vst [vmem:[#allocation141_spill] sm:$0xff] %v6198_v24  ;;  %1553 = vrot.lane.b32.xlu0 %v674_v50, %s4977_s16 }
 0x23a   : > { %1403 = vrot.lane.b32.xlu1 %v631_v17, %s4976_s15 }
 0x23b   : > { %v6206_v51 = vpop.permute.xlu0 %1313 }
 0x23c   : > { %v6204_v63 = vpop.permute.xlu1 %1163  ;;  %8513 = vst [vmem:[#allocation144_spill] sm:$0xff] %v6206_v51  ;;  %v637_v51 = vld [vmem:[#allocation2 + $0xa8] sm:$0xff] }
 0x23d   : > { %8512 = vst [vmem:[#allocation143_spill] sm:$0xff] %v6204_v63  ;;  %1557 = vrot.lane.b32.xlu0 %v676_v33, %s4977_s16  ;;  %v703_v63 = vld [vmem:[#allocation2 + $0xc2] sm:$0xff] }
 0x23e   : > { %1407 = vrot.lane.b32.xlu1 %v633_v26, %s4976_s15 }
 0x23f   : > { %v6212_v19 = vpop.permute.xlu0 %1317 }
 0x240   : > { %v6210_v20 = vpop.permute.xlu1 %1167  ;;  %8515 = vst [vmem:[#allocation146_spill] sm:$0xff] %v6212_v19  ;;  %v639_v19 = vld [vmem:[#allocation2 + $0xc0] sm:$0xff] }
 0x241   : > { %8514 = vst [vmem:[#allocation145_spill] sm:$0xff] %v6210_v20  ;;  %1561 = vrot.lane.b32.xlu0 %v678_v35, %s4977_s16  ;;  %v661_v20 = vld [vmem:[#allocation2 + $0x49] sm:$0xff] }
 0x242   : > { %1411 = vrot.lane.b32.xlu1 %v635_v48, %s4976_s15 }
 0x243   : > { %v6218_v17 = vpop.permute.xlu0 %1321 }
 0x244   : > { %v6216_v50 = vpop.permute.xlu1 %1171  ;;  %8517 = vst [vmem:[#allocation148_spill] sm:$0xff] %v6218_v17  ;;  %v692_v17 = vld [vmem:[#allocation2 + $0x3a] sm:$0xff] }
 0x245   : > { %8516 = vst [vmem:[#allocation147_spill] sm:$0xff] %v6216_v50  ;;  %1565 = vrot.lane.b32.xlu0 %v680_v16, %s4977_s16  ;;  %v710_v50 = vld [vmem:[#allocation2 + $0x112] sm:$0xff] }
 0x246   : > { %1415 = vrot.lane.b32.xlu1 %v637_v51, %s4976_s15 }
 0x247   : > { %v6224_v33 = vpop.permute.xlu0 %1325 }
 0x248   : > { %v6222_v26 = vpop.permute.xlu1 %1175  ;;  %8519 = vst [vmem:[#allocation150_spill] sm:$0xff] %v6224_v33  ;;  %v694_v33 = vld [vmem:[#allocation2 + $0x52] sm:$0xff] }
 0x249   : > { %8518 = vst [vmem:[#allocation149_spill] sm:$0xff] %v6222_v26  ;;  %1569 = vrot.lane.b32.xlu0 %v682_v0, %s4977_s16  ;;  %v659_v26 = vld [vmem:[#allocation2 + $0x31] sm:$0xff] }
 0x24a   : > { %1419 = vrot.lane.b32.xlu1 %v639_v19, %s4976_s15 }
 0x24b   : > { %v6230_v35 = vpop.permute.xlu0 %1329 }
 0x24c   : > { %v6228_v48 = vpop.permute.xlu1 %1179  ;;  %8521 = vst [vmem:[#allocation152_spill] sm:$0xff] %v6230_v35  ;;  %v696_v35 = vld [vmem:[#allocation2 + $0x6a] sm:$0xff] }
 0x24d   : > { %8520 = vst [vmem:[#allocation151_spill] sm:$0xff] %v6228_v48  ;;  %1653 = vrot.lane.b32.xlu0 %v692_v17, %s4978_s17  ;;  %v708_v48 = vld [vmem:[#allocation2 + $0xfa] sm:$0xff] }
 0x24e   : > { %1423 = vrot.lane.b32.xlu1 %v5852_v14, %s4976_s15 }
 0x24f   : > { %v6237_v51 = vpop.permute.xlu0 %1397 }
 0x250   : > { %v6235_v16 = vpop.permute.xlu1 %1183 }
 0x251   : > { %8522 = vst [vmem:[#allocation153_spill] sm:$0xff] %v6235_v16  ;;  %1657 = vrot.lane.b32.xlu0 %v694_v33, %s4978_s17  ;;  %v698_v16 = vld [vmem:[#allocation2 + $0x82] sm:$0xff] }
 0x252   : > { %1427 = vrot.lane.b32.xlu1 %v5862_v38, %s4976_s15 }
 0x253   : > { %v6244_v19 = vpop.permute.xlu0 %1401 }
 0x254   : > { %v6242_v0 = vpop.permute.xlu1 %1187 }
 0x255   : > { %8523 = vst [vmem:[#allocation154_spill] sm:$0xff] %v6242_v0  ;;  %1661 = vrot.lane.b32.xlu0 %v696_v35, %s4978_s17  ;;  %v700_v0 = vld [vmem:[#allocation2 + $0x9a] sm:$0xff] }
 0x256   : > { %1431 = vrot.lane.b32.xlu1 %v5874_v44, %s4976_s15 }
 0x257   : > { %v6251_v17 = vpop.permute.xlu0 %1405 }
 0x258   : > { %v6249_v14 = vpop.permute.xlu1 %1191 }
 0x259   : > { %8524 = vst [vmem:[#allocation155_spill] sm:$0xff] %v6249_v14  ;;  %1665 = vrot.lane.b32.xlu0 %v698_v16, %s4978_s17  ;;  %v702_v14 = vld [vmem:[#allocation2 + $0xb2] sm:$0xff] }
 0x25a   : > { %1435 = vrot.lane.b32.xlu1 %v5884_v34, %s4976_s15 }
 0x25b   : > { %v6258_v33 = vpop.permute.xlu0 %1409 }
 0x25c   : > { %v6256_v38 = vpop.permute.xlu1 %1195 }
 0x25d   : > { %8525 = vst [vmem:[#allocation156_spill] sm:$0xff] %v6256_v38  ;;  %1669 = vrot.lane.b32.xlu0 %v700_v0, %s4978_s17  ;;  %v704_v38 = vld [vmem:[#allocation2 + $0xca] sm:$0xff] }
 0x25e   : > { %1439 = vrot.lane.b32.xlu1 %v5894_v18, %s4976_s15 }
 0x25f   : > { %v6265_v35 = vpop.permute.xlu0 %1413 }
 0x260   : > { %v6263_v44 = vpop.permute.xlu1 %1199  ;;  %8527 = vst [vmem:[#allocation158_spill] sm:$0xff] %v6265_v35 }
 0x261   : > { %8526 = vst [vmem:[#allocation157_spill] sm:$0xff] %v6263_v44  ;;  %1673 = vrot.lane.b32.xlu0 %v702_v14, %s4978_s17  ;;  %v706_v44 = vld [vmem:[#allocation2 + $0xe2] sm:$0xff] }
 0x262   : > { %1443 = vrot.lane.b32.xlu1 %v5904_v54, %s4976_s15  ;;  %v657_v54 = vld [vmem:[#allocation2 + $0x198] sm:$0xff] }
 0x263   : > { %v6272_v16 = vpop.permute.xlu0 %1417 }
 0x264   : > { %v6270_v34 = vpop.permute.xlu1 %1267  ;;  %8528 = vst [vmem:[#allocation159_spill] sm:$0xff] %v6272_v16 }
 0x265   : > { %1677 = vrot.lane.b32.xlu0 %v704_v38, %s4978_s17 }
 0x266   : > { %1447 = vrot.lane.b32.xlu1 %v5914_v42, %s4976_s15 }
 0x267   : > { %v6279_v0 = vpop.permute.xlu0 %1421 }
 0x268   : > { %v6277_v18 = vpop.permute.xlu1 %1271  ;;  %8529 = vst [vmem:[#allocation160_spill] sm:$0xff] %v6279_v0  ;;  %v712_v0 = vld [vmem:[#allocation2 + $0x12a] sm:$0xff] }
 0x269   : > { %1681 = vrot.lane.b32.xlu0 %v706_v44, %s4978_s17 }
 0x26a   : > { %1451 = vrot.lane.b32.xlu1 %v5924_v10, %s4976_s15 }
 0x26b   : > { %v6288_v42 = vpop.permute.xlu0 %1425 }
 0x26c   : > { %v6284_v14 = vpop.permute.xlu1 %1275  ;;  %8530 = vst [vmem:[#allocation161_spill] sm:$0xff] %v6288_v42  ;;  %v714_v42 = vld [vmem:[#allocation2 + $0x142] sm:$0xff] }
 0x26d   : > { %1685 = vrot.lane.b32.xlu0 %v708_v48, %s4978_s17 }
 0x26e   : > { %1455 = vrot.lane.b32.xlu1 %v657_v54, %s4976_s15  ;;  %v663_v54 = vld [vmem:[#allocation2 + $0x61] sm:$0xff] }
 0x26f   : > { %v6296_v44 = vpop.permute.xlu0 %1429 }
 0x270   : > { %v6290_v38 = vpop.permute.xlu1 %1279  ;;  %8531 = vst [vmem:[#allocation162_spill] sm:$0xff] %v6296_v44  ;;  %v684_v44 = vld [vmem:[#allocation2 + $0x159] sm:$0xff] }
 0x271   : > { %1689 = vrot.lane.b32.xlu0 %v710_v50, %s4978_s17 }
 0x272   : > { %1523 = vrot.lane.b32.xlu1 %v659_v26, %s4977_s16 }
 0x273   : > { %v6304_v26 = vpop.permute.xlu0 %1433 }
 0x274   : > { %v6294_v10 = vpop.permute.xlu1 %1283  ;;  %8533 = vst [vmem:[#allocation164_spill] sm:$0xff] %v6304_v26  ;;  %v686_v26 = vld [vmem:[#allocation2 + $0x171] sm:$0xff] }
 0x275   : > { %1693 = vrot.lane.b32.xlu0 %v712_v0, %s4978_s17 }
 0x276   : > { %1527 = vrot.lane.b32.xlu1 %v661_v20, %s4977_s16 }
 0x277   : > { %v6312_v0 = vpop.permute.xlu0 %1437 }
 0x278   : > { %v6300_v48 = vpop.permute.xlu1 %1287  ;;  %8536 = vst [vmem:[#allocation167_spill] sm:$0xff] %v6312_v0  ;;  %v718_v0 = vld [vmem:[#allocation2 + $0x172] sm:$0xff] }
 0x279   : > { %8532 = vst [vmem:[#allocation163_spill] sm:$0xff] %v6300_v48  ;;  %1697 = vrot.lane.b32.xlu0 %v714_v42, %s4978_s17  ;;  %v711_v48 = vld [vmem:[#allocation2 + $0x122] sm:$0xff] }
 0x27a   : > { %1531 = vrot.lane.b32.xlu1 %v663_v54, %s4977_s16  ;;  %v669_v54 = vld [vmem:[#allocation2 + $0xa9] sm:$0xff] }
 0x27c   : > { %v6306_v50 = vpop.permute.xlu1 %1291 }
 0x27d   : > { %8534 = vst [vmem:[#allocation165_spill] sm:$0xff] %v6306_v50  ;;  %1573 = vrot.lane.b32.xlu0 %v684_v44, %s4977_s16  ;;  %v701_v50 = vld [vmem:[#allocation2 + $0xaa] sm:$0xff] }
 0x27e   : > { %1535 = vrot.lane.b32.xlu1 %v665_v5, %s4977_s16  ;;  %v6320_v5 = vpop.permute.xlu0 %1441 }
 0x27f   : > { %8538 = vst [vmem:[#allocation169_spill] sm:$0xff] %v6320_v5  ;;  %v673_v5 = vld [vmem:[#allocation2 + $0xd9] sm:$0xff] }
 0x280   : > { %v6310_v20 = vpop.permute.xlu1 %1295 }
 0x281   : > { %8535 = vst [vmem:[#allocation166_spill] sm:$0xff] %v6310_v20  ;;  %1701 = vrot.lane.b32.xlu0 %v716_v12, %s4978_s17  ;;  %v671_v20 = vld [vmem:[#allocation2 + $0xc1] sm:$0xff] }
 0x282   : > { %1539 = vrot.lane.b32.xlu1 %v667_v46, %s4977_s16  ;;  %v2010_v12 = vld [vmem:[%s8293_s1] sm:$0xff] }
 0x284   : > { %v6316_v42 = vpop.permute.xlu1 %1299 }
 0x285   : > { %8537 = vst [vmem:[#allocation168_spill] sm:$0xff] %v6316_v42  ;;  %1577 = vrot.lane.b32.xlu0 %v686_v26, %s4977_s16  ;;  %v2011_v26 = vld [vmem:[%s8293_s1 + $0x8] sm:$0xff] }
 0x286   : > { %1543 = vrot.lane.b32.xlu1 %v669_v54, %s4977_s16  ;;  %v6334_v54 = vpop.permute.xlu0 %1445 }
 0x287   : > { %8541 = vst [vmem:[#allocation172_spill] sm:$0xff] %v6334_v54  ;;  %v675_v54 = vld [vmem:[#allocation2 + $0xf1] sm:$0xff] }
 0x288   : > { %v6322_v44 = vpop.permute.xlu1 %1303 }
 0x289   : > { %8539 = vst [vmem:[#allocation170_spill] sm:$0xff] %v6322_v44  ;;  %1705 = vrot.lane.b32.xlu0 %v718_v0, %s4978_s17  ;;  %v4797_v44 = vpack.c.bf16 %v2011_v26, %v2010_v12  ;;  %v2012_v0 = vld [vmem:[%s8293_s1 + $0x10] sm:$0xff]  ;;  %v2014_v12 = vld [vmem:[%s8293_s1 + $0x20] sm:$0xf] }
 0x28a   : > { %1547 = vrot.lane.b32.xlu1 %v671_v20, %s4977_s16  ;;  %v677_v26 = vld [vmem:[#allocation2 + $0x109] sm:$0xff] }
 0x28b   : > { %4798 = vmatprep.subr.bf16.mxu0 %v4797_v44 }
 0x28c   : > { %v6326_v46 = vpop.permute.xlu1 %1307  ;;  %4800 = vmatpush3.bf16.msra.mxu0 %v4797_v44 }
 0x28d   : > { %8540 = vst [vmem:[#allocation171_spill] sm:$0xff] %v6326_v46  ;;  %1581 = vrot.lane.b32.xlu0 %v5868_v3, %s4977_s16  ;;  %v2013_v46 = vld [vmem:[%s8293_s1 + $0x18] sm:$0xff]  ;;  %v6350_v3 = vpop.permute.xlu0 %1449 }
 0x28e   : > { %1551 = vrot.lane.b32.xlu1 %v673_v5, %s4977_s16  ;;  %v4801_v42 = vpack.c.bf16 %v2013_v46, %v2012_v0  ;;  %8543 = vst [vmem:[#allocation174_spill] sm:$0xff] %v6350_v3  ;;  %v690_v5 = vld [vmem:[#allocation2 + $0x1a1] sm:$0xff]  ;;  %v681_v3 = vld [vmem:[#allocation2 + $0x139] sm:$0xff] }
 0x290   : > { %v6339_v20 = vpop.permute.xlu1 %1311  ;;  %4802 = vmatprep.subr.bf16.mxu0 %v4801_v42 }
 0x291   : > { %8542 = vst [vmem:[#allocation173_spill] sm:$0xff] %v6339_v20  ;;  %1709 = vrot.lane.b32.xlu0 %v6014_v55, %s4978_s17  ;;  %4804 = vmatpush3.bf16.msra.mxu0 %v4801_v42  ;;  %v722_v55 = vld [vmem:[#allocation2 + $0x1a2] sm:$0xff]  ;;  %v699_v20 = vld [vmem:[#allocation2 + $0x92] sm:$0xff] }
 0x292   : > { %1555 = vrot.lane.b32.xlu1 %v675_v54, %s4977_s16  ;;  %4689 = vmatprep.subr.msk.mxu0 %vm2119_vm2, %v2014_v12  ;;  %v6363_v54 = vpop.permute.xlu0 %1453  ;;  %v679_v42 = vld [vmem:[#allocation2 + $0x121] sm:$0xff] }
 0x293   : > { %8546 = vst [vmem:[#allocation177_spill] sm:$0xff] %v6363_v54 }
 0x294   : > { %v6352_v44 = vpop.permute.xlu1 %1315 }
 0x295   : > { %8544 = vst [vmem:[#allocation175_spill] sm:$0xff] %v6352_v44  ;;  %1585 = vrot.lane.b32.xlu0 %v690_v5, %s4977_s16  ;;  %4690 = vmatpush3.msk.msra.mxu0 %vm2119_vm2, %v2014_v12  ;;  %v691_v44 = vld [vmem:[#allocation2 + $0x32] sm:$0xff] }
 0x296   : > { %1559 = vrot.lane.b32.xlu1 %v677_v26, %s4977_s16  ;;  %v6370_v26 = vpop.permute.xlu0 %1457 }
 0x297   : > { %8548 = vst [vmem:[#allocation179_spill] sm:$0xff] %v6370_v26 }
 0x298   : > { %v6360_v46 = vpop.permute.xlu1 %1319 }
 0x299   : > { %8545 = vst [vmem:[#allocation176_spill] sm:$0xff] %v6360_v46  ;;  %1713 = vrot.lane.b32.xlu0 %v722_v55, %s4978_s17  ;;  %v693_v46 = vld [vmem:[#allocation2 + $0x4a] sm:$0xff] }
 0x29a   : > { %1563 = vrot.lane.b32.xlu1 %v679_v42, %s4977_s16  ;;  %v6377_v54 = vpop.permute.xlu0 %1525  ;;  %v695_v42 = vld [vmem:[#allocation2 + $0x62] sm:$0xff] }
 0x29c   : > { %v6367_v0 = vpop.permute.xlu1 %1323 }
 0x29d   : > { %8547 = vst [vmem:[#allocation178_spill] sm:$0xff] %v6367_v0 }
 0x29e   : > { %1567 = vrot.lane.b32.xlu1 %v681_v3, %s4977_s16  ;;  %v6383_v3 = vpop.permute.xlu0 %1529 }
 0x2a0   : > { %v6372_v5 = vpop.permute.xlu1 %1327 }
 0x2a1   : > { %8549 = vst [vmem:[#allocation180_spill] sm:$0xff] %v6372_v5  ;;  %v697_v5 = vld [vmem:[#allocation2 + $0x7a] sm:$0xff] }
 0x2a2   : > { %1651 = vrot.lane.b32.xlu1 %v691_v44, %s4978_s17  ;;  %v6390_v0 = vpop.permute.xlu0 %1533 }
 0x2a4   : > { %v6375_v12 = vpop.permute.xlu1 %1395 }
 0x2a6   : > { %1655 = vrot.lane.b32.xlu1 %v693_v46, %s4978_s17 }
 0x2a8   : > { %v6380_v55 = vpop.permute.xlu1 %1399 }
 0x2aa   : > { %1659 = vrot.lane.b32.xlu1 %v695_v42, %s4978_s17  ;;  %v6396_v42 = vpop.permute.xlu0 %1537 }
 0x2ac   : > { %v6385_v26 = vpop.permute.xlu1 %1403 }
 0x2ae   : > { %1663 = vrot.lane.b32.xlu1 %v697_v5, %s4978_s17  ;;  %v6403_v16 = vpop.permute.xlu0 %1541 }
 0x2af   : > { %8553 = vst [vmem:[#allocation184_spill] sm:$0xff] %v6403_v16 }
 0x2b0   : > { %v6388_v44 = vpop.permute.xlu1 %1407 }
 0x2b2   : > { %1667 = vrot.lane.b32.xlu1 %v699_v20, %s4978_s17 }
 0x2b4   : > { %v6393_v46 = vpop.permute.xlu1 %1411 }
 0x2b5   : > { %8550 = vst [vmem:[#allocation181_spill] sm:$0xff] %v6393_v46  ;;  %v434_v46 = vld [vmem:[#allocation2] sm:$0xff] }
 0x2b6   : > { %1671 = vrot.lane.b32.xlu1 %v701_v50, %s4978_s17  ;;  %v6409_v50 = vpop.permute.xlu0 %1545 }
 0x2b7   : > { %8555 = vst [vmem:[#allocation186_spill] sm:$0xff] %v6409_v50 }
 0x2b8   : > { %v6398_v59 = vpop.permute.xlu1 %1415 }
 0x2b9   : > { %8551 = vst [vmem:[#allocation182_spill] sm:$0xff] %v6398_v59  ;;  %v709_v59 = vld [vmem:[#allocation2 + $0x10a] sm:$0xff] }
 0x2ba   : > { %1675 = vrot.lane.b32.xlu1 %v703_v63, %s4978_s17 }
 0x2bc   : > { %v6401_v5 = vpop.permute.xlu1 %1419 }
 0x2bd   : > { %8552 = vst [vmem:[#allocation183_spill] sm:$0xff] %v6401_v5  ;;  %v6416_v5 = vpop.permute.xlu0 %1549 }
 0x2be   : > { %1679 = vrot.lane.b32.xlu1 %v705_v9, %s4978_s17  ;;  %8558 = vst [vmem:[#allocation189_spill] sm:$0xff] %v6416_v5  ;;  %v715_v5 = vld [vmem:[#allocation2 + $0x152] sm:$0xff] }
 0x2c0   : > { %v6406_v20 = vpop.permute.xlu1 %1423 }
 0x2c1   : > { %8554 = vst [vmem:[#allocation185_spill] sm:$0xff] %v6406_v20  ;;  %v713_v20 = vld [vmem:[#allocation2 + $0x13a] sm:$0xff] }
 0x2c2   : > { %1683 = vrot.lane.b32.xlu1 %v707_v11, %s4978_s17  ;;  %v6422_v11 = vpop.permute.xlu0 %1553 }
 0x2c3   : > { %8560 = vst [vmem:[#allocation191_spill] sm:$0xff] %v6422_v11 }
 0x2c4   : > { %v6411_v8 = vpop.permute.xlu1 %1427 }
 0x2c5   : > { %8556 = vst [vmem:[#allocation187_spill] sm:$0xff] %v6411_v8  ;;  %v683_v8 = vld [vmem:[#allocation2 + $0x151] sm:$0xff] }
 0x2c6   : > { %1687 = vrot.lane.b32.xlu1 %v709_v59, %s4978_s17 }
 0x2c8   : > { %v6414_v63 = vpop.permute.xlu1 %1431 }
 0x2c9   : > { %8557 = vst [vmem:[#allocation188_spill] sm:$0xff] %v6414_v63  ;;  %v6429_v63 = vpop.permute.xlu0 %1557 }
 0x2ca   : > { %1691 = vrot.lane.b32.xlu1 %v711_v48, %s4978_s17  ;;  %8563 = vst [vmem:[#allocation194_spill] sm:$0xff] %v6429_v63 }
 0x2cc   : > { %v6419_v9 = vpop.permute.xlu1 %1435 }
 0x2cd   : > { %8559 = vst [vmem:[#allocation190_spill] sm:$0xff] %v6419_v9  ;;  %v685_v9 = vld [vmem:[#allocation2 + $0x169] sm:$0xff] }
 0x2ce   : > { %1695 = vrot.lane.b32.xlu1 %v713_v20, %s4978_s17  ;;  %v6435_v20 = vpop.permute.xlu0 %1561 }
 0x2cf   : > { %8565 = vst [vmem:[#allocation196_spill] sm:$0xff] %v6435_v20 }
 0x2d0   : > { %v6424_v50 = vpop.permute.xlu1 %1439 }
 0x2d1   : > { %8561 = vst [vmem:[#allocation192_spill] sm:$0xff] %v6424_v50  ;;  %v717_v50 = vld [vmem:[#allocation2 + $0x16a] sm:$0xff] }
 0x2d2   : > { %1571 = vrot.lane.b32.xlu1 %v683_v8, %s4977_s16 }
 0x2d4   : > { %v6427_v59 = vpop.permute.xlu1 %1443 }
 0x2d5   : > { %8562 = vst [vmem:[#allocation193_spill] sm:$0xff] %v6427_v59  ;;  %v6442_v59 = vpop.permute.xlu0 %1565 }
 0x2d6   : > { %1699 = vrot.lane.b32.xlu1 %v715_v5, %s4978_s17  ;;  %8568 = vst [vmem:[#allocation199_spill] sm:$0xff] %v6442_v59 }
 0x2d8   : > { %v6432_v48 = vpop.permute.xlu1 %1447 }
 0x2d9   : > { %8564 = vst [vmem:[#allocation195_spill] sm:$0xff] %v6432_v48  ;;  %v6448_v48 = vpop.permute.xlu0 %1569 }
 0x2da   : > { %1575 = vrot.lane.b32.xlu1 %v685_v9, %s4977_s16  ;;  %8569 = vst [vmem:[#allocation200_spill] sm:$0xff] %v6448_v48  ;;  %v689_v9 = vld [vmem:[#allocation2 + $0x199] sm:$0xff] }
 0x2dc   : > { %v6437_v11 = vpop.permute.xlu1 %1451 }
 0x2dd   : > { %8566 = vst [vmem:[#allocation197_spill] sm:$0xff] %v6437_v11  ;;  %v721_v11 = vld [vmem:[#allocation2 + $0x19a] sm:$0xff] }
 0x2de   : > { %1703 = vrot.lane.b32.xlu1 %v717_v50, %s4978_s17 }
 0x2e0   : > { %v6440_v8 = vpop.permute.xlu1 %1455 }
 0x2e1   : > { %8567 = vst [vmem:[#allocation198_spill] sm:$0xff] %v6440_v8  ;;  %v1654_v8 = vpop.permute.xlu0 %1653 }
 0x2e2   : > { %1579 = vrot.lane.b32.xlu1 %v6056_v47, %s4977_s16 }
 0x2e4   : > { %v1524_v5 = vpop.permute.xlu1 %1523 }
 0x2e5   : > { %v6458_v47 = vpop.permute.xlu0 %1657 }
 0x2e6   : > { %1707 = vrot.lane.b32.xlu1 %v6181_v7, %s4978_s17 }
 0x2e8   : > { %v6450_v20 = vpop.permute.xlu1 %1527 }
 0x2e9   : > { %v6464_v48 = vpop.permute.xlu0 %1661 }
 0x2ea   : > { %1583 = vrot.lane.b32.xlu1 %v689_v9, %s4977_s16 }
 0x2ec   : > { %v6453_v50 = vpop.permute.xlu1 %1531 }
 0x2ed   : > { %v6468_v16 = vpop.permute.xlu0 %1665 }
 0x2ee   : > { %1711 = vrot.lane.b32.xlu1 %v721_v11, %s4978_s17  ;;  %8573 = vst [vmem:[#allocation204_spill] sm:$0xff] %v6468_v16 }
 0x2f0   : > { %v6456_v59 = vpop.permute.xlu1 %1535 }
 0x2f1   : > { %v6474_v35 = vpop.permute.xlu0 %1669 }
 0x2f2   : > { %8576 = vst [vmem:[#allocation207_spill] sm:$0xff] %v6474_v35  ;;  %v8583_v35 = vld [vmem:[#allocation42_spill] sm:$0xff] }
 0x2f4   : > { %v6460_v63 = vpop.permute.xlu1 %1539 }
 0x2f5   : > { %8570 = vst [vmem:[#allocation201_spill] sm:$0xff] %v6460_v63  ;;  %v6478_v28 = vpop.permute.xlu0 %1673 }
 0x2f6   : > { %8578 = vst [vmem:[#allocation209_spill] sm:$0xff] %v6478_v28 }
 0x2f8   : > { %v6462_v7 = vpop.permute.xlu1 %1543 }
 0x2f9   : > { %8571 = vst [vmem:[#allocation202_spill] sm:$0xff] %v6462_v7  ;;  %v8580_v7 = vld [vmem:[#allocation38_spill] sm:$0xff] }
 0x2fa   : > { %v1748_v40 = vsel %vm223_vm0, %v435_v15, %v8580_v7  ;;  %v8584_v7 = vld [vmem:[#allocation43_spill] sm:$0xff] }
 0x2fc   : > { %v6466_v52 = vpop.permute.xlu1 %1547 }
 0x2fd   : > { %8572 = vst [vmem:[#allocation203_spill] sm:$0xff] %v6466_v52  ;;  %v8581_v52 = vld [vmem:[#allocation35_spill] sm:$0xff] }
 0x2fe   : > { %v1747_v16 = vsel %vm223_vm0, %v434_v46, %v8581_v52  ;;  %v1751_v52 = vsel %vm223_vm0, %v5799_v4, %v8584_v7  ;;  %v8585_v46 = vld [vmem:[#allocation98_spill] sm:$0xff] }
 0x2ff   : > { %v1780_v28 = vsel %vm1779_vm3, %v1747_v16, %v5848_v56 }
 0x300   : > { %v6470_v9 = vpop.permute.xlu1 %1551 }
 0x301   : > { %8574 = vst [vmem:[#allocation205_spill] sm:$0xff] %v6470_v9  ;;  %v8582_v9 = vld [vmem:[#allocation40_spill] sm:$0xff] }
 0x304   : > { %v6472_v24 = vpop.permute.xlu1 %1555 }
 0x305   : > { %8575 = vst [vmem:[#allocation206_spill] sm:$0xff] %v6472_v24  ;;  %v1781_v24 = vsel %vm1779_vm3, %v1748_v40, %v5858_v62  ;;  %v1813_v62 = vsel %vm1812_vm4, %v1780_v28, %v6036_v53 }
 0x306   : > { %v1814_v56 = vsel %vm1812_vm4, %v1781_v24, %v5850_v30  ;;  %v1846_v16 = vsel %vm1845_vm5, %v1813_v62, %v6163_v32  ;;  %v4863_v32 = vld [vmem:[#allocation2 + $0x38] sm:$0xff] }
 0x307   : > { %v1847_v53 = vsel %vm1845_vm5, %v1814_v56, %v5996_v58  ;;  %v1879_v28 = vsel %vm1878_vm6, %v1846_v16, %v6270_v34  ;;  %v8586_v24 = vld [vmem:[#allocation44_spill] sm:$0xff]  ;;  %v8588_v56 = vld [vmem:[#allocation102_spill] sm:$0xff]  ;;  %v8589_v16 = vld [vmem:[#allocation45_spill] sm:$0xff] }
 0x308   : > { %v6476_v11 = vpop.permute.xlu1 %1559  ;;  %v1912_v30 = vsel %vm1911_vm7, %v1879_v28, %v6375_v12 }
 0x309   : > { %8577 = vst [vmem:[#allocation208_spill] sm:$0xff] %v6476_v11  ;;  %v1749_v11 = vsel %vm223_vm0, %v5789_v6, %v8582_v9  ;;  %v1945_v34 = vsel %vm1944_vm8, %v1912_v30, %v1524_v5 }
 0x30a   : > { %v1782_v6 = vsel %vm1779_vm3, %v1749_v11, %v5870_v22  ;;  %v1880_v22 = vsel %vm1878_vm6, %v1847_v53, %v6128_v41 }
 0x30b   : > { %v1815_v9 = vsel %vm1812_vm4, %v1782_v6, %v6044_v29  ;;  %v1913_v58 = vsel %vm1911_vm7, %v1880_v22, %v6237_v51 }
 0x30c   : > { %v6480_v63 = vpop.permute.xlu1 %1563  ;;  %v1848_v12 = vsel %vm1845_vm5, %v1815_v9, %v6170_v37  ;;  %v1946_v7 = vsel %vm1944_vm8, %v1913_v58, %v6377_v54  ;;  %v8590_v37 = vld [vmem:[#allocation85_spill] sm:$0xff]  ;;  %v8591_v54 = vld [vmem:[#allocation100_spill] sm:$0xff] }
 0x30d   : > { %8579 = vst [vmem:[#allocation210_spill] sm:$0xff] %v6480_v63  ;;  %v4862_v63 = vld [vmem:[#allocation2 + $0x20] sm:$0xff]  ;;  %v1881_v5 = vsel %vm1878_vm6, %v1848_v12, %v6277_v18  ;;  %v1979_v6 = vsel %vm1977_vm9, %v1946_v7, %v1654_v8  ;;  %v4864_v18 = vld [vmem:[#allocation2 + $0x50] sm:$0xff]  ;;  %v8592_v8 = vld [vmem:[#allocation46_spill] sm:$0xff] }
 0x30e   : > { %v1750_v15 = vsel %vm223_vm0, %v4862_v63, %v8583_v35  ;;  %v6508_v35 = vpop.permute.xlu0 %1677  ;;  %v1752_v63 = vsel %vm223_vm0, %v4863_v32, %v8586_v24  ;;  %v1754_v22 = vsel %vm223_vm0, %v4864_v18, %v8592_v8  ;;  %v8593_v24 = vld [vmem:[#allocation97_spill] sm:$0xff]  ;;  %v8600_v18 = vld [vmem:[#allocation204_spill] sm:$0xff] }
 0x30f   : > { %v1783_v4 = vsel %vm1779_vm3, %v1750_v15, %v8585_v46  ;;  %v8587_v15 = vld [vmem:[#allocation96_spill] sm:$0xff]  ;;  %v1785_v29 = vsel %vm1779_vm3, %v1752_v63, %v8588_v56  ;;  %v1753_v46 = vsel %vm223_vm0, %v8590_v37, %v8589_v16 }
 0x310   : > { %v6500_v40 = vpop.permute.xlu1 %1567  ;;  %v1816_v41 = vsel %vm1812_vm4, %v1783_v4, %v8587_v15  ;;  %v1784_v4 = vsel %vm1779_vm3, %v1751_v52, %v8591_v54  ;;  %v1786_v15 = vsel %vm1779_vm3, %v1753_v46, %v5910_v23  ;;  %v8598_v46 = vld [vmem:[#allocation101_spill] sm:$0xff] }
 0x311   : > { %v1849_v51 = vsel %vm1845_vm5, %v1816_v41, %v6004_v61  ;;  %v1914_v61 = vsel %vm1911_vm7, %v1881_v5, %v6380_v55  ;;  %v1817_v30 = vsel %vm1812_vm4, %v1784_v4, %v6052_v27  ;;  %v1818_v55 = vsel %vm1812_vm4, %v1785_v29, %v8593_v24  ;;  %v8595_v41 = vld [vmem:[#allocation48_spill] sm:$0xff]  ;;  %v8604_v24 = vld [vmem:[#allocation181_spill] sm:$0xff] }
 0x312   : > { %v1882_v53 = vsel %vm1878_vm6, %v1849_v51, %v6136_v43  ;;  %v6551_v28 = vpop.permute.xlu0 %1681  ;;  %v1947_v43 = vsel %vm1944_vm8, %v1914_v61, %v6450_v20  ;;  %v1850_v63 = vsel %vm1845_vm5, %v1817_v30, %v6177_v25  ;;  %v1787_v27 = vsel %vm1779_vm3, %v1754_v22, %v5920_v13  ;;  %v4865_v25 = vld [vmem:[#allocation2 + $0x60] sm:$0xff]  ;;  %v8601_v22 = vld [vmem:[#allocation50_spill] sm:$0xff] }
 0x313   : > { %v1915_v52 = vsel %vm1911_vm7, %v1882_v53, %v6244_v19  ;;  %v1851_v19 = vsel %vm1845_vm5, %v1818_v55, %v6012_v2  ;;  %v1883_v20 = vsel %vm1878_vm6, %v1850_v63, %v6284_v14  ;;  %v4866_v14 = vld [vmem:[#allocation2 + $0x68] sm:$0xff]  ;;  %v1819_v12 = vsel %vm1812_vm4, %v1786_v15, %v6062_v60  ;;  %v4867_v53 = vld [vmem:[#allocation2 + $0x78] sm:$0xff]  ;;  %v8602_v30 = vld [vmem:[#allocation109_spill] sm:$0xff] }
 0x314   : > { %v1652_v11 = vpop.permute.xlu1 %1651  ;;  %v1948_v9 = vsel %vm1944_vm8, %v1915_v52, %v6383_v3  ;;  %v1884_v13 = vsel %vm1878_vm6, %v1851_v19, %v6144_v49  ;;  %v1916_v2 = vsel %vm1911_vm7, %v1883_v20, %v6385_v26  ;;  %v8596_v49 = vld [vmem:[#allocation99_spill] sm:$0xff]  ;;  %v1852_v26 = vsel %vm1845_vm5, %v1819_v12, %v6186_v45  ;;  %v8597_v45 = vld [vmem:[#allocation106_spill] sm:$0xff]  ;;  %v8608_v20 = vld [vmem:[#allocation201_spill] sm:$0xff] }
 0x315   : > { %v1978_v62 = vsel %vm1977_vm9, %v1945_v34, %v1652_v11  ;;  %v1981_v34 = vsel %vm1977_vm9, %v1948_v9, %v6458_v47  ;;  %v8594_v11 = vld [vmem:[#allocation47_spill] sm:$0xff]  ;;  %v1756_v47 = vsel %vm223_vm0, %v4866_v14, %v8595_v41  ;;  %v1917_v7 = vsel %vm1911_vm7, %v1884_v13, %v6251_v17  ;;  %v8610_v15 = vld [vmem:[#allocation141_spill] sm:$0xff]  ;;  %v8612_v12 = vld [vmem:[#allocation52_spill] sm:$0xff] }
 0x316   : > { %4691 = vmatprep.mubr.msk.f32.mxu0 %vm2022_vm10, %v1978_v62  ;;  %v1755_v3 = vsel %vm223_vm0, %v4865_v25, %v8594_v11  ;;  %v1949_v23 = vsel %vm1944_vm8, %v1916_v2, %v6453_v50  ;;  %v1820_v56 = vsel %vm1812_vm4, %v1787_v27, %v8596_v49  ;;  %v1950_v29 = vsel %vm1944_vm8, %v1917_v7, %v6390_v0  ;;  %v6601_v51 = vpop.permute.xlu0 %1685  ;;  %v8606_v9 = vld [vmem:[#allocation131_spill] sm:$0xff]  ;;  %v8607_v27 = vld [vmem:[#allocation158_spill] sm:$0xff]  ;;  %v8611_v2 = vld [vmem:[#allocation184_spill] sm:$0xff] }
 0x317   : > { %4692 = vmatmul.mubr.msk.f32.vlgmr.msra.gmra.mrb[0].mxu0 %vm2022_vm10, %v1979_v6  ;;  %v1789_v17 = vsel %vm1779_vm3, %v1756_v47, %v5938_v31  ;;  %v1853_v50 = vsel %vm1845_vm5, %v1820_v56, %v6022_v1  ;;  %v1885_v5 = vsel %vm1878_vm6, %v1852_v26, %v6290_v38  ;;  %v1983_v6 = vsel %vm1977_vm9, %v1950_v29, %v6464_v48  ;;  %v8609_v11 = vld [vmem:[#allocation103_spill] sm:$0xff] }
 0x318   : > { %v1656_v32 = vpop.permute.xlu1 %1655  ;;  %v1788_v0 = vsel %vm1779_vm3, %v1755_v3, %v8597_v45  ;;  %v1886_v16 = vsel %vm1878_vm6, %v1853_v50, %v6151_v36  ;;  %v1918_v31 = vsel %vm1911_vm7, %v1885_v5, %v6388_v44  ;;  %v1822_v54 = vsel %vm1812_vm4, %v1789_v17, %v8598_v46  ;;  %v4869_v47 = vld [vmem:[#allocation2 + $0x90] sm:$0xff]  ;;  %v8616_v17 = vld [vmem:[#allocation54_spill] sm:$0xff]  ;;  %v8618_v45 = vld [vmem:[#allocation76_spill] sm:$0xff] }
 0x319   : > { %v1980_v58 = vsel %vm1977_vm9, %v1947_v43, %v1656_v32  ;;  %v1821_v1 = vsel %vm1812_vm4, %v1788_v0, %v6070_v21  ;;  %v1919_v38 = vsel %vm1911_vm7, %v1886_v16, %v6258_v33  ;;  %v1951_v48 = vsel %vm1944_vm8, %v1918_v31, %v6456_v59  ;;  %v8599_v21 = vld [vmem:[#allocation49_spill] sm:$0xff]  ;;  %v8603_v43 = vld [vmem:[#allocation136_spill] sm:$0xff]  ;;  %v8614_v49 = vld [vmem:[#allocation163_spill] sm:$0xff] }
 0x31a   : > { %4694 = vmatprep.mubr.msk.f32.mxu0 %vm2022_vm10, %v1980_v58  ;;  %v1854_v36 = vsel %vm1845_vm5, %v1821_v1, %v6192_v39  ;;  %v1952_v44 = vsel %vm1944_vm8, %v1919_v38, %v6396_v42  ;;  %v1757_v61 = vsel %vm223_vm0, %v4867_v53, %v8599_v21  ;;  %v1855_v33 = vsel %vm1845_vm5, %v1822_v54, %v6030_v57  ;;  %v4868_v39 = vld [vmem:[#allocation2 + $0x80] sm:$0xff]  ;;  %v6650_v55 = vpop.permute.xlu0 %1689  ;;  %v8615_v26 = vld [vmem:[#allocation207_spill] sm:$0xff]  ;;  %v8619_v16 = vld [vmem:[#allocation182_spill] sm:$0xff] }
 0x31b   : > { %4695 = vmatmul.mubr.msk.f32.gmra.mrb[2].mxu0 %vm2022_vm10, %v1981_v34  ;;  %v1887_v59 = vsel %vm1878_vm6, %v1854_v36, %v6294_v10  ;;  %v1985_v8 = vsel %vm1977_vm9, %v1952_v44, %v8600_v18  ;;  %v1758_v42 = vsel %vm223_vm0, %v4868_v39, %v8601_v22  ;;  %v1790_v52 = vsel %vm1779_vm3, %v1757_v61, %v8602_v30  ;;  %v8605_v10 = vld [vmem:[#allocation69_spill] sm:$0xff]  ;;  %v8617_v5 = vld [vmem:[#allocation111_spill] sm:$0xff]  ;;  %v8620_v1 = vld [vmem:[#allocation72_spill] sm:$0xff] }
 0x31c   : > { %v1660_v62 = vpop.permute.xlu1 %1659  ;;  %v1888_v32 = vsel %vm1878_vm6, %v1855_v33, %v8603_v43  ;;  %v1920_v57 = vsel %vm1911_vm7, %v1887_v59, %v8604_v24  ;;  %v1791_v63 = vsel %vm1779_vm3, %v1758_v42, %v8605_v10  ;;  %v1823_v58 = vsel %vm1812_vm4, %v1790_v52, %v8606_v9  ;;  %v8622_v46 = vld [vmem:[#allocation159_spill] sm:$0xff]  ;;  %v8623_v36 = vld [vmem:[#allocation202_spill] sm:$0xff]  ;;  %v8624_v53 = vld [vmem:[#allocation104_spill] sm:$0xff] }
 0x31d   : > { %v1982_v60 = vsel %vm1977_vm9, %v1949_v23, %v1660_v62  ;;  %v1921_v19 = vsel %vm1911_vm7, %v1888_v32, %v8607_v27  ;;  %v1953_v34 = vsel %vm1944_vm8, %v1920_v57, %v8608_v20  ;;  %v1824_v3 = vsel %vm1812_vm4, %v1791_v63, %v8609_v11  ;;  %v8613_v23 = vld [vmem:[#allocation126_spill] sm:$0xff]  ;;  %v8625_v61 = vld [vmem:[#allocation143_spill] sm:$0xff]  ;;  %v8627_v42 = vld [vmem:[#allocation57_spill] sm:$0xff] }
 0x31e   : > { %4697 = vmatprep.mubr.msk.f32.mxu0 %vm2022_vm10, %v1982_v60  ;;  %v1856_v13 = vsel %vm1845_vm5, %v1823_v58, %v8610_v15  ;;  %v1954_v14 = vsel %vm1944_vm8, %v1921_v19, %v8611_v2  ;;  %v1759_v7 = vsel %vm223_vm0, %v4869_v47, %v8612_v12  ;;  %v1857_v62 = vsel %vm1845_vm5, %v1824_v3, %v8613_v23  ;;  %v4870_v60 = vld [vmem:[#allocation2 + $0x98] sm:$0xff]  ;;  %v8626_v59 = vld [vmem:[#allocation186_spill] sm:$0xff]  ;;  %v8628_v52 = vld [vmem:[#allocation127_spill] sm:$0xff] }
 0x31f   : > { %4698 = vmatmul.mubr.msk.f32.gmra.mrb[4].mxu0 %vm2022_vm10, %v1983_v6  ;;  %v1889_v56 = vsel %vm1878_vm6, %v1856_v13, %v8614_v49  ;;  %v1987_v29 = vsel %vm1977_vm9, %v1954_v14, %v8615_v26  ;;  %v1760_v50 = vsel %vm223_vm0, %v4870_v60, %v8616_v17  ;;  %v1792_v6 = vsel %vm1779_vm3, %v1759_v7, %v8617_v5  ;;  %v4871_v22 = vld [vmem:[#allocation2 + $0xa8] sm:$0xff]  ;;  %v8629_v32 = vld [vmem:[#allocation165_spill] sm:$0xff]  ;;  %v4872_v63 = vld [vmem:[#allocation2 + $0xb0] sm:$0xff] }
 0x320   : > { %v1664_v37 = vpop.permute.xlu1 %1663  ;;  %v1890_v0 = vsel %vm1878_vm6, %v1857_v62, %v8618_v45  ;;  %v1922_v31 = vsel %vm1911_vm7, %v1889_v56, %v8619_v16  ;;  %v1793_v38 = vsel %vm1779_vm3, %v1760_v50, %v8620_v1  ;;  %v1761_v30 = vsel %vm223_vm0, %v4871_v22, %v8627_v42  ;;  %v8630_v57 = vld [vmem:[#allocation209_spill] sm:$0xff]  ;;  %v8631_v9 = vld [vmem:[#allocation62_spill] sm:$0xff]  ;;  %v8636_v13 = vld [vmem:[#allocation51_spill] sm:$0xff] }
 0x321   : > { %v1984_v4 = vsel %vm1977_vm9, %v1951_v48, %v1664_v37  ;;  %v8621_v48 = vld [vmem:[#allocation133_spill] sm:$0xff]  ;;  %v1923_v54 = vsel %vm1911_vm7, %v1890_v0, %v8622_v46  ;;  %v1955_v44 = vsel %vm1944_vm8, %v1922_v31, %v8623_v36  ;;  %v1826_v21 = vsel %vm1812_vm4, %v1793_v38, %v8624_v53  ;;  %v8635_v3 = vld [vmem:[#allocation74_spill] sm:$0xff]  ;;  %v8637_v14 = vld [vmem:[#allocation160_spill] sm:$0xff] }
 0x322   : > { %4700 = vmatprep.mubr.msk.f32.mxu0 %vm2022_vm10, %v1984_v4  ;;  %v1825_v37 = vsel %vm1812_vm4, %v1792_v6, %v8621_v48  ;;  %v1956_v18 = vsel %vm1944_vm8, %v1923_v54, %v8626_v59  ;;  %v1859_v43 = vsel %vm1845_vm5, %v1826_v21, %v8628_v52  ;;  %v1762_v58 = vsel %vm223_vm0, %v4872_v63, %v8631_v9  ;;  %v8632_v27 = vld [vmem:[#allocation113_spill] sm:$0xff]  ;;  %v8638_v47 = vld [vmem:[#allocation203_spill] sm:$0xff]  ;;  %v8643_v6 = vld [vmem:[#allocation128_spill] sm:$0xff] }
 0x323   : > { %4701 = vmatmul.mubr.msk.f32.gmra.mrb[6].mxu0 %vm2022_vm10, %v1985_v8  ;;  %v1858_v33 = vsel %vm1845_vm5, %v1825_v37, %v8625_v61  ;;  %v6700_v8 = vpop.permute.xlu0 %1693  ;;  %v1989_v10 = vsel %vm1977_vm9, %v1956_v18, %v8630_v57  ;;  %v1794_v19 = vsel %vm1779_vm3, %v1761_v30, %v8632_v27  ;;  %v8633_v20 = vld [vmem:[#allocation137_spill] sm:$0xff]  ;;  %v1795_v15 = vsel %vm1779_vm3, %v1762_v58, %v8635_v3  ;;  %v8644_v0 = vld [vmem:[#allocation166_spill] sm:$0xff]  ;;  %v8646_v37 = vld [vmem:[#allocation115_spill] sm:$0xff] }
 0x324   : > { %v1668_v25 = vpop.permute.xlu1 %1667  ;;  %v1891_v24 = vsel %vm1878_vm6, %v1858_v33, %v8629_v32  ;;  %v1827_v2 = vsel %vm1812_vm4, %v1794_v19, %v8636_v13  ;;  %v8639_v23 = vld [vmem:[#allocation105_spill] sm:$0xff]  ;;  %v4874_v1 = vld [vmem:[#allocation2 + $0xc8] sm:$0xff]  ;;  %v8650_v61 = vld [vmem:[#allocation56_spill] sm:$0xff] }
 0x325   : > { %v1986_v41 = vsel %vm1977_vm9, %v1953_v34, %v1668_v25  ;;  %v1892_v34 = vsel %vm1878_vm6, %v1859_v43, %v8633_v20  ;;  %v8634_v25 = vld [vmem:[#allocation183_spill] sm:$0xff]  ;;  %v1828_v62 = vsel %vm1812_vm4, %v1795_v15, %v8639_v23  ;;  %v8640_v49 = vld [vmem:[#allocation145_spill] sm:$0xff]  ;;  %v8645_v38 = vld [vmem:[#allocation66_spill] sm:$0xff] }
 0x326   : > { %4703 = vmatprep.mubr.msk.f32.mxu0 %vm2022_vm10, %v1986_v41  ;;  %v1924_v11 = vsel %vm1911_vm7, %v1891_v24, %v8634_v25  ;;  %v1925_v41 = vsel %vm1911_vm7, %v1892_v34, %v8637_v14  ;;  %v1860_v56 = vsel %vm1845_vm5, %v1827_v2, %v8640_v49  ;;  %v8641_v26 = vld [vmem:[#allocation189_spill] sm:$0xff]  ;;  %v1861_v45 = vsel %vm1845_vm5, %v1828_v62, %v8643_v6  ;;  %v8647_v54 = vld [vmem:[#allocation138_spill] sm:$0xff]  ;;  %v8653_v30 = vld [vmem:[#allocation107_spill] sm:$0xff] }
 0x327   : > { %4704 = vmatmul.mubr.msk.f32.gmra.mrb[8].mxu0 %vm2022_vm10, %v1987_v29  ;;  %v1957_v12 = vsel %vm1944_vm8, %v1924_v11, %v8638_v47  ;;  %v1958_v29 = vsel %vm1944_vm8, %v1925_v41, %v8641_v26  ;;  %v4873_v17 = vld [vmem:[#allocation2 + $0xc0] sm:$0xff]  ;;  %v1893_v16 = vsel %vm1878_vm6, %v1860_v56, %v8644_v0  ;;  %v1764_v48 = vsel %vm223_vm0, %v4874_v1, %v8645_v38  ;;  %v6753_v53 = vpop.permute.xlu0 %1697  ;;  %v8654_v43 = vld [vmem:[#allocation147_spill] sm:$0xff]  ;;  %v4875_v63 = vld [vmem:[#allocation2 + $0xd8] sm:$0xff] }
 0x328   : > { %v1672_v4 = vpop.permute.xlu1 %1671  ;;  %v8642_v50 = vld [vmem:[#allocation65_spill] sm:$0xff]  ;;  %v1991_v31 = vsel %vm1977_vm9, %v1958_v29, %v6508_v35  ;;  %v1894_v36 = vsel %vm1878_vm6, %v1861_v45, %v8647_v54  ;;  %v8655_v24 = vld [vmem:[#allocation191_spill] sm:$0xff]  ;;  %v8656_v9 = vld [vmem:[#allocation68_spill] sm:$0xff] }
 0x329   : > { %v1988_v39 = vsel %vm1977_vm9, %v1955_v44, %v1672_v4  ;;  %v1763_v5 = vsel %vm223_vm0, %v4873_v17, %v8642_v50  ;;  %v8648_v44 = vld [vmem:[#allocation185_spill] sm:$0xff]  ;;  %v1765_v58 = vsel %vm223_vm0, %v4875_v63, %v8656_v9  ;;  %v8658_v20 = vld [vmem:[#allocation168_spill] sm:$0xff]  ;;  %v8659_v3 = vld [vmem:[#allocation71_spill] sm:$0xff] }
 0x32a   : > { %4706 = vmatprep.mubr.msk.f32.mxu0 %vm2022_vm10, %v1988_v39  ;;  %v1796_v46 = vsel %vm1779_vm3, %v1763_v5, %v8646_v37  ;;  %v1926_v4 = vsel %vm1911_vm7, %v1893_v16, %v8648_v44  ;;  %v8649_v35 = vld [vmem:[#allocation77_spill] sm:$0xff]  ;;  %v8661_v14 = vld [vmem:[#allocation139_spill] sm:$0xff]  ;;  %v8665_v49 = vld [vmem:[#allocation162_spill] sm:$0xff] }
 0x32b   : > { %4707 = vmatmul.mubr.msk.f32.gmra.mrb[10].mxu0 %vm2022_vm10, %v1989_v10  ;;  %v1797_v21 = vsel %vm1779_vm3, %v1764_v48, %v8649_v35  ;;  %v1829_v33 = vsel %vm1812_vm4, %v1796_v46, %v8650_v61  ;;  %v8651_v59 = vld [vmem:[#allocation161_spill] sm:$0xff]  ;;  %v8662_v47 = vld [vmem:[#allocation187_spill] sm:$0xff]  ;;  %v8666_v26 = vld [vmem:[#allocation206_spill] sm:$0xff]  ;;  %v6803_v16 = vpop.permute.xlu0 %1573 }
 0x32c   : > { %v1676_v7 = vpop.permute.xlu1 %1675  ;;  %v1927_v18 = vsel %vm1911_vm7, %v1894_v36, %v8651_v59  ;;  %v8652_v39 = vld [vmem:[#allocation205_spill] sm:$0xff]  ;;  %v1830_v52 = vsel %vm1812_vm4, %v1797_v21, %v8653_v30  ;;  %v1862_v32 = vsel %vm1845_vm5, %v1829_v33, %v8654_v43  ;;  %v8664_v23 = vld [vmem:[#allocation59_spill] sm:$0xff]  ;;  %v8667_v17 = vld [vmem:[#allocation108_spill] sm:$0xff] }
 0x32d   : > { %v1990_v60 = vsel %vm1977_vm9, %v1957_v12, %v1676_v7  ;;  %v1959_v22 = vsel %vm1944_vm8, %v1926_v4, %v8652_v39  ;;  %v1960_v57 = vsel %vm1944_vm8, %v1927_v18, %v8655_v24  ;;  %v8657_v27 = vld [vmem:[#allocation129_spill] sm:$0xff]  ;;  %v1895_v34 = vsel %vm1878_vm6, %v1862_v32, %v8658_v20  ;;  %v8663_v7 = vld [vmem:[#allocation80_spill] sm:$0xff]  ;;  %v8669_v45 = vld [vmem:[#allocation194_spill] sm:$0xff] }
 0x32e   : > { %4709 = vmatprep.mubr.msk.f32.mxu0 %vm2022_vm10, %v1990_v60  ;;  %v1863_v19 = vsel %vm1845_vm5, %v1830_v52, %v8657_v27  ;;  %v1993_v25 = vsel %vm1977_vm9, %v1960_v57, %v6551_v28  ;;  %v4876_v11 = vld [vmem:[#allocation2 + $0xe0] sm:$0xff]  ;;  %v1928_v12 = vsel %vm1911_vm7, %v1895_v34, %v8662_v47  ;;  %v4877_v1 = vld [vmem:[#allocation2 + $0xf0] sm:$0xff]  ;;  %v8671_v37 = vld [vmem:[#allocation130_spill] sm:$0xff] }
 0x32f   : > { %4710 = vmatmul.mubr.msk.f32.gmra.mrb[12].mxu0 %vm2022_vm10, %v1991_v31  ;;  %v1766_v15 = vsel %vm223_vm0, %v4876_v11, %v8659_v3  ;;  %v8660_v13 = vld [vmem:[#allocation117_spill] sm:$0xff]  ;;  %v1896_v41 = vsel %vm1878_vm6, %v1863_v19, %v8661_v14  ;;  %v1961_v29 = vsel %vm1944_vm8, %v1928_v12, %v8666_v26  ;;  %v8672_v54 = vld [vmem:[#allocation170_spill] sm:$0xff]  ;;  %v4878_v4 = vld [vmem:[#allocation2 + $0xf8] sm:$0xff] }
 0x330   : > { %v1680_v42 = vpop.permute.xlu1 %1679  ;;  %v1798_v2 = vsel %vm1779_vm3, %v1765_v58, %v8660_v13  ;;  %v1799_v28 = vsel %vm1779_vm3, %v1766_v15, %v8663_v7  ;;  %v1929_v56 = vsel %vm1911_vm7, %v1896_v41, %v8665_v49  ;;  %v8668_v5 = vld [vmem:[#allocation149_spill] sm:$0xff]  ;;  %v8673_v35 = vld [vmem:[#allocation75_spill] sm:$0xff]  ;;  %v8675_v59 = vld [vmem:[#allocation140_spill] sm:$0xff] }
 0x331   : > { %v1992_v10 = vsel %vm1977_vm9, %v1959_v22, %v1680_v42  ;;  %v1831_v62 = vsel %vm1812_vm4, %v1798_v2, %v8664_v23  ;;  %v1832_v50 = vsel %vm1812_vm4, %v1799_v28, %v8667_v17  ;;  %v1962_v0 = vsel %vm1944_vm8, %v1929_v56, %v8669_v45  ;;  %v8670_v38 = vld [vmem:[#allocation73_spill] sm:$0xff]  ;;  %v8674_v61 = vld [vmem:[#allocation119_spill] sm:$0xff]  ;;  %v8676_v39 = vld [vmem:[#allocation188_spill] sm:$0xff] }
 0x332   : > { %4712 = vmatprep.mubr.msk.f32.mxu0 %vm2022_vm10, %v1992_v10  ;;  %v1864_v6 = vsel %vm1845_vm5, %v1831_v62, %v8668_v5  ;;  %v1767_v48 = vsel %vm223_vm0, %v4877_v1, %v8670_v38  ;;  %v1865_v46 = vsel %vm1845_vm5, %v1832_v50, %v8671_v37  ;;  %v1995_v44 = vsel %vm1977_vm9, %v1962_v0, %v6601_v51  ;;  %v8677_v42 = vld [vmem:[#allocation82_spill] sm:$0xff]  ;;  %v8678_v30 = vld [vmem:[#allocation61_spill] sm:$0xff]  ;;  %v8679_v43 = vld [vmem:[#allocation164_spill] sm:$0xff] }
 0x333   : > { %4713 = vmatmul.mubr.msk.f32.gmra.mrb[14].mxu0 %vm2022_vm10, %v1993_v25  ;;  %v1897_v36 = vsel %vm1878_vm6, %v1864_v6, %v8672_v54  ;;  %v1768_v21 = vsel %vm223_vm0, %v4878_v4, %v8673_v35  ;;  %v1800_v33 = vsel %vm1779_vm3, %v1767_v48, %v8674_v61  ;;  %v1898_v18 = vsel %vm1878_vm6, %v1865_v46, %v8675_v59  ;;  %v8680_v24 = vld [vmem:[#allocation208_spill] sm:$0xff]  ;;  %v8681_v63 = vld [vmem:[#allocation110_spill] sm:$0xff]  ;;  %v8682_v58 = vld [vmem:[#allocation151_spill] sm:$0xff] }
 0x334   : > { %v1684_v60 = vpop.permute.xlu1 %1683  ;;  %v1930_v22 = vsel %vm1911_vm7, %v1897_v36, %v8676_v39  ;;  %v1801_v51 = vsel %vm1779_vm3, %v1768_v21, %v8677_v42  ;;  %v1833_v52 = vsel %vm1812_vm4, %v1800_v33, %v8678_v30  ;;  %v1931_v32 = vsel %vm1911_vm7, %v1898_v18, %v8679_v43  ;;  %v8683_v19 = vld [vmem:[#allocation196_spill] sm:$0xff]  ;;  %v4879_v25 = vld [vmem:[#allocation2 + $0x108] sm:$0xff]  ;;  %v8686_v2 = vld [vmem:[#allocation171_spill] sm:$0xff] }
 0x335   : > { %v1994_v31 = vsel %vm1977_vm9, %v1961_v29, %v1684_v60  ;;  %v1963_v57 = vsel %vm1944_vm8, %v1930_v22, %v8680_v24  ;;  %v1834_v9 = vsel %vm1812_vm4, %v1801_v51, %v8681_v63  ;;  %v1866_v27 = vsel %vm1845_vm5, %v1833_v52, %v8682_v58  ;;  %v8684_v11 = vld [vmem:[#allocation78_spill] sm:$0xff]  ;;  %v8685_v15 = vld [vmem:[#allocation132_spill] sm:$0xff]  ;;  %v4880_v47 = vld [vmem:[#allocation2 + $0x110] sm:$0xff]  ;;  %v1702_v29 = vpop.permute.xlu0 %1701 }
 0x336   : > { %4715 = vmatprep.mubr.msk.f32.mxu0 %vm2022_vm10, %v1994_v31  ;;  %v1964_v20 = vsel %vm1944_vm8, %v1931_v32, %v8683_v19  ;;  %v1769_v3 = vsel %vm223_vm0, %v4879_v25, %v8684_v11  ;;  %v1867_v13 = vsel %vm1845_vm5, %v1834_v9, %v8685_v15  ;;  %v1899_v14 = vsel %vm1878_vm6, %v1866_v27, %v8686_v2  ;;  %v8687_v12 = vld [vmem:[#allocation79_spill] sm:$0xff]  ;;  %v8688_v28 = vld [vmem:[#allocation121_spill] sm:$0xff]  ;;  %v8689_v62 = vld [vmem:[#allocation142_spill] sm:$0xff] }
 0x337   : > { %4716 = vmatmul.mubr.msk.f32.gmra.mrb[16].mxu0 %vm2022_vm10, %v1995_v44  ;;  %v1997_v41 = vsel %vm1977_vm9, %v1964_v20, %v6650_v55  ;;  %v1770_v7 = vsel %vm223_vm0, %v4880_v47, %v8687_v12  ;;  %v1802_v23 = vsel %vm1779_vm3, %v1769_v3, %v8688_v28  ;;  %v1900_v49 = vsel %vm1878_vm6, %v1867_v13, %v8689_v62  ;;  %v8690_v56 = vld [vmem:[#allocation190_spill] sm:$0xff]  ;;  %v8692_v17 = vld [vmem:[#allocation64_spill] sm:$0xff]  ;;  %v8693_v5 = vld [vmem:[#allocation167_spill] sm:$0xff] }
 0x338   : > { %v1688_v10 = vpop.permute.xlu1 %1687  ;;  %v1932_v26 = vsel %vm1911_vm7, %v1899_v14, %v8690_v56  ;;  %v8691_v60 = vld [vmem:[#allocation86_spill] sm:$0xff]  ;;  %v1835_v50 = vsel %vm1812_vm4, %v1802_v23, %v8692_v17  ;;  %v1933_v6 = vsel %vm1911_vm7, %v1900_v49, %v8693_v5  ;;  %v8695_v1 = vld [vmem:[#allocation112_spill] sm:$0xff]  ;;  %v8696_v48 = vld [vmem:[#allocation153_spill] sm:$0xff] }
 0x339   : > { %v1996_v34 = vsel %vm1977_vm9, %v1963_v57, %v1688_v10  ;;  %v1803_v55 = vsel %vm1779_vm3, %v1770_v7, %v8691_v60  ;;  %v8694_v45 = vld [vmem:[#allocation210_spill] sm:$0xff]  ;;  %v1868_v37 = vsel %vm1845_vm5, %v1835_v50, %v8696_v48  ;;  %v8697_v46 = vld [vmem:[#allocation199_spill] sm:$0xff]  ;;  %v8699_v35 = vld [vmem:[#allocation173_spill] sm:$0xff]  ;;  %v1578_v57 = vpop.permute.xlu0 %1577 }
 0x33a   : > { %4718 = vmatprep.mubr.msk.f32.mxu0 %vm2022_vm10, %v1996_v34  ;;  %v1965_v0 = vsel %vm1944_vm8, %v1932_v26, %v8694_v45  ;;  %v1836_v38 = vsel %vm1812_vm4, %v1803_v55, %v8695_v1  ;;  %v1966_v54 = vsel %vm1944_vm8, %v1933_v6, %v8697_v46  ;;  %v8698_v44 = vld [vmem:[#allocation134_spill] sm:$0xff]  ;;  %v1901_v21 = vsel %vm1878_vm6, %v1868_v37, %v8699_v35  ;;  %v8700_v33 = vld [vmem:[#allocation144_spill] sm:$0xff]  ;;  %v8702_v22 = vld [vmem:[#allocation169_spill] sm:$0xff] }
 0x33b   : > { %4719 = vmatmul.mubr.msk.f32.gmra.mrb[18].mxu0 %vm2022_vm10, %v1997_v41  ;;  %v1869_v4 = vsel %vm1845_vm5, %v1836_v38, %v8698_v44  ;;  %v1999_v61 = vsel %vm1977_vm9, %v1966_v54, %v6700_v8  ;;  %v8701_v18 = vld [vmem:[#allocation192_spill] sm:$0xff]  ;;  %v4881_v52 = vld [vmem:[#allocation2 + $0x128] sm:$0xff]  ;;  %v8703_v43 = vld [vmem:[#allocation83_spill] sm:$0xff] }
 0x33c   : > { %v1692_v31 = vpop.permute.xlu1 %1691  ;;  %v1902_v59 = vsel %vm1878_vm6, %v1869_v4, %v8700_v33  ;;  %v1934_v39 = vsel %vm1911_vm7, %v1901_v21, %v8701_v18  ;;  %v1772_v8 = vsel %vm223_vm0, %v4881_v52, %v8703_v43  ;;  %v8704_v32 = vld [vmem:[#allocation200_spill] sm:$0xff]  ;;  %v4882_v63 = vld [vmem:[#allocation2 + $0x120] sm:$0xff]  ;;  %v8708_v25 = vld [vmem:[#allocation63_spill] sm:$0xff] }
 0x33d   : > { %v1998_v36 = vsel %vm1977_vm9, %v1965_v0, %v1692_v31  ;;  %v1935_v42 = vsel %vm1911_vm7, %v1902_v59, %v8702_v22  ;;  %v1967_v51 = vsel %vm1944_vm8, %v1934_v39, %v6500_v40  ;;  %v8705_v9 = vld [vmem:[#allocation81_spill] sm:$0xff]  ;;  %v8706_v40 = vld [vmem:[#allocation122_spill] sm:$0xff]  ;;  %v8707_v20 = vld [vmem:[#allocation88_spill] sm:$0xff]  ;;  %v1706_v49 = vpop.permute.xlu0 %1705 }
 0x33e   : > { %4721 = vmatprep.mubr.msk.f32.mxu0 %vm2022_vm10, %v1998_v36  ;;  %v1968_v24 = vsel %vm1944_vm8, %v1935_v42, %v8704_v32  ;;  %v1771_v58 = vsel %vm223_vm0, %v4882_v63, %v8705_v9  ;;  %v1805_v34 = vsel %vm1779_vm3, %v1772_v8, %v8707_v20  ;;  %v8709_v15 = vld [vmem:[#allocation114_spill] sm:$0xff]  ;;  %v8711_v14 = vld [vmem:[#allocation53_spill] sm:$0xff]  ;;  %v8712_v47 = vld [vmem:[#allocation175_spill] sm:$0xff] }
 0x33f   : > { %4722 = vmatmul.mubr.msk.f32.gmra.mrb[20].mxu0 %vm2022_vm10, %v1999_v61  ;;  %v2001_v27 = vsel %vm1977_vm9, %v1968_v24, %v6753_v53  ;;  %v1804_v19 = vsel %vm1779_vm3, %v1771_v58, %v8706_v40  ;;  %v1838_v13 = vsel %vm1812_vm4, %v1805_v34, %v8709_v15  ;;  %v8710_v2 = vld [vmem:[#allocation154_spill] sm:$0xff]  ;;  %v8714_v23 = vld [vmem:[#allocation193_spill] sm:$0xff]  ;;  %v8715_v56 = vld [vmem:[#allocation172_spill] sm:$0xff] }
 0x340   : > { %v1696_v30 = vpop.permute.xlu1 %1695  ;;  %v1837_v11 = vsel %vm1812_vm4, %v1804_v19, %v8708_v25  ;;  %v1871_v41 = vsel %vm1845_vm5, %v1838_v13, %v8711_v14  ;;  %v8713_v7 = vld [vmem:[#allocation146_spill] sm:$0xff]  ;;  %v4883_v17 = vld [vmem:[#allocation2 + $0x140] sm:$0xff]  ;;  %v8716_v50 = vld [vmem:[#allocation87_spill] sm:$0xff] }
 0x341   : > { %v2000_v10 = vsel %vm1977_vm9, %v1967_v51, %v1696_v30  ;;  %v1870_v53 = vsel %vm1845_vm5, %v1837_v11, %v8710_v2  ;;  %v1904_v28 = vsel %vm1878_vm6, %v1871_v41, %v8713_v7  ;;  %v1774_v5 = vsel %vm223_vm0, %v4883_v17, %v8716_v50  ;;  %v4884_v0 = vld [vmem:[#allocation2 + $0x138] sm:$0xff]  ;;  %v8718_v48 = vld [vmem:[#allocation123_spill] sm:$0xff]  ;;  %v8719_v46 = vld [vmem:[#allocation90_spill] sm:$0xff]  ;;  %v1582_v61 = vpop.permute.xlu0 %1581 }
 0x342   : > { %4724 = vmatprep.mubr.msk.f32.mxu0 %vm2022_vm10, %v2000_v10  ;;  %v1903_v12 = vsel %vm1878_vm6, %v1870_v53, %v8712_v47  ;;  %v1937_v26 = vsel %vm1911_vm7, %v1904_v28, %v8715_v56  ;;  %v8717_v31 = vld [vmem:[#allocation84_spill] sm:$0xff]  ;;  %v1807_v54 = vsel %vm1779_vm3, %v1774_v5, %v8719_v46  ;;  %v8720_v36 = vld [vmem:[#allocation67_spill] sm:$0xff]  ;;  %v8727_v52 = vld [vmem:[#allocation174_spill] sm:$0xff] }
 0x343   : > { %4725 = vmatmul.mubr.msk.f32.gmra.mrb[22].mxu0 %vm2022_vm10, %v2001_v27  ;;  %v1936_v62 = vsel %vm1911_vm7, %v1903_v12, %v8714_v23  ;;  %v1970_v6 = vsel %vm1944_vm8, %v1937_v26, %v6803_v16  ;;  %v1773_v1 = vsel %vm223_vm0, %v4884_v0, %v8717_v31  ;;  %v8721_v4 = vld [vmem:[#allocation116_spill] sm:$0xff]  ;;  %v8722_v21 = vld [vmem:[#allocation155_spill] sm:$0xff]  ;;  %v8729_v40 = vld [vmem:[#allocation89_spill] sm:$0xff] }
 0x344   : > { %v1572_v3 = vpop.permute.xlu1 %1571  ;;  %v2003_v38 = vsel %vm1977_vm9, %v1970_v6, %v1702_v29  ;;  %v1806_v37 = vsel %vm1779_vm3, %v1773_v1, %v8718_v48  ;;  %v1840_v35 = vsel %vm1812_vm4, %v1807_v54, %v8721_v4  ;;  %v8723_v33 = vld [vmem:[#allocation55_spill] sm:$0xff]  ;;  %v8724_v18 = vld [vmem:[#allocation176_spill] sm:$0xff]  ;;  %v8733_v53 = vld [vmem:[#allocation118_spill] sm:$0xff] }
 0x345   : > { %v1969_v60 = vsel %vm1944_vm8, %v1936_v62, %v1572_v3  ;;  %v1839_v16 = vsel %vm1812_vm4, %v1806_v37, %v8720_v36  ;;  %v1873_v59 = vsel %vm1845_vm5, %v1840_v35, %v8723_v33  ;;  %v8725_v22 = vld [vmem:[#allocation148_spill] sm:$0xff]  ;;  %v8726_v51 = vld [vmem:[#allocation195_spill] sm:$0xff]  ;;  %v1710_v11 = vpop.permute.xlu0 %1709  ;;  %v8735_v12 = vld [vmem:[#allocation58_spill] sm:$0xff] }
 0x346   : > { %v1872_v29 = vsel %vm1845_vm5, %v1839_v16, %v8722_v21  ;;  %v1906_v42 = vsel %vm1878_vm6, %v1873_v59, %v8725_v22  ;;  %v4885_v24 = vld [vmem:[#allocation2 + $0x158] sm:$0xff]  ;;  %v8728_v10 = vld [vmem:[#allocation91_spill] sm:$0xff]  ;;  %v8736_v28 = vld [vmem:[#allocation178_spill] sm:$0xff] }
 0x347   : > { %v1905_v39 = vsel %vm1878_vm6, %v1872_v29, %v8724_v18  ;;  %v1939_v43 = vsel %vm1911_vm7, %v1906_v42, %v8727_v52  ;;  %v1776_v63 = vsel %vm223_vm0, %v4885_v24, %v8728_v10  ;;  %v4886_v27 = vld [vmem:[#allocation2 + $0x150] sm:$0xff]  ;;  %v8730_v34 = vld [vmem:[#allocation124_spill] sm:$0xff]  ;;  %v8737_v62 = vld [vmem:[#allocation150_spill] sm:$0xff] }
 0x348   : > { %v1700_v55 = vpop.permute.xlu1 %1699  ;;  %v1938_v30 = vsel %vm1911_vm7, %v1905_v39, %v8726_v51  ;;  %v1972_v9 = vsel %vm1944_vm8, %v1939_v43, %v1578_v57  ;;  %v1775_v19 = vsel %vm223_vm0, %v4886_v27, %v8729_v40  ;;  %v8731_v3 = vld [vmem:[#allocation92_spill] sm:$0xff]  ;;  %v8732_v57 = vld [vmem:[#allocation70_spill] sm:$0xff]  ;;  %v8738_v56 = vld [vmem:[#allocation197_spill] sm:$0xff] }
 0x349   : > { %v2002_v45 = vsel %vm1977_vm9, %v1969_v60, %v1700_v55  ;;  %v2005_v20 = vsel %vm1977_vm9, %v1972_v9, %v1706_v49  ;;  %v1808_v25 = vsel %vm1779_vm3, %v1775_v19, %v8730_v34  ;;  %v1809_v15 = vsel %vm1779_vm3, %v1776_v63, %v8731_v3  ;;  %v8734_v41 = vld [vmem:[#allocation156_spill] sm:$0xff]  ;;  %v8739_v60 = vld [vmem:[#allocation177_spill] sm:$0xff]  ;;  %v4887_v5 = vld [vmem:[#allocation2 + $0x170] sm:$0xff]  ;;  %v1586_v31 = vpop.permute.xlu0 %1585 }
 0x34a   : > { %4727 = vmatprep.mubr.msk.f32.mxu0 %vm2022_vm10, %v2002_v45  ;;  %v1841_v13 = vsel %vm1812_vm4, %v1808_v25, %v8732_v57  ;;  %v1842_v14 = vsel %vm1812_vm4, %v1809_v15, %v8733_v53  ;;  %v8740_v6 = vld [vmem:[#allocation94_spill] sm:$0xff]  ;;  %v8741_v48 = vld [vmem:[#allocation93_spill] sm:$0xff]  ;;  %v8743_v16 = vld [vmem:[#allocation95_spill] sm:$0xff] }
 0x34b   : > { %4728 = vmatmul.mubr.msk.f32.gmra.mrb[24].mxu0 %vm2022_vm10, %v2003_v38  ;;  %v1874_v47 = vsel %vm1845_vm5, %v1841_v13, %v8734_v41  ;;  %v1875_v7 = vsel %vm1845_vm5, %v1842_v14, %v8735_v12  ;;  %v1778_v45 = vsel %vm223_vm0, %v4887_v5, %v8740_v6  ;;  %v4888_v38 = vld [vmem:[#allocation2 + $0x168] sm:$0xff]  ;;  %v8742_v54 = vld [vmem:[#allocation125_spill] sm:$0xff]  ;;  %v8744_v4 = vld [vmem:[#allocation135_spill] sm:$0xff] }
 0x34c   : > { %v1576_v44 = vpop.permute.xlu1 %1575  ;;  %v1907_v23 = vsel %vm1878_vm6, %v1874_v47, %v8736_v28  ;;  %v1908_v49 = vsel %vm1878_vm6, %v1875_v7, %v8737_v62  ;;  %v1777_v37 = vsel %vm223_vm0, %v4888_v38, %v8741_v48  ;;  %v8745_v29 = vld [vmem:[#allocation120_spill] sm:$0xff]  ;;  %v8746_v33 = vld [vmem:[#allocation157_spill] sm:$0xff]  ;;  %v8750_v52 = vld [vmem:[#allocation198_spill] sm:$0xff] }
 0x34d   : > { %v1971_v8 = vsel %vm1944_vm8, %v1938_v30, %v1576_v44  ;;  %v1940_v26 = vsel %vm1911_vm7, %v1907_v23, %v8738_v56  ;;  %v1941_v55 = vsel %vm1911_vm7, %v1908_v49, %v8739_v60  ;;  %v1810_v36 = vsel %vm1779_vm3, %v1777_v37, %v8742_v54  ;;  %v8747_v18 = vld [vmem:[#allocation60_spill] sm:$0xff] }
 0x34e   : > { %v1974_v0 = vsel %vm1944_vm8, %v1941_v55, %v1582_v61  ;;  %v1811_v44 = vsel %vm1779_vm3, %v1778_v45, %v8743_v16  ;;  %v1843_v35 = vsel %vm1812_vm4, %v1810_v36, %v8744_v4  ;;  %v8748_v22 = vld [vmem:[#allocation180_spill] sm:$0xff] }
 0x34f   : > { %v2007_v46 = vsel %vm1977_vm9, %v1974_v0, %v1710_v11  ;;  %v1844_v61 = vsel %vm1812_vm4, %v1811_v44, %v8745_v29  ;;  %v1876_v59 = vsel %vm1845_vm5, %v1843_v35, %v8746_v33  ;;  %v8749_v51 = vld [vmem:[#allocation152_spill] sm:$0xff] }
 0x350   : > { %v1704_v32 = vpop.permute.xlu1 %1703  ;;  %v1877_v39 = vsel %vm1845_vm5, %v1844_v61, %v8747_v18  ;;  %v1909_v42 = vsel %vm1878_vm6, %v1876_v59, %v8748_v22  ;;  %v2446_v40 = vld [vmem:[#allocation3 + $0x9] sm:$0xff]  ;;  %v2445_v19 = vld [vmem:[#allocation3 + $0x1] sm:$0xff] }
 0x351   : > { %v2004_v58 = vsel %vm1977_vm9, %v1971_v8, %v1704_v32  ;;  %v1910_v30 = vsel %vm1878_vm6, %v1877_v39, %v8749_v51  ;;  %v1942_v43 = vsel %vm1911_vm7, %v1909_v42, %v8750_v52  ;;  %v1714_v8 = vpop.permute.xlu0 %1713  ;;  %v8751_v32 = vld [vmem:[#allocation179_spill] sm:$0xff]  ;;  %2736 = vrot.lane.b32.xlu0 %v2446_v40, %s4971_s10  ;;  %2734 = vrot.lane.b32.xlu1 %v2445_v19, %s4971_s10 }
 0x352   : > { %4730 = vmatprep.mubr.msk.f32.mxu0 %vm2022_vm10, %v2004_v58  ;;  %v1943_v24 = vsel %vm1911_vm7, %v1910_v30, %v8751_v32 }
 0x353   : > { %4731 = vmatmul.mubr.msk.f32.gmra.mrb[26].mxu0 %vm2022_vm10, %v2005_v20  ;;  %v1976_v9 = vsel %vm1944_vm8, %v1943_v24, %v1586_v31  ;;  %v7021_v20 = vld [vmem:[%s8294_s2] ss:$0 sm:$0xff] }
 0x354   : > { %v1580_v2 = vpop.permute.xlu1 %1579  ;;  %v2009_v27 = vsel %vm1977_vm9, %v1976_v9, %v1714_v8 }
 0x355   : > { %v1973_v17 = vsel %vm1944_vm8, %v1940_v26, %v1580_v2 }
 0x358   : > { %v1708_v50 = vpop.permute.xlu1 %1707 }
 0x359   : > { %v2006_v1 = vsel %vm1977_vm9, %v1973_v17, %v1708_v50 }
 0x35a   : > { %4733 = vmatprep.mubr.msk.f32.mxu0 %vm2022_vm10, %v2006_v1 }
 0x35b   : > { %4734 = vmatmul.mubr.msk.f32.gmra.mrb[28].mxu0 %vm2022_vm10, %v2007_v46 }
 0x35c   : > { %v1584_v21 = vpop.permute.xlu1 %1583 }
 0x35d   : > { %v1975_v10 = vsel %vm1944_vm8, %v1942_v43, %v1584_v21 }
 0x360   : > { %v1712_v63 = vpop.permute.xlu1 %1711 }
 0x361   : > { %v2008_v58 = vsel %vm1977_vm9, %v1975_v10, %v1712_v63 }
 0x362   : > { %4736 = vmatprep.mubr.msk.f32.mxu0 %vm2022_vm10, %v2008_v58 }
 0x363   : > { %4737 = vmatmul.mubr.msk.f32.gmra.mrb[30].mxu0 %vm2022_vm10, %v2009_v27 }
 0x3ea   : > { %v4693_v34 = vpop.f32.mrb[0].mxu0 }
 0x3eb   : > { %v2195_v25 = vadd.f32 %v4693_v34, %v7021_v20  ;;  %v2189_v11 = vpop.f32.mrb[1].mxu0 }
 0x3ec   : > { %v2190_v3 = vadd.f32 %v7021_v20, %v2189_v11 }
 0x3ed   : > { %v2349_v15 = vmax.f32 %v2195_v25, 0.0 }
 0x3ee   : > { %v2348_v57 = vmax.f32 %v2190_v3, 0.0  ;;  %v4696_v13 = vpop.f32.mrb[2].mxu0 }
 0x3ef   : > { %2382 = vst.msk [vmem:[#allocation3 + $0x21] sm:$0xff] %vm223_vm0, %v2349_v15  ;;  %v2205_v2 = vadd.f32 %v4696_v13, %v7021_v20  ;;  %v2199_v53 = vpop.f32.mrb[3].mxu0 }
 0x3f0   : > { %2381 = vst.msk [vmem:[#allocation3 + $0x19] sm:$0xff] %vm223_vm0, %v2348_v57  ;;  %v2200_v14 = vadd.f32 %v7021_v20, %v2199_v53 }
 0x3f1   : > { %v2351_v41 = vmax.f32 %v2205_v2, 0.0 }
 0x3f2   : > { %v2350_v47 = vmax.f32 %v2200_v14, 0.0  ;;  %v4699_v12 = vpop.f32.mrb[4].mxu0 }
 0x3f3   : > { %2384 = vst.msk [vmem:[#allocation3 + $0x39] sm:$0xff] %vm223_vm0, %v2351_v41  ;;  %v2215_v7 = vadd.f32 %v4699_v12, %v7021_v20  ;;  %v2209_v28 = vpop.f32.mrb[5].mxu0 }
 0x3f4   : > { %2383 = vst.msk [vmem:[#allocation3 + $0x31] sm:$0xff] %vm223_vm0, %v2350_v47  ;;  %v2210_v23 = vadd.f32 %v7021_v20, %v2209_v28 }
 0x3f5   : > { %v2353_v62 = vmax.f32 %v2215_v7, 0.0 }
 0x3f6   : > { %v2352_v49 = vmax.f32 %v2210_v23, 0.0  ;;  %v4702_v56 = vpop.f32.mrb[6].mxu0  ;;  %v7033_v26 = vld [vmem:[#allocation3 + $0x21] sm:$0xff] }
 0x3f7   : > { %2386 = vst.msk [vmem:[#allocation3 + $0x51] sm:$0xff] %vm223_vm0, %v2353_v62  ;;  %v2225_v60 = vadd.f32 %v4702_v56, %v7021_v20  ;;  %2740 = vrot.lane.b32.xlu0 %v7033_v26, %s4971_s10  ;;  %v2219_v55 = vpop.f32.mrb[7].mxu0  ;;  %v7039_v17 = vld [vmem:[#allocation3 + $0x19] sm:$0xff] }
 0x3f8   : > { %2385 = vst.msk [vmem:[#allocation3 + $0x49] sm:$0xff] %vm223_vm0, %v2352_v49  ;;  %v2220_v50 = vadd.f32 %v7021_v20, %v2219_v55  ;;  %2738 = vrot.lane.b32.xlu1 %v7039_v17, %s4971_s10 }
 0x3f9   : > { %v2355_v5 = vmax.f32 %v2225_v60, 0.0 }
 0x3fa   : > { %v2354_v6 = vmax.f32 %v2220_v50, 0.0  ;;  %v4705_v45 = vpop.f32.mrb[8].mxu0  ;;  %v7045_v0 = vld [vmem:[#allocation3 + $0x39] sm:$0xff] }
 0x3fb   : > { %2388 = vst.msk [vmem:[#allocation3 + $0x69] sm:$0xff] %vm223_vm0, %v2355_v5  ;;  %v2235_v31 = vadd.f32 %v4705_v45, %v7021_v20  ;;  %2744 = vrot.lane.b32.xlu0 %v7045_v0, %s4971_s10  ;;  %v2229_v1 = vpop.f32.mrb[9].mxu0  ;;  %v7051_v38 = vld [vmem:[#allocation3 + $0x31] sm:$0xff] }
 0x3fc   : > { %2387 = vst.msk [vmem:[#allocation3 + $0x61] sm:$0xff] %vm223_vm0, %v2354_v6  ;;  %v2230_v48 = vadd.f32 %v7021_v20, %v2229_v1  ;;  %2742 = vrot.lane.b32.xlu1 %v7051_v38, %s4971_s10 }
 0x3fd   : > { %v2357_v37 = vmax.f32 %v2235_v31, 0.0 }
 0x3fe   : > { %v2356_v46 = vmax.f32 %v2230_v48, 0.0  ;;  %v4708_v54 = vpop.f32.mrb[10].mxu0  ;;  %v7057_v36 = vld [vmem:[#allocation3 + $0x51] sm:$0xff] }
 0x3ff   : > { %2390 = vst.msk [vmem:[#allocation3 + $0x81] sm:$0xff] %vm223_vm0, %v2357_v37  ;;  %v2245_v16 = vadd.f32 %v4708_v54, %v7021_v20  ;;  %2748 = vrot.lane.b32.xlu0 %v7057_v36, %s4971_s10  ;;  %v2239_v44 = vpop.f32.mrb[11].mxu0  ;;  %v7063_v4 = vld [vmem:[#allocation3 + $0x49] sm:$0xff] }
 0x400   : > { %2389 = vst.msk [vmem:[#allocation3 + $0x79] sm:$0xff] %vm223_vm0, %v2356_v46  ;;  %v2240_v35 = vadd.f32 %v7021_v20, %v2239_v44  ;;  %2746 = vrot.lane.b32.xlu1 %v7063_v4, %s4971_s10 }
 0x401   : > { %v2359_v21 = vmax.f32 %v2245_v16, 0.0 }
 0x402   : > { %v2358_v29 = vmax.f32 %v2240_v35, 0.0  ;;  %v4711_v61 = vpop.f32.mrb[12].mxu0  ;;  %v7069_v33 = vld [vmem:[#allocation3 + $0x69] sm:$0xff] }
 0x403   : > { %2392 = vst.msk [vmem:[#allocation3 + $0x99] sm:$0xff] %vm223_vm0, %v2359_v21  ;;  %v2255_v59 = vadd.f32 %v4711_v61, %v7021_v20  ;;  %2752 = vrot.lane.b32.xlu0 %v7069_v33, %s4971_s10  ;;  %v2249_v18 = vpop.f32.mrb[13].mxu0  ;;  %v7075_v39 = vld [vmem:[#allocation3 + $0x61] sm:$0xff] }
 0x404   : > { %2391 = vst.msk [vmem:[#allocation3 + $0x91] sm:$0xff] %vm223_vm0, %v2358_v29  ;;  %v2250_v22 = vadd.f32 %v7021_v20, %v2249_v18  ;;  %2750 = vrot.lane.b32.xlu1 %v7075_v39, %s4971_s10 }
 0x405   : > { %v2361_v42 = vmax.f32 %v2255_v59, 0.0 }
 0x406   : > { %v2360_v51 = vmax.f32 %v2250_v22, 0.0  ;;  %v4714_v30 = vpop.f32.mrb[14].mxu0  ;;  %v7081_v52 = vld [vmem:[#allocation3 + $0x81] sm:$0xff] }
 0x407   : > { %2394 = vst.msk [vmem:[#allocation3 + $0xb1] sm:$0xff] %vm223_vm0, %v2361_v42  ;;  %v2265_v43 = vadd.f32 %v4714_v30, %v7021_v20  ;;  %2756 = vrot.lane.b32.xlu0 %v7081_v52, %s4971_s10  ;;  %v2259_v8 = vpop.f32.mrb[15].mxu0  ;;  %v7087_v32 = vld [vmem:[#allocation3 + $0x79] sm:$0xff] }
 0x408   : > { %2393 = vst.msk [vmem:[#allocation3 + $0xa9] sm:$0xff] %vm223_vm0, %v2360_v51  ;;  %v2260_v24 = vadd.f32 %v7021_v20, %v2259_v8  ;;  %2754 = vrot.lane.b32.xlu1 %v7087_v32, %s4971_s10 }
 0x409   : > { %v2363_v10 = vmax.f32 %v2265_v43, 0.0 }
 0x40a   : > { %v2362_v63 = vmax.f32 %v2260_v24, 0.0  ;;  %v4717_v9 = vpop.f32.mrb[16].mxu0  ;;  %v2458_v58 = vld [vmem:[#allocation3 + $0x99] sm:$0xff] }
 0x40b   : > { %2396 = vst.msk [vmem:[#allocation3 + $0xc9] sm:$0xff] %vm223_vm0, %v2363_v10  ;;  %v2275_v27 = vadd.f32 %v4717_v9, %v7021_v20  ;;  %2760 = vrot.lane.b32.xlu0 %v2458_v58, %s4971_s10  ;;  %v2269_v40 = vpop.f32.mrb[17].mxu0  ;;  %v2457_v19 = vld [vmem:[#allocation3 + $0x91] sm:$0xff] }
 0x40c   : > { %2395 = vst.msk [vmem:[#allocation3 + $0xc1] sm:$0xff] %vm223_vm0, %v2362_v63  ;;  %v2270_v34 = vadd.f32 %v7021_v20, %v2269_v40  ;;  %2758 = vrot.lane.b32.xlu1 %v2457_v19, %s4971_s10 }
 0x40d   : > { %v2365_v25 = vmax.f32 %v2275_v27, 0.0 }
 0x40e   : > { %v2364_v11 = vmax.f32 %v2270_v34, 0.0  ;;  %v4720_v3 = vpop.f32.mrb[18].mxu0  ;;  %v2460_v15 = vld [vmem:[#allocation3 + $0xb1] sm:$0xff] }
 0x40f   : > { %2398 = vst.msk [vmem:[#allocation3 + $0xe1] sm:$0xff] %vm223_vm0, %v2365_v25  ;;  %v2285_v57 = vadd.f32 %v4720_v3, %v7021_v20  ;;  %2764 = vrot.lane.b32.xlu0 %v2460_v15, %s4971_s10  ;;  %v2279_v13 = vpop.f32.mrb[19].mxu0  ;;  %v2459_v2 = vld [vmem:[#allocation3 + $0xa9] sm:$0xff] }
 0x410   : > { %2397 = vst.msk [vmem:[#allocation3 + $0xd9] sm:$0xff] %vm223_vm0, %v2364_v11  ;;  %v2280_v53 = vadd.f32 %v7021_v20, %v2279_v13  ;;  %2762 = vrot.lane.b32.xlu1 %v2459_v2, %s4971_s10 }
 0x411   : > { %v2367_v14 = vmax.f32 %v2285_v57, 0.0 }
 0x412   : > { %v2366_v41 = vmax.f32 %v2280_v53, 0.0  ;;  %v4723_v47 = vpop.f32.mrb[20].mxu0  ;;  %v2462_v12 = vld [vmem:[#allocation3 + $0xc9] sm:$0xff] }
 0x413   : > { %2400 = vst.msk [vmem:[#allocation3 + $0xf9] sm:$0xff] %vm223_vm0, %v2367_v14  ;;  %v2295_v7 = vadd.f32 %v4723_v47, %v7021_v20  ;;  %2768 = vrot.lane.b32.xlu0 %v2462_v12, %s4971_s10  ;;  %v2289_v28 = vpop.f32.mrb[21].mxu0  ;;  %v2461_v23 = vld [vmem:[#allocation3 + $0xc1] sm:$0xff] }
 0x414   : > { %2399 = vst.msk [vmem:[#allocation3 + $0xf1] sm:$0xff] %vm223_vm0, %v2366_v41  ;;  %v2290_v62 = vadd.f32 %v7021_v20, %v2289_v28  ;;  %2766 = vrot.lane.b32.xlu1 %v2461_v23, %s4971_s10  ;;  %v2478_v41 = vld [vmem:[#allocation3 + $0xa] sm:$0xff]  ;;  %v2477_v47 = vld [vmem:[#allocation3 + $0x2] sm:$0xff]  ;;  %v7161_v28 = vld [vmem:[#allocation3 + $0x32] sm:$0xff] }
 0x415   : > { %v2369_v49 = vmax.f32 %v2295_v7, 0.0  ;;  %v7149_v12 = vld [vmem:[#allocation3 + $0x22] sm:$0xff]  ;;  %v7157_v7 = vld [vmem:[#allocation3 + $0x3a] sm:$0xff]  ;;  %v7165_v23 = vld [vmem:[#allocation3 + $0x52] sm:$0xff] }
 0x416   : > { %v2368_v56 = vmax.f32 %v2290_v62, 0.0  ;;  %v4726_v60 = vpop.f32.mrb[22].mxu0  ;;  %v2464_v55 = vld [vmem:[#allocation3 + $0xe1] sm:$0xff]  ;;  %v7169_v62 = vld [vmem:[#allocation3 + $0x4a] sm:$0xff] }
 0x417   : > { %2402 = vst.msk [vmem:[#allocation3 + $0x111] sm:$0xff] %vm223_vm0, %v2369_v49  ;;  %v2305_v50 = vadd.f32 %v4726_v60, %v7021_v20  ;;  %2772 = vrot.lane.b32.xlu0 %v2464_v55, %s4971_s10  ;;  %v2299_v5 = vpop.f32.mrb[23].mxu0  ;;  %v2463_v6 = vld [vmem:[#allocation3 + $0xd9] sm:$0xff]  ;;  %v7173_v49 = vld [vmem:[#allocation3 + $0x6a] sm:$0xff]  ;;  %v7181_v60 = vld [vmem:[#allocation3 + $0x82] sm:$0xff] }
 0x418   : > { %2401 = vst.msk [vmem:[#allocation3 + $0x109] sm:$0xff] %vm223_vm0, %v2368_v56  ;;  %v2300_v45 = vadd.f32 %v7021_v20, %v2299_v5  ;;  %2770 = vrot.lane.b32.xlu1 %v2463_v6, %s4971_s10  ;;  %v7177_v56 = vld [vmem:[#allocation3 + $0x62] sm:$0xff]  ;;  %v7185_v55 = vld [vmem:[#allocation3 + $0x7a] sm:$0xff]  ;;  %v7193_v5 = vld [vmem:[#allocation3 + $0x92] sm:$0xff] }
 0x419   : > { %v2371_v31 = vmax.f32 %v2305_v50, 0.0  ;;  %v7189_v50 = vld [vmem:[#allocation3 + $0x9a] sm:$0xff]  ;;  %v7197_v6 = vld [vmem:[#allocation3 + $0xb2] sm:$0xff] }
 0x41a   : > { %v2370_v1 = vmax.f32 %v2300_v45, 0.0  ;;  %v2466_v48 = vld [vmem:[#allocation3 + $0xf9] sm:$0xff]  ;;  %v7201_v45 = vld [vmem:[#allocation3 + $0xaa] sm:$0xff] }
 0x41b   : > { %2404 = vst.msk [vmem:[#allocation3 + $0x129] sm:$0xff] %vm223_vm0, %v2371_v31  ;;  %2776 = vrot.lane.b32.xlu0 %v2466_v48, %s4971_s10  ;;  %v2465_v37 = vld [vmem:[#allocation3 + $0xf1] sm:$0xff]  ;;  %v2496_v48 = vld [vmem:[#allocation3 + $0xe2] sm:$0xff] }
 0x41c   : > { %2403 = vst.msk [vmem:[#allocation3 + $0x121] sm:$0xff] %vm223_vm0, %v2370_v1  ;;  %2774 = vrot.lane.b32.xlu1 %v2465_v37, %s4971_s10  ;;  %v7205_v31 = vld [vmem:[#allocation3 + $0xca] sm:$0xff]  ;;  %v7209_v1 = vld [vmem:[#allocation3 + $0xc2] sm:$0xff]  ;;  %v2495_v37 = vld [vmem:[#allocation3 + $0xda] sm:$0xff] }
 0x41e   : > { %v4729_v46 = vpop.f32.mrb[24].mxu0  ;;  %v2468_v54 = vld [vmem:[#allocation3 + $0x111] sm:$0xff] }
 0x41f   : > { %v2315_v16 = vadd.f32 %v4729_v46, %v7021_v20  ;;  %2780 = vrot.lane.b32.xlu0 %v2468_v54, %s4971_s10  ;;  %v2309_v44 = vpop.f32.mrb[25].mxu0  ;;  %v2467_v35 = vld [vmem:[#allocation3 + $0x109] sm:$0xff]  ;;  %v7214_v46 = vpop.permute.xlu0 %2736 }
 0x420   : > { %v2310_v21 = vadd.f32 %v7021_v20, %v2309_v44  ;;  %2778 = vrot.lane.b32.xlu1 %v2467_v35, %s4971_s10  ;;  %v7217_v54 = vpop.permute.xlu1 %2734  ;;  %v2497_v44 = vld [vmem:[#allocation3 + $0xf2] sm:$0xff] }
 0x421   : > { %v2373_v29 = vmax.f32 %v2315_v16, 0.0  ;;  %v2498_v16 = vld [vmem:[#allocation3 + $0xfa] sm:$0xff] }
 0x422   : > { %v2372_v61 = vmax.f32 %v2310_v21, 0.0  ;;  %v2470_v59 = vld [vmem:[#allocation3 + $0x129] sm:$0xff] }
 0x423   : > { %2406 = vst.msk [vmem:[#allocation3 + $0x141] sm:$0xff] %vm223_vm0, %v2373_v29  ;;  %2784 = vrot.lane.b32.xlu0 %v2470_v59, %s4971_s10  ;;  %v2469_v18 = vld [vmem:[#allocation3 + $0x121] sm:$0xff]  ;;  %v2500_v29 = vld [vmem:[#allocation3 + $0x112] sm:$0xff] }
 0x424   : > { %2405 = vst.msk [vmem:[#allocation3 + $0x139] sm:$0xff] %vm223_vm0, %v2372_v61  ;;  %2782 = vrot.lane.b32.xlu1 %v2469_v18, %s4971_s10  ;;  %v2499_v61 = vld [vmem:[#allocation3 + $0x10a] sm:$0xff] }
 0x426   : > { %v4732_v22 = vpop.f32.mrb[26].mxu0 }
 0x427   : > { %v2325_v42 = vadd.f32 %v4732_v22, %v7021_v20  ;;  %v2319_v51 = vpop.f32.mrb[27].mxu0  ;;  %v2502_v22 = vld [vmem:[#allocation3 + $0x12a] sm:$0xff] }
 0x428   : > { %v2320_v30 = vadd.f32 %v7021_v20, %v2319_v51 }
 0x429   : > { %v2375_v43 = vmax.f32 %v2325_v42, 0.0  ;;  %v2501_v42 = vld [vmem:[#allocation3 + $0x122] sm:$0xff] }
 0x42a   : > { %v2374_v8 = vmax.f32 %v2320_v30, 0.0  ;;  %v2472_v24 = vld [vmem:[#allocation3 + $0x141] sm:$0xff] }
 0x42b   : > { %2408 = vst.msk [vmem:[#allocation3 + $0x159] sm:$0xff] %vm223_vm0, %v2375_v43  ;;  %2788 = vrot.lane.b32.xlu0 %v2472_v24, %s4971_s10  ;;  %v2471_v10 = vld [vmem:[#allocation3 + $0x139] sm:$0xff]  ;;  %v2504_v43 = vld [vmem:[#allocation3 + $0x142] sm:$0xff] }
 0x42c   : > { %2407 = vst.msk [vmem:[#allocation3 + $0x151] sm:$0xff] %vm223_vm0, %v2374_v8  ;;  %2786 = vrot.lane.b32.xlu1 %v2471_v10, %s4971_s10  ;;  %v2503_v8 = vld [vmem:[#allocation3 + $0x13a] sm:$0xff] }
 0x42e   : > { %v4735_v63 = vpop.f32.mrb[28].mxu0 }
 0x42f   : > { %v2335_v9 = vadd.f32 %v4735_v63, %v7021_v20  ;;  %v2329_v58 = vpop.f32.mrb[29].mxu0 }
 0x430   : > { %v2330_v27 = vadd.f32 %v7021_v20, %v2329_v58 }
 0x431   : > { %v2377_v40 = vmax.f32 %v2335_v9, 0.0 }
 0x432   : > { %v2376_v19 = vmax.f32 %v2330_v27, 0.0  ;;  %v2474_v34 = vld [vmem:[#allocation3 + $0x159] sm:$0xff] }
 0x433   : > { %2410 = vst.msk [vmem:[#allocation3 + $0x171] sm:$0xff] %vm223_vm0, %v2377_v40  ;;  %2792 = vrot.lane.b32.xlu0 %v2474_v34, %s4971_s10  ;;  %v2473_v25 = vld [vmem:[#allocation3 + $0x151] sm:$0xff]  ;;  %v2506_v63 = vld [vmem:[#allocation3 + $0x15a] sm:$0xff] }
 0x434   : > { %2409 = vst.msk [vmem:[#allocation3 + $0x169] sm:$0xff] %vm223_vm0, %v2376_v19  ;;  %2790 = vrot.lane.b32.xlu1 %v2473_v25, %s4971_s10  ;;  %v2505_v9 = vld [vmem:[#allocation3 + $0x152] sm:$0xff]  ;;  %v7253_v25 = vld [vmem:[#allocation3 + $0x20] sm:$0xff] }
 0x436   : > { %v4738_v11 = vpop.f32.mrb[30].mxu0 }
 0x437   : > { %v2345_v3 = vadd.f32 %v4738_v11, %v7021_v20  ;;  %v2339_v15 = vpop.f32.mrb[31].mxu0 }
 0x438   : > { %v2340_v57 = vadd.f32 %v7021_v20, %v2339_v15  ;;  %v7153_v20 = vld [vmem:[#allocation3 + $0x1a] sm:$0xff] }
 0x439   : > { %v2379_v13 = vmax.f32 %v2345_v3, 0.0  ;;  %v7257_v3 = vld [vmem:[#allocation3 + $0x18] sm:$0xff] }
 0x43a   : > { %v2378_v2 = vmax.f32 %v2340_v57, 0.0  ;;  %v2476_v53 = vld [vmem:[#allocation3 + $0x171] sm:$0xff] }
 0x43b   : > { %2412 = vst.msk [vmem:[#allocation3 + $0x189] sm:$0xff] %vm223_vm0, %v2379_v13  ;;  %2796 = vrot.lane.b32.xlu0 %v2476_v53, %s4971_s10  ;;  %v2475_v14 = vld [vmem:[#allocation3 + $0x169] sm:$0xff]  ;;  %v2508_v40 = vld [vmem:[#allocation3 + $0x172] sm:$0xff] }
 0x43c   : > { %2411 = vst.msk [vmem:[#allocation3 + $0x181] sm:$0xff] %vm223_vm0, %v2378_v2  ;;  %2794 = vrot.lane.b32.xlu1 %v2475_v14, %s4971_s10  ;;  %v2507_v19 = vld [vmem:[#allocation3 + $0x16a] sm:$0xff]  ;;  %v7263_v15 = vld [vmem:[#allocation3 + $0x38] sm:$0xff] }
 0x43d   : > { %v7265_v57 = vld [vmem:[#allocation3 + $0x30] sm:$0xff]  ;;  %v7277_v14 = vld [vmem:[#allocation3 + $0x48] sm:$0xff] }
 0x43e   : > { %v7275_v53 = vld [vmem:[#allocation3 + $0x50] sm:$0xff] }
 0x43f   : > { %2864 = vrot.lane.b32.xlu0 %v2478_v41, %s4972_s11 }
 0x440   : > { %2862 = vrot.lane.b32.xlu1 %v2477_v47, %s4972_s11  ;;  %v7285_v47 = vld [vmem:[#allocation3 + $0x68] sm:$0xff] }
 0x443   : > { %2868 = vrot.lane.b32.xlu0 %v7149_v12, %s4972_s11 }
 0x444   : > { %2866 = vrot.lane.b32.xlu1 %v7153_v20, %s4972_s11 }
 0x447   : > { %2872 = vrot.lane.b32.xlu0 %v7157_v7, %s4972_s11 }
 0x448   : > { %2870 = vrot.lane.b32.xlu1 %v7161_v28, %s4972_s11 }
 0x44b   : > { %2876 = vrot.lane.b32.xlu0 %v7165_v23, %s4972_s11 }
 0x44c   : > { %2874 = vrot.lane.b32.xlu1 %v7169_v62, %s4972_s11 }
 0x44f   : > { %2880 = vrot.lane.b32.xlu0 %v7173_v49, %s4972_s11 }
 0x450   : > { %2878 = vrot.lane.b32.xlu1 %v7177_v56, %s4972_s11 }
 0x453   : > { %2884 = vrot.lane.b32.xlu0 %v7181_v60, %s4972_s11 }
 0x454   : > { %2882 = vrot.lane.b32.xlu1 %v7185_v55, %s4972_s11 }
 0x457   : > { %2888 = vrot.lane.b32.xlu0 %v7189_v50, %s4972_s11 }
 0x458   : > { %2886 = vrot.lane.b32.xlu1 %v7193_v5, %s4972_s11 }
 0x45b   : > { %2892 = vrot.lane.b32.xlu0 %v7197_v6, %s4972_s11 }
 0x45c   : > { %2890 = vrot.lane.b32.xlu1 %v7201_v45, %s4972_s11 }
 0x45f   : > { %2896 = vrot.lane.b32.xlu0 %v7205_v31, %s4972_s11 }
 0x460   : > { %2894 = vrot.lane.b32.xlu1 %v7209_v1, %s4972_s11 }
 0x463   : > { %2900 = vrot.lane.b32.xlu0 %v2496_v48, %s4972_s11 }
 0x464   : > { %2898 = vrot.lane.b32.xlu1 %v2495_v37, %s4972_s11  ;;  %v7289_v37 = vld [vmem:[#allocation3 + $0x60] sm:$0xff] }
 0x467   : > { %2904 = vrot.lane.b32.xlu0 %v2498_v16, %s4972_s11  ;;  %v7295_v16 = vld [vmem:[#allocation3 + $0x80] sm:$0xff] }
 0x468   : > { %2902 = vrot.lane.b32.xlu1 %v2497_v44, %s4972_s11  ;;  %v7297_v44 = vld [vmem:[#allocation3 + $0x78] sm:$0xff] }
 0x469   : > { %v7221_v35 = vpop.permute.xlu0 %2740 }
 0x46a   : > { %v7223_v21 = vpop.permute.xlu1 %2738 }
 0x46b   : > { %2908 = vrot.lane.b32.xlu0 %v2500_v29, %s4972_s11 }
 0x46c   : > { %2906 = vrot.lane.b32.xlu1 %v2499_v61, %s4972_s11 }
 0x46d   : > { %v7227_v59 = vpop.permute.xlu0 %2744 }
 0x46e   : > { %v7229_v18 = vpop.permute.xlu1 %2742 }
 0x46f   : > { %2912 = vrot.lane.b32.xlu0 %v2502_v22, %s4972_s11  ;;  %v7307_v22 = vld [vmem:[#allocation3 + $0x98] sm:$0xff] }
 0x470   : > { %2910 = vrot.lane.b32.xlu1 %v2501_v42, %s4972_s11  ;;  %8766 = vst [vmem:[#allocation47_spill] sm:$0xff] %v7307_v22  ;;  %v7309_v42 = vld [vmem:[#allocation3 + $0x90] sm:$0xff] }
 0x471   : > { %v7233_v51 = vpop.permute.xlu0 %2748 }
 0x472   : > { %8752 = vst [vmem:[#allocation38_spill] sm:$0xff] %v7233_v51  ;;  %v7235_v30 = vpop.permute.xlu1 %2746 }
 0x473   : > { %8753 = vst [vmem:[#allocation35_spill] sm:$0xff] %v7235_v30  ;;  %2916 = vrot.lane.b32.xlu0 %v2504_v43, %s4972_s11 }
 0x474   : > { %2914 = vrot.lane.b32.xlu1 %v2503_v8, %s4972_s11  ;;  %v7317_v8 = vld [vmem:[#allocation3 + $0xb0] sm:$0xff] }
 0x475   : > { %v7239_v24 = vpop.permute.xlu0 %2752 }
 0x476   : > { %8754 = vst [vmem:[#allocation40_spill] sm:$0xff] %v7239_v24  ;;  %v7241_v10 = vpop.permute.xlu1 %2750 }
 0x477   : > { %8755 = vst [vmem:[#allocation42_spill] sm:$0xff] %v7241_v10  ;;  %2920 = vrot.lane.b32.xlu0 %v2506_v63, %s4972_s11  ;;  %v2439_v10 = vld [vmem:[#allocation3 + $0x138] sm:$0xff] }
 0x478   : > { %2918 = vrot.lane.b32.xlu1 %v2505_v9, %s4972_s11  ;;  %v7321_v9 = vld [vmem:[#allocation3 + $0xa8] sm:$0xff] }
 0x479   : > { %v7245_v58 = vpop.permute.xlu0 %2756  ;;  %8769 = vst [vmem:[#allocation106_spill] sm:$0xff] %v7321_v9 }
 0x47a   : > { %8756 = vst [vmem:[#allocation43_spill] sm:$0xff] %v7245_v58  ;;  %v7247_v27 = vpop.permute.xlu1 %2754 }
 0x47b   : > { %8757 = vst [vmem:[#allocation98_spill] sm:$0xff] %v7247_v27  ;;  %2924 = vrot.lane.b32.xlu0 %v2508_v40, %s4972_s11  ;;  %v7327_v40 = vld [vmem:[#allocation3 + $0xc8] sm:$0xff]  ;;  %v2437_v27 = vld [vmem:[#allocation3 + $0x120] sm:$0xff] }
 0x47c   : > { %2922 = vrot.lane.b32.xlu1 %v2507_v19, %s4972_s11  ;;  %v7329_v19 = vld [vmem:[#allocation3 + $0xc0] sm:$0xff] }
 0x47d   : > { %v7251_v34 = vpop.permute.xlu0 %2760 }
 0x47e   : > { %8758 = vst [vmem:[#allocation44_spill] sm:$0xff] %v7251_v34  ;;  %v7255_v11 = vpop.permute.xlu1 %2758 }
 0x47f   : > { %8759 = vst [vmem:[#allocation96_spill] sm:$0xff] %v7255_v11  ;;  %2992 = vrot.lane.b32.xlu0 %v7253_v25, %s4973_s12  ;;  %v7365_v11 = vld [vmem:[#allocation3 + $0x108] sm:$0xff] }
 0x480   : > { %2990 = vrot.lane.b32.xlu1 %v7257_v3, %s4973_s12  ;;  %8777 = vst [vmem:[#allocation69_spill] sm:$0xff] %v7365_v11 }
 0x481   : > { %v7267_v13 = vpop.permute.xlu0 %2764 }
 0x482   : > { %8760 = vst [vmem:[#allocation102_spill] sm:$0xff] %v7267_v13  ;;  %v7271_v2 = vpop.permute.xlu1 %2762 }
 0x483   : > { %2996 = vrot.lane.b32.xlu0 %v7263_v15, %s4973_s12  ;;  %8761 = vst [vmem:[#allocation45_spill] sm:$0xff] %v7271_v2  ;;  %v7361_v2 = vld [vmem:[#allocation3 + $0x110] sm:$0xff] }
 0x484   : > { %2994 = vrot.lane.b32.xlu1 %v7265_v57, %s4973_s12  ;;  %8775 = vst [vmem:[#allocation136_spill] sm:$0xff] %v7361_v2 }
 0x485   : > { %v7283_v41 = vpop.permute.xlu0 %2768 }
 0x486   : > { %8762 = vst [vmem:[#allocation85_spill] sm:$0xff] %v7283_v41  ;;  %v7287_v48 = vpop.permute.xlu1 %2766 }
 0x487   : > { %3000 = vrot.lane.b32.xlu0 %v7275_v53, %s4973_s12  ;;  %8763 = vst [vmem:[#allocation100_spill] sm:$0xff] %v7287_v48 }
 0x488   : > { %2998 = vrot.lane.b32.xlu1 %v7277_v14, %s4973_s12 }
 0x489   : > { %v7299_v29 = vpop.permute.xlu0 %2772 }
 0x48a   : > { %8764 = vst [vmem:[#allocation46_spill] sm:$0xff] %v7299_v29  ;;  %v7303_v61 = vpop.permute.xlu1 %2770 }
 0x48b   : > { %3004 = vrot.lane.b32.xlu0 %v7285_v47, %s4973_s12  ;;  %8765 = vst [vmem:[#allocation97_spill] sm:$0xff] %v7303_v61  ;;  %v7341_v61 = vld [vmem:[#allocation3 + $0xd8] sm:$0xff] }
 0x48c   : > { %3002 = vrot.lane.b32.xlu1 %v7289_v37, %s4973_s12 }
 0x48d   : > { %v7315_v43 = vpop.permute.xlu0 %2776 }
 0x48e   : > { %8767 = vst [vmem:[#allocation48_spill] sm:$0xff] %v7315_v43  ;;  %v7319_v63 = vpop.permute.xlu1 %2774 }
 0x48f   : > { %3008 = vrot.lane.b32.xlu0 %v7295_v16, %s4973_s12  ;;  %8768 = vst [vmem:[#allocation99_spill] sm:$0xff] %v7319_v63  ;;  %v7339_v63 = vld [vmem:[#allocation3 + $0xe0] sm:$0xff] }
 0x490   : > { %3006 = vrot.lane.b32.xlu1 %v7297_v44, %s4973_s12 }
 0x491   : > { %v7331_v29 = vpop.permute.xlu0 %2780 }
 0x492   : > { %8770 = vst [vmem:[#allocation101_spill] sm:$0xff] %v7331_v29  ;;  %v7335_v43 = vpop.permute.xlu1 %2778  ;;  %v7349_v29 = vld [vmem:[#allocation3 + $0xf8] sm:$0xff] }
 0x493   : > { %3012 = vrot.lane.b32.xlu0 %v7307_v22, %s4973_s12  ;;  %8771 = vst [vmem:[#allocation49_spill] sm:$0xff] %v7335_v43  ;;  %v7353_v43 = vld [vmem:[#allocation3 + $0xf0] sm:$0xff] }
 0x494   : > { %3010 = vrot.lane.b32.xlu1 %v7309_v42, %s4973_s12 }
 0x495   : > { %v7347_v41 = vpop.permute.xlu0 %2784 }
 0x496   : > { %8772 = vst [vmem:[#allocation204_spill] sm:$0xff] %v7347_v41  ;;  %v7351_v48 = vpop.permute.xlu1 %2782 }
 0x497   : > { %3016 = vrot.lane.b32.xlu0 %v7317_v8, %s4973_s12  ;;  %8773 = vst [vmem:[#allocation50_spill] sm:$0xff] %v7351_v48  ;;  %v2438_v48 = vld [vmem:[#allocation3 + $0x128] sm:$0xff] }
 0x498   : > { %3014 = vrot.lane.b32.xlu1 %v7321_v9, %s4973_s12 }
 0x49b   : > { %3020 = vrot.lane.b32.xlu0 %v7327_v40, %s4973_s12 }
 0x49c   : > { %3018 = vrot.lane.b32.xlu1 %v7329_v19, %s4973_s12 }
 0x49d   : > { %v7359_v13 = vpop.permute.xlu0 %2788 }
 0x49e   : > { %8774 = vst [vmem:[#allocation109_spill] sm:$0xff] %v7359_v13  ;;  %v7363_v34 = vpop.permute.xlu1 %2786 }
 0x49f   : > { %3024 = vrot.lane.b32.xlu0 %v7339_v63, %s4973_s12  ;;  %8776 = vst [vmem:[#allocation181_spill] sm:$0xff] %v7363_v34  ;;  %v2440_v34 = vld [vmem:[#allocation3 + $0x140] sm:$0xff] }
 0x4a0   : > { %3022 = vrot.lane.b32.xlu1 %v7341_v61, %s4973_s12 }
 0x4a3   : > { %3028 = vrot.lane.b32.xlu0 %v7349_v29, %s4973_s12 }
 0x4a4   : > { %3026 = vrot.lane.b32.xlu1 %v7353_v43, %s4973_s12 }
 0x4a5   : > { %v7371_v41 = vpop.permute.xlu0 %2792 }
 0x4a6   : > { %8778 = vst [vmem:[#allocation131_spill] sm:$0xff] %v7371_v41  ;;  %v7373_v58 = vpop.permute.xlu1 %2790  ;;  %v2442_v41 = vld [vmem:[#allocation3 + $0x158] sm:$0xff] }
 0x4a7   : > { %3032 = vrot.lane.b32.xlu0 %v7361_v2, %s4973_s12  ;;  %8779 = vst [vmem:[#allocation158_spill] sm:$0xff] %v7373_v58  ;;  %v2441_v58 = vld [vmem:[#allocation3 + $0x150] sm:$0xff]  ;;  %v2540_v2 = vld [vmem:[#allocation3 + $0x188] sm:$0xff] }
 0x4a8   : > { %3030 = vrot.lane.b32.xlu1 %v7365_v11, %s4973_s12 }
 0x4ab   : > { %3036 = vrot.lane.b32.xlu0 %v2438_v48, %s4973_s12  ;;  %v2444_v48 = vld [vmem:[#allocation3 + $0x170] sm:$0xff] }
 0x4ac   : > { %3034 = vrot.lane.b32.xlu1 %v2437_v27, %s4973_s12 }
 0x4ad   : > { %v7377_v13 = vpop.permute.xlu0 %2796 }
 0x4ae   : > { %8780 = vst [vmem:[#allocation201_spill] sm:$0xff] %v7377_v13  ;;  %v7379_v24 = vpop.permute.xlu1 %2794 }
 0x4af   : > { %8781 = vst [vmem:[#allocation103_spill] sm:$0xff] %v7379_v24  ;;  %3040 = vrot.lane.b32.xlu0 %v2440_v34, %s4973_s12  ;;  %v2443_v24 = vld [vmem:[#allocation3 + $0x168] sm:$0xff] }
 0x4b0   : > { %3038 = vrot.lane.b32.xlu1 %v2439_v10, %s4973_s12 }
 0x4b1   : > { %v7383_v51 = vpop.permute.xlu0 %2864 }
 0x4b2   : > { %v7385_v11 = vpop.permute.xlu1 %2862 }
 0x4b3   : > { %3044 = vrot.lane.b32.xlu0 %v2442_v41, %s4973_s12  ;;  %v2539_v41 = vld [vmem:[#allocation3 + $0x180] sm:$0xff] }
 0x4b4   : > { %3042 = vrot.lane.b32.xlu1 %v2441_v58, %s4973_s12 }
 0x4b5   : > { %v7389_v27 = vpop.permute.xlu0 %2868 }
 0x4b6   : > { %v7391_v13 = vpop.permute.xlu1 %2866 }
 0x4b7   : > { %3048 = vrot.lane.b32.xlu0 %v2444_v48, %s4973_s12 }
 0x4b8   : > { %3046 = vrot.lane.b32.xlu1 %v2443_v24, %s4973_s12 }
 0x4b9   : > { %v7395_v10 = vpop.permute.xlu0 %2872 }
 0x4ba   : > { %v7397_v34 = vpop.permute.xlu1 %2870 }
 0x4bb   : > { %3052 = vrot.lane.b32.xlu0 %v2540_v2, %s4973_s12 }
 0x4bc   : > { %3050 = vrot.lane.b32.xlu1 %v2539_v41, %s4973_s12 }
 0x4bd   : > { %v7401_v58 = vpop.permute.xlu0 %2876 }
 0x4be   : > { %8782 = vst [vmem:[#allocation141_spill] sm:$0xff] %v7401_v58  ;;  %v7403_v30 = vpop.permute.xlu1 %2874  ;;  %v3985_v58 = vld [vmem:[%s8295_s3 + $0x18] sm:$0xff] }
 0x4bf   : > { %3120 = vrot.lane.b32.xlu0 %v7033_v26, %s4974_s13 }
 0x4c0   : > { %3118 = vrot.lane.b32.xlu1 %v7039_v17, %s4974_s13  ;;  %v3982_v17 = vld [vmem:[%s8295_s3] sm:$0xff] }
 0x4c1   : > { %v7409_v24 = vpop.permute.xlu0 %2880 }
 0x4c2   : > { %8783 = vst [vmem:[#allocation184_spill] sm:$0xff] %v7409_v24  ;;  %v7411_v48 = vpop.permute.xlu1 %2878  ;;  %v3983_v24 = vld [vmem:[%s8295_s3 + $0x8] sm:$0xff] }
 0x4c3   : > { %8784 = vst [vmem:[#allocation52_spill] sm:$0xff] %v7411_v48  ;;  %3124 = vrot.lane.b32.xlu0 %v7045_v0, %s4974_s13 }
 0x4c4   : > { %3122 = vrot.lane.b32.xlu1 %v7051_v38, %s4974_s13 }
 0x4c5   : > { %v7417_v2 = vpop.permute.xlu0 %2884 }
 0x4c6   : > { %8785 = vst [vmem:[#allocation126_spill] sm:$0xff] %v7417_v2  ;;  %v7419_v41 = vpop.permute.xlu1 %2882  ;;  %v4805_v2 = vpack.c.bf16 %v3983_v24, %v3982_v17 }
 0x4c7   : > { %8786 = vst [vmem:[#allocation163_spill] sm:$0xff] %v7419_v41  ;;  %3128 = vrot.lane.b32.xlu0 %v7057_v36, %s4974_s13 }
 0x4c8   : > { %3126 = vrot.lane.b32.xlu1 %v7063_v4, %s4974_s13  ;;  %4806 = vmatprep.subr.bf16.mxu1 %v4805_v2 }
 0x4c9   : > { %v7425_v26 = vpop.permute.xlu0 %2888  ;;  %4808 = vmatpush3.bf16.msra.mxu1 %v4805_v2 }
 0x4ca   : > { %8787 = vst [vmem:[#allocation207_spill] sm:$0xff] %v7425_v26  ;;  %v7433_v48 = vpop.permute.xlu1 %2886  ;;  %v3984_v26 = vld [vmem:[%s8295_s3 + $0x10] sm:$0xff] }
 0x4cb   : > { %8788 = vst [vmem:[#allocation54_spill] sm:$0xff] %v7433_v48  ;;  %3132 = vrot.lane.b32.xlu0 %v7069_v33, %s4974_s13  ;;  %v4809_v24 = vpack.c.bf16 %v3985_v58, %v3984_v26 }
 0x4cc   : > { %3130 = vrot.lane.b32.xlu1 %v7075_v39, %s4974_s13 }
 0x4cd   : > { %v7439_v41 = vpop.permute.xlu0 %2892  ;;  %4810 = vmatprep.subr.bf16.mxu1 %v4809_v24 }
 0x4ce   : > { %8789 = vst [vmem:[#allocation111_spill] sm:$0xff] %v7439_v41  ;;  %v7447_v48 = vpop.permute.xlu1 %2890  ;;  %4812 = vmatpush3.bf16.msra.mxu1 %v4809_v24  ;;  %v3986_v41 = vld [vmem:[%s8295_s3 + $0x20] sm:$0xf] }
 0x4cf   : > { %8790 = vst [vmem:[#allocation76_spill] sm:$0xff] %v7447_v48  ;;  %3248 = vrot.lane.b32.xlu0 %v7149_v12, %s4975_s14  ;;  %4747 = vmatprep.subr.msk.mxu1 %vm2119_vm2, %v3986_v41 }
 0x4d0   : > { %3246 = vrot.lane.b32.xlu1 %v7153_v20, %s4975_s14 }
 0x4d1   : > { %v7453_v17 = vpop.permute.xlu0 %2896 }
 0x4d2   : > { %8791 = vst [vmem:[#allocation182_spill] sm:$0xff] %v7453_v17  ;;  %v7455_v2 = vpop.permute.xlu1 %2894  ;;  %4748 = vmatpush3.msk.msra.mxu1 %vm2119_vm2, %v3986_v41 }
 0x4d3   : > { %8792 = vst [vmem:[#allocation72_spill] sm:$0xff] %v7455_v2  ;;  %3376 = vrot.lane.b32.xlu0 %v7263_v15, %s4976_s15  ;;  %v2413_v2 = vld [vmem:[#allocation3] sm:$0xff] }
 0x4d4   : > { %3374 = vrot.lane.b32.xlu1 %v7265_v57, %s4976_s15 }
 0x4d5   : > { %v7465_v12 = vpop.permute.xlu0 %2900 }
 0x4d6   : > { %8793 = vst [vmem:[#allocation133_spill] sm:$0xff] %v7465_v12  ;;  %v7468_v20 = vpop.permute.xlu1 %2898  ;;  %v2550_v12 = vld [vmem:[#allocation3 + $0x81] sm:$0xff] }
 0x4d7   : > { %8794 = vst [vmem:[#allocation159_spill] sm:$0xff] %v7468_v20  ;;  %3504 = vrot.lane.b32.xlu0 %v7045_v0, %s4977_s16 }
 0x4d8   : > { %3502 = vrot.lane.b32.xlu1 %v7051_v38, %s4977_s16 }
 0x4d9   : > { %v7474_v58 = vpop.permute.xlu0 %2904 }
 0x4da   : > { %8795 = vst [vmem:[#allocation202_spill] sm:$0xff] %v7474_v58  ;;  %v7476_v26 = vpop.permute.xlu1 %2902 }
 0x4db   : > { %8796 = vst [vmem:[#allocation104_spill] sm:$0xff] %v7476_v26  ;;  %3250 = vrot.lane.b32.xlu0 %v7161_v28, %s4975_s14 }
 0x4dc   : > { %3630 = vrot.lane.b32.xlu1 %v7161_v28, %s4978_s17 }
 0x4dd   : > { %v7482_v24 = vpop.permute.xlu0 %2908 }
 0x4de   : > { %8797 = vst [vmem:[#allocation143_spill] sm:$0xff] %v7482_v24  ;;  %v7484_v41 = vpop.permute.xlu1 %2906 }
 0x4df   : > { %8798 = vst [vmem:[#allocation186_spill] sm:$0xff] %v7484_v41  ;;  %3252 = vrot.lane.b32.xlu0 %v7157_v7, %s4975_s14 }
 0x4e0   : > { %3632 = vrot.lane.b32.xlu1 %v7157_v7, %s4978_s17 }
 0x4e1   : > { %v7490_v0 = vpop.permute.xlu0 %2912 }
 0x4e2   : > { %8799 = vst [vmem:[#allocation57_spill] sm:$0xff] %v7490_v0  ;;  %v7492_v38 = vpop.permute.xlu1 %2910 }
 0x4e3   : > { %8800 = vst [vmem:[#allocation127_spill] sm:$0xff] %v7492_v38  ;;  %3380 = vrot.lane.b32.xlu0 %v7275_v53, %s4976_s15 }
 0x4e4   : > { %3378 = vrot.lane.b32.xlu1 %v7277_v14, %s4976_s15 }
 0x4e5   : > { %v7498_v28 = vpop.permute.xlu0 %2916 }
 0x4e6   : > { %8801 = vst [vmem:[#allocation165_spill] sm:$0xff] %v7498_v28  ;;  %v7500_v24 = vpop.permute.xlu1 %2914 }
 0x4e7   : > { %8802 = vst [vmem:[#allocation209_spill] sm:$0xff] %v7500_v24  ;;  %3508 = vrot.lane.b32.xlu0 %v7057_v36, %s4977_s16 }
 0x4e8   : > { %3506 = vrot.lane.b32.xlu1 %v7063_v4, %s4977_s16 }
 0x4e9   : > { %v7506_v7 = vpop.permute.xlu0 %2920 }
 0x4ea   : > { %8803 = vst [vmem:[#allocation62_spill] sm:$0xff] %v7506_v7  ;;  %v7508_v0 = vpop.permute.xlu1 %2918 }
 0x4eb   : > { %8804 = vst [vmem:[#allocation113_spill] sm:$0xff] %v7508_v0  ;;  %3254 = vrot.lane.b32.xlu0 %v7169_v62, %s4975_s14 }
 0x4ec   : > { %3634 = vrot.lane.b32.xlu1 %v7169_v62, %s4978_s17 }
 0x4ed   : > { %v7514_v38 = vpop.permute.xlu0 %2924 }
 0x4ee   : > { %8805 = vst [vmem:[#allocation137_spill] sm:$0xff] %v7514_v38  ;;  %v7516_v28 = vpop.permute.xlu1 %2922 }
 0x4ef   : > { %8806 = vst [vmem:[#allocation183_spill] sm:$0xff] %v7516_v28  ;;  %3256 = vrot.lane.b32.xlu0 %v7165_v23, %s4975_s14 }
 0x4f0   : > { %3636 = vrot.lane.b32.xlu1 %v7165_v23, %s4978_s17 }
 0x4f1   : > { %v7522_v36 = vpop.permute.xlu0 %2992 }
 0x4f2   : > { %v7524_v4 = vpop.permute.xlu1 %2990 }
 0x4f3   : > { %3384 = vrot.lane.b32.xlu0 %v7285_v47, %s4976_s15 }
 0x4f4   : > { %3382 = vrot.lane.b32.xlu1 %v7289_v37, %s4976_s15 }
 0x4f5   : > { %v7530_v62 = vpop.permute.xlu0 %2996 }
 0x4f6   : > { %v7532_v38 = vpop.permute.xlu1 %2994 }
 0x4f7   : > { %3512 = vrot.lane.b32.xlu0 %v7069_v33, %s4977_s16 }
 0x4f8   : > { %3510 = vrot.lane.b32.xlu1 %v7075_v39, %s4977_s16 }
 0x4f9   : > { %v7538_v23 = vpop.permute.xlu0 %3000 }
 0x4fa   : > { %v7540_v28 = vpop.permute.xlu1 %2998 }
 0x4fb   : > { %3258 = vrot.lane.b32.xlu0 %v7177_v56, %s4975_s14 }
 0x4fc   : > { %3638 = vrot.lane.b32.xlu1 %v7177_v56, %s4978_s17 }
 0x4fd   : > { %v7546_v7 = vpop.permute.xlu0 %3004 }
 0x4fe   : > { %v7548_v0 = vpop.permute.xlu1 %3002 }
 0x4ff   : > { %3260 = vrot.lane.b32.xlu0 %v7173_v49, %s4975_s14 }
 0x500   : > { %3640 = vrot.lane.b32.xlu1 %v7173_v49, %s4978_s17 }
 0x501   : > { %v7554_v33 = vpop.permute.xlu0 %3008 }
 0x502   : > { %v7556_v39 = vpop.permute.xlu1 %3006 }
 0x503   : > { %3388 = vrot.lane.b32.xlu0 %v7295_v16, %s4976_s15 }
 0x504   : > { %3386 = vrot.lane.b32.xlu1 %v7297_v44, %s4976_s15 }
 0x505   : > { %v7562_v56 = vpop.permute.xlu0 %3012 }
 0x506   : > { %v7564_v24 = vpop.permute.xlu1 %3010 }
 0x507   : > { %3134 = vrot.lane.b32.xlu0 %v7087_v32, %s4974_s13 }
 0x508   : > { %3514 = vrot.lane.b32.xlu1 %v7087_v32, %s4977_s16 }
 0x509   : > { %v7570_v49 = vpop.permute.xlu0 %3016 }
 0x50a   : > { %8807 = vst [vmem:[#allocation74_spill] sm:$0xff] %v7570_v49  ;;  %v7572_v41 = vpop.permute.xlu1 %3014 }
 0x50b   : > { %8808 = vst [vmem:[#allocation51_spill] sm:$0xff] %v7572_v41  ;;  %3642 = vrot.lane.b32.xlu0 %v7185_v55, %s4978_s17 }
 0x50c   : > { %3516 = vrot.lane.b32.xlu1 %v7081_v52, %s4977_s16 }
 0x50d   : > { %v7578_v58 = vpop.permute.xlu0 %3020 }
 0x50e   : > { %8809 = vst [vmem:[#allocation160_spill] sm:$0xff] %v7578_v58  ;;  %v7580_v26 = vpop.permute.xlu1 %3018 }
 0x50f   : > { %8810 = vst [vmem:[#allocation203_spill] sm:$0xff] %v7580_v26  ;;  %3262 = vrot.lane.b32.xlu0 %v7185_v55, %s4975_s14  ;;  %v2651_v26 = vld [vmem:[#allocation3 + $0xc9] sm:$0xff] }
 0x510   : > { %3136 = vrot.lane.b32.xlu1 %v2550_v12, %s4974_s13 }
 0x511   : > { %v7585_v32 = vpop.permute.xlu0 %3024 }
 0x512   : > { %8811 = vst [vmem:[#allocation105_spill] sm:$0xff] %v7585_v32  ;;  %v7587_v20 = vpop.permute.xlu1 %3022  ;;  %v2551_v32 = vld [vmem:[#allocation3 + $0x91] sm:$0xff] }
 0x513   : > { %8812 = vst [vmem:[#allocation145_spill] sm:$0xff] %v7587_v20  ;;  %3264 = vrot.lane.b32.xlu0 %v7181_v60, %s4975_s14 }
 0x514   : > { %3644 = vrot.lane.b32.xlu1 %v7181_v60, %s4978_s17 }
 0x515   : > { %v7593_v52 = vpop.permute.xlu0 %3028 }
 0x516   : > { %8813 = vst [vmem:[#allocation189_spill] sm:$0xff] %v7593_v52  ;;  %v7595_v17 = vpop.permute.xlu1 %3026 }
 0x517   : > { %8814 = vst [vmem:[#allocation65_spill] sm:$0xff] %v7595_v17  ;;  %3392 = vrot.lane.b32.xlu0 %v7307_v22, %s4976_s15  ;;  %v2647_v17 = vld [vmem:[#allocation3 + $0x99] sm:$0xff] }
 0x518   : > { %3390 = vrot.lane.b32.xlu1 %v7309_v42, %s4976_s15 }
 0x519   : > { %v7601_v55 = vpop.permute.xlu0 %3032 }
 0x51a   : > { %8815 = vst [vmem:[#allocation128_spill] sm:$0xff] %v7601_v55  ;;  %v7603_v12 = vpop.permute.xlu1 %3030 }
 0x51b   : > { %8816 = vst [vmem:[#allocation166_spill] sm:$0xff] %v7603_v12  ;;  %3138 = vrot.lane.b32.xlu0 %v2551_v32, %s4974_s13  ;;  %v2555_v12 = vld [vmem:[#allocation3 + $0xc1] sm:$0xff] }
 0x51c   : > { %3518 = vrot.lane.b32.xlu1 %v2551_v32, %s4977_s16 }
 0x51d   : > { %v7607_v60 = vpop.permute.xlu0 %3036 }
 0x51e   : > { %8817 = vst [vmem:[#allocation66_spill] sm:$0xff] %v7607_v60  ;;  %v7609_v52 = vpop.permute.xlu1 %3034 }
 0x51f   : > { %8818 = vst [vmem:[#allocation115_spill] sm:$0xff] %v7609_v52  ;;  %3646 = vrot.lane.b32.xlu0 %v7193_v5, %s4978_s17 }
 0x520   : > { %3520 = vrot.lane.b32.xlu1 %v2647_v17, %s4977_s16 }
 0x521   : > { %v7614_v20 = vpop.permute.xlu0 %3040 }
 0x522   : > { %8819 = vst [vmem:[#allocation138_spill] sm:$0xff] %v7614_v20  ;;  %v7616_v55 = vpop.permute.xlu1 %3038 }
 0x523   : > { %8820 = vst [vmem:[#allocation185_spill] sm:$0xff] %v7616_v55  ;;  %3266 = vrot.lane.b32.xlu0 %v7193_v5, %s4975_s14 }
 0x524   : > { %3140 = vrot.lane.b32.xlu1 %v2647_v17, %s4974_s13 }
 0x525   : > { %v7621_v32 = vpop.permute.xlu0 %3044 }
 0x526   : > { %8821 = vst [vmem:[#allocation77_spill] sm:$0xff] %v7621_v32  ;;  %v7623_v60 = vpop.permute.xlu1 %3042  ;;  %v2553_v32 = vld [vmem:[#allocation3 + $0xa9] sm:$0xff] }
 0x527   : > { %8822 = vst [vmem:[#allocation56_spill] sm:$0xff] %v7623_v60  ;;  %3268 = vrot.lane.b32.xlu0 %v7189_v50, %s4975_s14 }
 0x528   : > { %3648 = vrot.lane.b32.xlu1 %v7189_v50, %s4978_s17 }
 0x529   : > { %v7629_v52 = vpop.permute.xlu0 %3048 }
 0x52a   : > { %8823 = vst [vmem:[#allocation161_spill] sm:$0xff] %v7629_v52  ;;  %v7631_v20 = vpop.permute.xlu1 %3046  ;;  %v2649_v52 = vld [vmem:[#allocation3 + $0xb1] sm:$0xff] }
 0x52b   : > { %8824 = vst [vmem:[#allocation205_spill] sm:$0xff] %v7631_v20  ;;  %3396 = vrot.lane.b32.xlu0 %v7317_v8, %s4976_s15 }
 0x52c   : > { %3394 = vrot.lane.b32.xlu1 %v7321_v9, %s4976_s15 }
 0x52d   : > { %v7637_v5 = vpop.permute.xlu0 %3052 }
 0x52e   : > { %8825 = vst [vmem:[#allocation107_spill] sm:$0xff] %v7637_v5  ;;  %v7639_v17 = vpop.permute.xlu1 %3050 }
 0x52f   : > { %8826 = vst [vmem:[#allocation147_spill] sm:$0xff] %v7639_v17  ;;  %3142 = vrot.lane.b32.xlu0 %v2553_v32, %s4974_s13 }
 0x530   : > { %3522 = vrot.lane.b32.xlu1 %v2553_v32, %s4977_s16 }
 0x531   : > { %v3121_v50 = vpop.permute.xlu0 %3120 }
 0x532   : > { %v3119_v60 = vpop.permute.xlu1 %3118 }
 0x533   : > { %3650 = vrot.lane.b32.xlu0 %v7201_v45, %s4978_s17 }
 0x534   : > { %3524 = vrot.lane.b32.xlu1 %v2649_v52, %s4977_s16 }
 0x535   : > { %v7646_v8 = vpop.permute.xlu0 %3124 }
 0x536   : > { %v7648_v20 = vpop.permute.xlu1 %3122 }
 0x537   : > { %3270 = vrot.lane.b32.xlu0 %v7201_v45, %s4975_s14 }
 0x538   : > { %3144 = vrot.lane.b32.xlu1 %v2649_v52, %s4974_s13 }
 0x539   : > { %v7653_v5 = vpop.permute.xlu0 %3128 }
 0x53a   : > { %v7655_v32 = vpop.permute.xlu1 %3126 }
 0x53b   : > { %3272 = vrot.lane.b32.xlu0 %v7197_v6, %s4975_s14 }
 0x53c   : > { %3652 = vrot.lane.b32.xlu1 %v7197_v6, %s4978_s17 }
 0x53d   : > { %v7661_v17 = vpop.permute.xlu0 %3132 }
 0x53e   : > { %v7663_v55 = vpop.permute.xlu1 %3130 }
 0x53f   : > { %3400 = vrot.lane.b32.xlu0 %v7327_v40, %s4976_s15  ;;  %v3726_v40 = vsel %vm223_vm0, %v2413_v2, %v7217_v54 }
 0x540   : > { %3398 = vrot.lane.b32.xlu1 %v7329_v19, %s4976_s15  ;;  %v2414_v19 = vld [vmem:[#allocation3 + $0x8] sm:$0xff]  ;;  %v3758_v48 = vsel %vm1779_vm3, %v3726_v40, %v7385_v11 }
 0x541   : > { %v3249_v45 = vpop.permute.xlu0 %3248  ;;  %v3727_v41 = vsel %vm223_vm0, %v2414_v19, %v7214_v46 }
 0x542   : > { %v3247_v52 = vpop.permute.xlu1 %3246  ;;  %v3759_v11 = vsel %vm1779_vm3, %v3727_v41, %v7383_v51 }
 0x543   : > { %3146 = vrot.lane.b32.xlu0 %v2555_v12, %s4974_s13 }
 0x544   : > { %3526 = vrot.lane.b32.xlu1 %v2555_v12, %s4977_s16  ;;  %v3790_v12 = vsel %vm1812_vm4, %v3758_v48, %v7524_v4  ;;  %v3791_v48 = vsel %vm1812_vm4, %v3759_v11, %v7522_v36 }
 0x545   : > { %v3377_v58 = vpop.permute.xlu0 %3376  ;;  %v3822_v22 = vsel %vm1845_vm5, %v3790_v12, %v3119_v60  ;;  %v2653_v12 = vld [vmem:[#allocation3 + $0xe1] sm:$0xff] }
 0x546   : > { %v3375_v6 = vpop.permute.xlu1 %3374  ;;  %v3854_v54 = vsel %vm1878_vm6, %v3822_v22, %v3247_v52 }
 0x547   : > { %3654 = vrot.lane.b32.xlu0 %v7209_v1, %s4978_s17  ;;  %v3886_v2 = vsel %vm1911_vm7, %v3854_v54, %v3375_v6  ;;  %v2684_v6 = vld [vmem:[#allocation3 + $0xda] sm:$0xff] }
 0x548   : > { %3528 = vrot.lane.b32.xlu1 %v2651_v26, %s4977_s16 }
 0x549   : > { %v3505_v9 = vpop.permute.xlu0 %3504 }
 0x54a   : > { %v3503_v49 = vpop.permute.xlu1 %3502 }
 0x54b   : > { %3274 = vrot.lane.b32.xlu0 %v7209_v1, %s4975_s14  ;;  %v3918_v4 = vsel %vm1944_vm8, %v3886_v2, %v3503_v49  ;;  %v3823_v1 = vsel %vm1845_vm5, %v3791_v48, %v3121_v50 }
 0x54c   : > { %3148 = vrot.lane.b32.xlu1 %v2651_v26, %s4974_s13  ;;  %v3855_v22 = vsel %vm1878_vm6, %v3823_v1, %v3249_v45  ;;  %v2557_v45 = vld [vmem:[#allocation3 + $0xd9] sm:$0xff] }
 0x54d   : > { %v3251_v40 = vpop.permute.xlu0 %3250  ;;  %v3887_v51 = vsel %vm1911_vm7, %v3855_v22, %v3377_v58  ;;  %v3730_v22 = vsel %vm223_vm0, %v7265_v57, %v7229_v18  ;;  %v3731_v18 = vsel %vm223_vm0, %v7263_v15, %v7227_v59 }
 0x54e   : > { %v3631_v60 = vpop.permute.xlu1 %3630  ;;  %v3919_v41 = vsel %vm1944_vm8, %v3887_v51, %v3505_v9  ;;  %v3728_v9 = vsel %vm223_vm0, %v7257_v3, %v7223_v21  ;;  %v3729_v21 = vsel %vm223_vm0, %v7253_v25, %v7221_v35  ;;  %v3762_v51 = vsel %vm1779_vm3, %v3730_v22, %v7397_v34 }
 0x54f   : > { %3276 = vrot.lane.b32.xlu0 %v7205_v31, %s4975_s14  ;;  %v3950_v46 = vsel %vm1977_vm9, %v3918_v4, %v3631_v60  ;;  %v3760_v58 = vsel %vm1779_vm3, %v3728_v9, %v7391_v13  ;;  %v3761_v13 = vsel %vm1779_vm3, %v3729_v21, %v7389_v27  ;;  %v2590_v60 = vld [vmem:[#allocation3 + $0xe2] sm:$0xff]  ;;  %v2655_v9 = vld [vmem:[#allocation3 + $0xf9] sm:$0xff] }
 0x550   : > { %3656 = vrot.lane.b32.xlu1 %v7205_v31, %s4978_s17  ;;  %4749 = vmatprep.mubr.msk.f32.mxu1 %vm2022_vm10, %v3950_v46 }
 0x551   : > { %v3253_v26 = vpop.permute.xlu0 %3252 }
 0x552   : > { %v3633_v36 = vpop.permute.xlu1 %3632 }
 0x553   : > { %v3951_v49 = vsel %vm1977_vm9, %v3919_v41, %v3633_v36  ;;  %3404 = vrot.lane.b32.xlu0 %v7339_v63, %s4976_s15  ;;  %v3794_v41 = vsel %vm1812_vm4, %v3762_v51, %v7540_v28  ;;  %v2657_v51 = vld [vmem:[#allocation3 + $0x111] sm:$0xff] }
 0x554   : > { %3402 = vrot.lane.b32.xlu1 %v7341_v61, %s4976_s15  ;;  %4750 = vmatmul.mubr.msk.f32.vlgmr.msra.gmra.mrb[0].mxu1 %vm2022_vm10, %v3951_v49  ;;  %v3792_v61 = vsel %vm1812_vm4, %v3760_v58, %v7532_v38  ;;  %v2559_v49 = vld [vmem:[#allocation3 + $0xf1] sm:$0xff] }
 0x555   : > { %v3381_v50 = vpop.permute.xlu0 %3380  ;;  %v3824_v19 = vsel %vm1845_vm5, %v3792_v61, %v7648_v20  ;;  %v3793_v20 = vsel %vm1812_vm4, %v3761_v13, %v7530_v62 }
 0x556   : > { %v3379_v31 = vpop.permute.xlu1 %3378  ;;  %v3856_v3 = vsel %vm1878_vm6, %v3824_v19, %v3251_v40  ;;  %v3825_v48 = vsel %vm1845_vm5, %v3793_v20, %v7646_v8  ;;  %v2592_v19 = vld [vmem:[#allocation3 + $0xfa] sm:$0xff] }
 0x557   : > { %3150 = vrot.lane.b32.xlu0 %v2557_v45, %s4974_s13  ;;  %v3888_v38 = vsel %vm1911_vm7, %v3856_v3, %v3379_v31  ;;  %v3857_v25 = vsel %vm1878_vm6, %v3825_v48, %v3253_v26  ;;  %v8829_v48 = vld [vmem:[#allocation69_spill] sm:$0xff] }
 0x558   : > { %3530 = vrot.lane.b32.xlu1 %v2557_v45, %s4977_s16  ;;  %v3889_v27 = vsel %vm1911_vm7, %v3857_v25, %v3381_v50  ;;  %v3826_v50 = vsel %vm1845_vm5, %v3794_v41, %v7655_v32  ;;  %v2686_v45 = vld [vmem:[#allocation3 + $0xf2] sm:$0xff] }
 0x559   : > { %v3509_v63 = vpop.permute.xlu0 %3508 }
 0x55a   : > { %v3507_v52 = vpop.permute.xlu1 %3506  ;;  %v3921_v62 = vsel %vm1944_vm8, %v3889_v27, %v3509_v63  ;;  %v2561_v27 = vld [vmem:[#allocation3 + $0x109] sm:$0xff] }
 0x55b   : > { %3658 = vrot.lane.b32.xlu0 %v2684_v6, %s4978_s17  ;;  %v3920_v11 = vsel %vm1944_vm8, %v3888_v38, %v3507_v52 }
 0x55c   : > { %3532 = vrot.lane.b32.xlu1 %v2653_v12, %s4977_s16 }
 0x55d   : > { %v3255_v54 = vpop.permute.xlu0 %3254 }
 0x55e   : > { %v3635_v2 = vpop.permute.xlu1 %3634  ;;  %v3858_v57 = vsel %vm1878_vm6, %v3826_v50, %v3255_v54 }
 0x55f   : > { %v3952_v35 = vsel %vm1977_vm9, %v3920_v11, %v3635_v2  ;;  %3278 = vrot.lane.b32.xlu0 %v2684_v6, %s4975_s14  ;;  %v8828_v2 = vld [vmem:[#allocation136_spill] sm:$0xff] }
 0x560   : > { %3152 = vrot.lane.b32.xlu1 %v2653_v12, %s4974_s13  ;;  %4752 = vmatprep.mubr.msk.f32.mxu1 %vm2022_vm10, %v3952_v35  ;;  %v8827_v12 = vld [vmem:[#allocation35_spill] sm:$0xff] }
 0x561   : > { %v3257_v40 = vpop.permute.xlu0 %3256  ;;  %v3732_v21 = vsel %vm223_vm0, %v7277_v14, %v8827_v12 }
 0x562   : > { %v3637_v4 = vpop.permute.xlu1 %3636  ;;  %v3764_v3 = vsel %vm1779_vm3, %v3732_v21, %v7403_v30 }
 0x563   : > { %v3953_v1 = vsel %vm1977_vm9, %v3921_v62, %v3637_v4  ;;  %3280 = vrot.lane.b32.xlu0 %v2590_v60, %s4975_s14  ;;  %v3796_v13 = vsel %vm1812_vm4, %v3764_v3, %v7548_v0  ;;  %v8831_v62 = vld [vmem:[#allocation141_spill] sm:$0xff]  ;;  %v2690_v3 = vld [vmem:[#allocation3 + $0x122] sm:$0xff] }
 0x564   : > { %3660 = vrot.lane.b32.xlu1 %v2590_v60, %s4978_s17  ;;  %4753 = vmatmul.mubr.msk.f32.gmra.mrb[2].mxu1 %vm2022_vm10, %v3953_v1  ;;  %v3828_v54 = vsel %vm1845_vm5, %v3796_v13, %v7663_v55  ;;  %v8830_v55 = vld [vmem:[#allocation38_spill] sm:$0xff] }
 0x565   : > { %v3385_v8 = vpop.permute.xlu0 %3384 }
 0x566   : > { %v3383_v46 = vpop.permute.xlu1 %3382 }
 0x567   : > { %3408 = vrot.lane.b32.xlu0 %v7349_v29, %s4976_s15  ;;  %v3763_v29 = vsel %vm1779_vm3, %v3731_v18, %v7395_v10  ;;  %v2594_v18 = vld [vmem:[#allocation3 + $0x112] sm:$0xff] }
 0x568   : > { %3406 = vrot.lane.b32.xlu1 %v7353_v43, %s4976_s15  ;;  %v3890_v43 = vsel %vm1911_vm7, %v3858_v57, %v3383_v46  ;;  %v3795_v28 = vsel %vm1812_vm4, %v3763_v29, %v7538_v23  ;;  %v2688_v46 = vld [vmem:[#allocation3 + $0x10a] sm:$0xff]  ;;  %v8832_v57 = vld [vmem:[#allocation42_spill] sm:$0xff] }
 0x569   : > { %v3513_v26 = vpop.permute.xlu0 %3512  ;;  %v3827_v59 = vsel %vm1845_vm5, %v3795_v28, %v7653_v5  ;;  %v3734_v29 = vsel %vm223_vm0, %v7289_v37, %v8832_v57  ;;  %v2626_v37 = vld [vmem:[#allocation3 + $0x120] sm:$0xff] }
 0x56a   : > { %v3511_v36 = vpop.permute.xlu1 %3510  ;;  %v3859_v10 = vsel %vm1878_vm6, %v3827_v59, %v3257_v40  ;;  %v3733_v40 = vsel %vm223_vm0, %v7275_v53, %v8830_v55  ;;  %v2627_v59 = vld [vmem:[#allocation3 + $0x128] sm:$0xff] }
 0x56b   : > { %3154 = vrot.lane.b32.xlu0 %v2559_v49, %s4974_s13  ;;  %v3922_v32 = vsel %vm1944_vm8, %v3890_v43, %v3511_v36  ;;  %v3891_v23 = vsel %vm1911_vm7, %v3859_v10, %v3385_v8  ;;  %v3765_v4 = vsel %vm1779_vm3, %v3733_v40, %v8831_v62  ;;  %v8833_v43 = vld [vmem:[#allocation52_spill] sm:$0xff] }
 0x56c   : > { %3534 = vrot.lane.b32.xlu1 %v2559_v49, %s4977_s16  ;;  %v3923_v63 = vsel %vm1944_vm8, %v3891_v23, %v3513_v26  ;;  %v3797_v1 = vsel %vm1812_vm4, %v3765_v4, %v7546_v7 }
 0x56d   : > { %v3259_v34 = vpop.permute.xlu0 %3258  ;;  %v3829_v22 = vsel %vm1845_vm5, %v3797_v1, %v7661_v17 }
 0x56e   : > { %v3639_v31 = vpop.permute.xlu1 %3638  ;;  %v3860_v11 = vsel %vm1878_vm6, %v3828_v54, %v3259_v34  ;;  %v3766_v34 = vsel %vm1779_vm3, %v3734_v29, %v8833_v43  ;;  %v2661_v29 = vld [vmem:[#allocation3 + $0x141] sm:$0xff] }
 0x56f   : > { %v3954_v15 = vsel %vm1977_vm9, %v3922_v32, %v3639_v31  ;;  %3662 = vrot.lane.b32.xlu0 %v2686_v45, %s4978_s17  ;;  %v3798_v28 = vsel %vm1812_vm4, %v3766_v34, %v7556_v39 }
 0x570   : > { %3536 = vrot.lane.b32.xlu1 %v2655_v9, %s4977_s16  ;;  %4755 = vmatprep.mubr.msk.f32.mxu1 %vm2022_vm10, %v3954_v15 }
 0x571   : > { %v3261_v58 = vpop.permute.xlu0 %3260 }
 0x572   : > { %v3641_v61 = vpop.permute.xlu1 %3640  ;;  %v3861_v26 = vsel %vm1878_vm6, %v3829_v22, %v3261_v58 }
 0x573   : > { %v3955_v52 = vsel %vm1977_vm9, %v3923_v63, %v3641_v61  ;;  %3282 = vrot.lane.b32.xlu0 %v2686_v45, %s4975_s14  ;;  %v2563_v63 = vld [vmem:[#allocation3 + $0x121] sm:$0xff] }
 0x574   : > { %3156 = vrot.lane.b32.xlu1 %v2655_v9, %s4974_s13  ;;  %4756 = vmatmul.mubr.msk.f32.gmra.mrb[4].mxu1 %vm2022_vm10, %v3955_v52  ;;  %v8834_v61 = vld [vmem:[#allocation40_spill] sm:$0xff] }
 0x575   : > { %v3389_v5 = vpop.permute.xlu0 %3388  ;;  %v3735_v52 = vsel %vm223_vm0, %v7285_v47, %v8834_v61 }
 0x576   : > { %v3387_v6 = vpop.permute.xlu1 %3386  ;;  %v3893_v53 = vsel %vm1911_vm7, %v3861_v26, %v3389_v5  ;;  %v8835_v5 = vld [vmem:[#allocation184_spill] sm:$0xff]  ;;  %v2565_v26 = vld [vmem:[#allocation3 + $0x139] sm:$0xff] }
 0x577   : > { %3284 = vrot.lane.b32.xlu0 %v2592_v19, %s4975_s14  ;;  %v3892_v14 = vsel %vm1911_vm7, %v3860_v11, %v3387_v6  ;;  %v3767_v6 = vsel %vm1779_vm3, %v3735_v52, %v8835_v5  ;;  %v2631_v52 = vld [vmem:[#allocation3 + $0x158] sm:$0xff] }
 0x578   : > { %3664 = vrot.lane.b32.xlu1 %v2592_v19, %s4978_s17  ;;  %v3799_v12 = vsel %vm1812_vm4, %v3767_v6, %v7554_v33 }
 0x579   : > { %v3135_v38 = vpop.permute.xlu0 %3134 }
 0x57a   : > { %v3515_v20 = vpop.permute.xlu1 %3514  ;;  %v3830_v31 = vsel %vm1845_vm5, %v3798_v28, %v3135_v38  ;;  %v2659_v38 = vld [vmem:[#allocation3 + $0x129] sm:$0xff] }
 0x57b   : > { %3412 = vrot.lane.b32.xlu0 %v8828_v2, %s4976_s15  ;;  %v3924_v30 = vsel %vm1944_vm8, %v3892_v14, %v3515_v20 }
 0x57c   : > { %3410 = vrot.lane.b32.xlu1 %v8829_v48, %s4976_s15 }
 0x57d   : > { %v3643_v35 = vpop.permute.xlu0 %3642 }
 0x57e   : > { %v3956_v0 = vsel %vm1977_vm9, %v3924_v30, %v3643_v35  ;;  %v3517_v25 = vpop.permute.xlu1 %3516  ;;  %v2596_v30 = vld [vmem:[#allocation3 + $0x12a] sm:$0xff]  ;;  %v8836_v35 = vld [vmem:[#allocation98_spill] sm:$0xff] }
 0x57f   : > { %3158 = vrot.lane.b32.xlu0 %v2561_v27, %s4974_s13  ;;  %4758 = vmatprep.mubr.msk.f32.mxu1 %vm2022_vm10, %v3956_v0  ;;  %v3925_v36 = vsel %vm1944_vm8, %v3893_v53, %v3517_v25  ;;  %v3736_v0 = vsel %vm223_vm0, %v7297_v44, %v8836_v35  ;;  %v8837_v25 = vld [vmem:[#allocation163_spill] sm:$0xff]  ;;  %v2628_v44 = vld [vmem:[#allocation3 + $0x138] sm:$0xff] }
 0x580   : > { %3538 = vrot.lane.b32.xlu1 %v2561_v27, %s4977_s16  ;;  %v3768_v27 = vsel %vm1779_vm3, %v3736_v0, %v8837_v25  ;;  %v8838_v53 = vld [vmem:[#allocation43_spill] sm:$0xff] }
 0x581   : > { %v3263_v60 = vpop.permute.xlu0 %3262  ;;  %v3800_v55 = vsel %vm1812_vm4, %v3768_v27, %v7564_v24  ;;  %v2663_v0 = vld [vmem:[#allocation3 + $0x159] sm:$0xff] }
 0x582   : > { %v3137_v8 = vpop.permute.xlu1 %3136  ;;  %v3862_v15 = vsel %vm1878_vm6, %v3830_v31, %v3263_v60  ;;  %v2629_v60 = vld [vmem:[#allocation3 + $0x140] sm:$0xff] }
 0x583   : > { %3666 = vrot.lane.b32.xlu0 %v2688_v46, %s4978_s17  ;;  %v3831_v13 = vsel %vm1845_vm5, %v3799_v12, %v3137_v8 }
 0x584   : > { %3540 = vrot.lane.b32.xlu1 %v2657_v51, %s4977_s16 }
 0x585   : > { %v3265_v41 = vpop.permute.xlu0 %3264 }
 0x586   : > { %v3645_v49 = vpop.permute.xlu1 %3644  ;;  %v3863_v54 = vsel %vm1878_vm6, %v3831_v13, %v3265_v41  ;;  %v3737_v41 = vsel %vm223_vm0, %v7295_v16, %v8838_v53  ;;  %v2567_v13 = vld [vmem:[#allocation3 + $0x151] sm:$0xff] }
 0x587   : > { %v3957_v7 = vsel %vm1977_vm9, %v3925_v36, %v3645_v49  ;;  %3286 = vrot.lane.b32.xlu0 %v2688_v46, %s4975_s14  ;;  %v8839_v36 = vld [vmem:[#allocation126_spill] sm:$0xff] }
 0x588   : > { %3160 = vrot.lane.b32.xlu1 %v2657_v51, %s4974_s13  ;;  %4759 = vmatmul.mubr.msk.f32.gmra.mrb[6].mxu1 %vm2022_vm10, %v3957_v7  ;;  %v3769_v49 = vsel %vm1779_vm3, %v3737_v41, %v8839_v36 }
 0x589   : > { %v3393_v17 = vpop.permute.xlu0 %3392 }
 0x58a   : > { %v3391_v50 = vpop.permute.xlu1 %3390  ;;  %v3895_v47 = vsel %vm1911_vm7, %v3863_v54, %v3393_v17  ;;  %v3801_v17 = vsel %vm1812_vm4, %v3769_v49, %v7562_v56  ;;  %v8844_v54 = vld [vmem:[#allocation47_spill] sm:$0xff] }
 0x58b   : > { %3288 = vrot.lane.b32.xlu0 %v2594_v18, %s4975_s14  ;;  %v3894_v9 = vsel %vm1911_vm7, %v3862_v15, %v3391_v50  ;;  %v8840_v15 = vld [vmem:[#allocation96_spill] sm:$0xff] }
 0x58c   : > { %3668 = vrot.lane.b32.xlu1 %v2594_v18, %s4978_s17  ;;  %v2692_v18 = vld [vmem:[#allocation3 + $0x13a] sm:$0xff] }
 0x58d   : > { %v3139_v32 = vpop.permute.xlu0 %3138 }
 0x58e   : > { %v3519_v45 = vpop.permute.xlu1 %3518  ;;  %v3832_v62 = vsel %vm1845_vm5, %v3800_v55, %v3139_v32 }
 0x58f   : > { %3416 = vrot.lane.b32.xlu0 %v2627_v59, %s4976_s15  ;;  %v3926_v10 = vsel %vm1944_vm8, %v3894_v9, %v3519_v45  ;;  %v2598_v59 = vld [vmem:[#allocation3 + $0x142] sm:$0xff]  ;;  %v8841_v9 = vld [vmem:[#allocation54_spill] sm:$0xff] }
 0x590   : > { %3414 = vrot.lane.b32.xlu1 %v2626_v37, %s4976_s15  ;;  %v3738_v37 = vsel %vm223_vm0, %v7309_v42, %v8840_v15  ;;  %v2630_v42 = vld [vmem:[#allocation3 + $0x150] sm:$0xff]  ;;  %v8853_v15 = vld [vmem:[#allocation160_spill] sm:$0xff] }
 0x591   : > { %v3647_v23 = vpop.permute.xlu0 %3646 }
 0x592   : > { %v3958_v58 = vsel %vm1977_vm9, %v3926_v10, %v3647_v23  ;;  %v3521_v39 = vpop.permute.xlu1 %3520  ;;  %v3770_v10 = vsel %vm1779_vm3, %v3738_v37, %v8841_v9  ;;  %v8842_v23 = vld [vmem:[#allocation51_spill] sm:$0xff] }
 0x593   : > { %3162 = vrot.lane.b32.xlu0 %v2563_v63, %s4974_s13  ;;  %4761 = vmatprep.mubr.msk.f32.mxu1 %vm2022_vm10, %v3958_v58  ;;  %v3927_v11 = vsel %vm1944_vm8, %v3895_v47, %v3521_v39  ;;  %v3802_v58 = vsel %vm1812_vm4, %v3770_v10, %v8842_v23  ;;  %v2696_v10 = vld [vmem:[#allocation3 + $0x16a] sm:$0xff] }
 0x594   : > { %3542 = vrot.lane.b32.xlu1 %v2563_v63, %s4977_s16 }
 0x595   : > { %v3267_v19 = vpop.permute.xlu0 %3266 }
 0x596   : > { %v3141_v21 = vpop.permute.xlu1 %3140  ;;  %v3864_v1 = vsel %vm1878_vm6, %v3832_v62, %v3267_v19 }
 0x597   : > { %3670 = vrot.lane.b32.xlu0 %v2690_v3, %s4978_s17  ;;  %v3833_v57 = vsel %vm1845_vm5, %v3801_v17, %v3141_v21 }
 0x598   : > { %3544 = vrot.lane.b32.xlu1 %v2659_v38, %s4977_s16 }
 0x599   : > { %v3269_v20 = vpop.permute.xlu0 %3268 }
 0x59a   : > { %v3649_v2 = vpop.permute.xlu1 %3648  ;;  %v3865_v43 = vsel %vm1878_vm6, %v3833_v57, %v3269_v20  ;;  %v8845_v20 = vld [vmem:[#allocation207_spill] sm:$0xff] }
 0x59b   : > { %v3959_v14 = vsel %vm1977_vm9, %v3927_v11, %v3649_v2  ;;  %3290 = vrot.lane.b32.xlu0 %v2690_v3, %s4975_s14 }
 0x59c   : > { %3164 = vrot.lane.b32.xlu1 %v2659_v38, %s4974_s13  ;;  %4762 = vmatmul.mubr.msk.f32.gmra.mrb[8].mxu1 %vm2022_vm10, %v3959_v14  ;;  %v8843_v38 = vld [vmem:[#allocation44_spill] sm:$0xff]  ;;  %v8846_v14 = vld [vmem:[#allocation74_spill] sm:$0xff] }
 0x59d   : > { %v3397_v33 = vpop.permute.xlu0 %3396  ;;  %v3739_v47 = vsel %vm223_vm0, %v8844_v54, %v8843_v38  ;;  %v8855_v38 = vld [vmem:[#allocation72_spill] sm:$0xff] }
 0x59e   : > { %v3395_v48 = vpop.permute.xlu1 %3394  ;;  %v3897_v16 = vsel %vm1911_vm7, %v3865_v43, %v3397_v33  ;;  %v3771_v11 = vsel %vm1779_vm3, %v3739_v47, %v8845_v20  ;;  %v8856_v47 = vld [vmem:[#allocation145_spill] sm:$0xff] }
 0x59f   : > { %3292 = vrot.lane.b32.xlu0 %v2596_v30, %s4975_s14  ;;  %v3896_v8 = vsel %vm1911_vm7, %v3864_v1, %v3395_v48  ;;  %v3803_v33 = vsel %vm1812_vm4, %v3771_v11, %v8846_v14 }
 0x5a0   : > { %3672 = vrot.lane.b32.xlu1 %v2596_v30, %s4978_s17  ;;  %v2694_v30 = vld [vmem:[#allocation3 + $0x152] sm:$0xff] }
 0x5a1   : > { %v3143_v40 = vpop.permute.xlu0 %3142 }
 0x5a2   : > { %v3523_v4 = vpop.permute.xlu1 %3522  ;;  %v3834_v63 = vsel %vm1845_vm5, %v3802_v58, %v3143_v40  ;;  %v2665_v58 = vld [vmem:[#allocation3 + $0x171] sm:$0xff] }
 0x5a3   : > { %3420 = vrot.lane.b32.xlu0 %v2629_v60, %s4976_s15  ;;  %v3928_v46 = vsel %vm1944_vm8, %v3896_v8, %v3523_v4  ;;  %v8847_v8 = vld [vmem:[#allocation45_spill] sm:$0xff] }
 0x5a4   : > { %3418 = vrot.lane.b32.xlu1 %v2628_v44, %s4976_s15  ;;  %v2600_v44 = vld [vmem:[#allocation3 + $0x15a] sm:$0xff] }
 0x5a5   : > { %v3651_v22 = vpop.permute.xlu0 %3650 }
 0x5a6   : > { %v3960_v51 = vsel %vm1977_vm9, %v3928_v46, %v3651_v22  ;;  %v3525_v24 = vpop.permute.xlu1 %3524  ;;  %v8848_v46 = vld [vmem:[#allocation106_spill] sm:$0xff] }
 0x5a7   : > { %3166 = vrot.lane.b32.xlu0 %v2565_v26, %s4974_s13  ;;  %4764 = vmatprep.mubr.msk.f32.mxu1 %vm2022_vm10, %v3960_v51  ;;  %v3929_v28 = vsel %vm1944_vm8, %v3897_v16, %v3525_v24  ;;  %v3740_v22 = vsel %vm223_vm0, %v8848_v46, %v8847_v8  ;;  %v8849_v51 = vld [vmem:[#allocation76_spill] sm:$0xff]  ;;  %v8859_v46 = vld [vmem:[#allocation105_spill] sm:$0xff] }
 0x5a8   : > { %3546 = vrot.lane.b32.xlu1 %v2565_v26, %s4977_s16  ;;  %v3772_v24 = vsel %vm1779_vm3, %v3740_v22, %v8849_v51  ;;  %v8850_v26 = vld [vmem:[#allocation203_spill] sm:$0xff] }
 0x5a9   : > { %v3271_v7 = vpop.permute.xlu0 %3270  ;;  %v3804_v53 = vsel %vm1812_vm4, %v3772_v24, %v8850_v26  ;;  %v2698_v24 = vld [vmem:[#allocation3 + $0x182] sm:$0xff] }
 0x5aa   : > { %v3145_v50 = vpop.permute.xlu1 %3144  ;;  %v3866_v5 = vsel %vm1878_vm6, %v3834_v63, %v3271_v7  ;;  %v2633_v7 = vld [vmem:[#allocation3 + $0x170] sm:$0xff] }
 0x5ab   : > { %3674 = vrot.lane.b32.xlu0 %v2692_v18, %s4978_s17  ;;  %v3835_v35 = vsel %vm1845_vm5, %v3803_v33, %v3145_v50  ;;  %v2632_v50 = vld [vmem:[#allocation3 + $0x168] sm:$0xff] }
 0x5ac   : > { %3548 = vrot.lane.b32.xlu1 %v2661_v29, %s4977_s16  ;;  %v2635_v33 = vld [vmem:[#allocation3 + $0x188] sm:$0xff] }
 0x5ad   : > { %v3273_v34 = vpop.permute.xlu0 %3272 }
 0x5ae   : > { %v3653_v32 = vpop.permute.xlu1 %3652  ;;  %v3867_v25 = vsel %vm1878_vm6, %v3835_v35, %v3273_v34  ;;  %v2569_v34 = vld [vmem:[#allocation3 + $0x169] sm:$0xff] }
 0x5af   : > { %v3961_v31 = vsel %vm1977_vm9, %v3929_v28, %v3653_v32  ;;  %3294 = vrot.lane.b32.xlu0 %v2692_v18, %s4975_s14  ;;  %v4889_v28 = vld [vmem:[#allocation3 + $0xb0] sm:$0xff]  ;;  %v8851_v32 = vld [vmem:[#allocation102_spill] sm:$0xff] }
 0x5b0   : > { %3168 = vrot.lane.b32.xlu1 %v2661_v29, %s4974_s13  ;;  %4765 = vmatmul.mubr.msk.f32.gmra.mrb[10].mxu1 %vm2022_vm10, %v3961_v31  ;;  %v3741_v31 = vsel %vm223_vm0, %v4889_v28, %v8851_v32  ;;  %v8861_v28 = vld [vmem:[#allocation159_spill] sm:$0xff] }
 0x5b1   : > { %v3401_v56 = vpop.permute.xlu0 %3400 }
 0x5b2   : > { %v3399_v45 = vpop.permute.xlu1 %3398  ;;  %v3899_v27 = vsel %vm1911_vm7, %v3867_v25, %v3401_v56  ;;  %v8852_v56 = vld [vmem:[#allocation111_spill] sm:$0xff] }
 0x5b3   : > { %3296 = vrot.lane.b32.xlu0 %v2598_v59, %s4975_s14  ;;  %v3898_v6 = vsel %vm1911_vm7, %v3866_v5, %v3399_v45  ;;  %v3773_v45 = vsel %vm1779_vm3, %v3741_v31, %v8852_v56  ;;  %v2637_v31 = vld [vmem:[#allocation3 + $0x1a0] sm:$0xff]  ;;  %v8862_v56 = vld [vmem:[#allocation65_spill] sm:$0xff] }
 0x5b4   : > { %3676 = vrot.lane.b32.xlu1 %v2598_v59, %s4978_s17  ;;  %v3805_v37 = vsel %vm1812_vm4, %v3773_v45, %v8853_v15  ;;  %v2636_v15 = vld [vmem:[#allocation3 + $0x198] sm:$0xff] }
 0x5b5   : > { %v3147_v39 = vpop.permute.xlu0 %3146 }
 0x5b6   : > { %v3527_v61 = vpop.permute.xlu1 %3526  ;;  %v3836_v36 = vsel %vm1845_vm5, %v3804_v53, %v3147_v39  ;;  %v2667_v53 = vld [vmem:[#allocation3 + $0x189] sm:$0xff] }
 0x5b7   : > { %3424 = vrot.lane.b32.xlu0 %v2631_v52, %s4976_s15  ;;  %v3930_v19 = vsel %vm1944_vm8, %v3898_v6, %v3527_v61 }
 0x5b8   : > { %3422 = vrot.lane.b32.xlu1 %v2630_v42, %s4976_s15 }
 0x5b9   : > { %v3655_v12 = vpop.permute.xlu0 %3654 }
 0x5ba   : > { %v3962_v21 = vsel %vm1977_vm9, %v3930_v19, %v3655_v12  ;;  %v3529_v3 = vpop.permute.xlu1 %3528  ;;  %v2602_v12 = vld [vmem:[#allocation3 + $0x172] sm:$0xff] }
 0x5bb   : > { %3170 = vrot.lane.b32.xlu0 %v2567_v13, %s4974_s13  ;;  %4767 = vmatprep.mubr.msk.f32.mxu1 %vm2022_vm10, %v3962_v21  ;;  %v3931_v40 = vsel %vm1944_vm8, %v3899_v27, %v3529_v3  ;;  %v4890_v21 = vld [vmem:[#allocation3 + $0xc0] sm:$0xff]  ;;  %v8854_v3 = vld [vmem:[#allocation100_spill] sm:$0xff] }
 0x5bc   : > { %3550 = vrot.lane.b32.xlu1 %v2567_v13, %s4977_s16  ;;  %v3742_v13 = vsel %vm223_vm0, %v4890_v21, %v8854_v3  ;;  %v8864_v21 = vld [vmem:[#allocation133_spill] sm:$0xff] }
 0x5bd   : > { %v3275_v2 = vpop.permute.xlu0 %3274  ;;  %v3774_v54 = vsel %vm1779_vm3, %v3742_v13, %v8855_v38  ;;  %v2700_v38 = vld [vmem:[#allocation3 + $0x19a] sm:$0xff] }
 0x5be   : > { %v3149_v48 = vpop.permute.xlu1 %3148  ;;  %v3868_v17 = vsel %vm1878_vm6, %v3836_v36, %v3275_v2  ;;  %v3806_v20 = vsel %vm1812_vm4, %v3774_v54, %v8856_v47  ;;  %v8865_v54 = vld [vmem:[#allocation189_spill] sm:$0xff] }
 0x5bf   : > { %3678 = vrot.lane.b32.xlu0 %v2694_v30, %s4978_s17  ;;  %v3837_v23 = vsel %vm1845_vm5, %v3805_v37, %v3149_v48 }
 0x5c0   : > { %3552 = vrot.lane.b32.xlu1 %v2663_v0, %s4977_s16 }
 0x5c1   : > { %v3277_v55 = vpop.permute.xlu0 %3276 }
 0x5c2   : > { %v3657_v62 = vpop.permute.xlu1 %3656  ;;  %v3869_v39 = vsel %vm1878_vm6, %v3837_v23, %v3277_v55 }
 0x5c3   : > { %v3963_v4 = vsel %vm1977_vm9, %v3931_v40, %v3657_v62  ;;  %3298 = vrot.lane.b32.xlu0 %v2694_v30, %s4975_s14  ;;  %v2634_v30 = vld [vmem:[#allocation3 + $0x180] sm:$0xff]  ;;  %v4891_v62 = vld [vmem:[#allocation3 + $0xc8] sm:$0xff] }
 0x5c4   : > { %3172 = vrot.lane.b32.xlu1 %v2663_v0, %s4974_s13  ;;  %4768 = vmatmul.mubr.msk.f32.gmra.mrb[12].mxu1 %vm2022_vm10, %v3963_v4  ;;  %v2571_v40 = vld [vmem:[#allocation3 + $0x181] sm:$0xff]  ;;  %v8857_v4 = vld [vmem:[#allocation85_spill] sm:$0xff] }
 0x5c5   : > { %v3405_v60 = vpop.permute.xlu0 %3404 }
 0x5c6   : > { %v3403_v1 = vpop.permute.xlu1 %3402  ;;  %v3901_v63 = vsel %vm1911_vm7, %v3869_v39, %v3405_v60  ;;  %v3743_v60 = vsel %vm223_vm0, %v4891_v62, %v8857_v4  ;;  %v8867_v62 = vld [vmem:[#allocation104_spill] sm:$0xff] }
 0x5c7   : > { %3300 = vrot.lane.b32.xlu0 %v2600_v44, %s4975_s14  ;;  %v3900_v18 = vsel %vm1911_vm7, %v3868_v17, %v3403_v1  ;;  %v8858_v1 = vld [vmem:[#allocation182_spill] sm:$0xff] }
 0x5c8   : > { %3680 = vrot.lane.b32.xlu1 %v2600_v44, %s4978_s17  ;;  %v3775_v44 = vsel %vm1779_vm3, %v3743_v60, %v8858_v1  ;;  %v8868_v60 = vld [vmem:[#allocation166_spill] sm:$0xff] }
 0x5c9   : > { %v3151_v41 = vpop.permute.xlu0 %3150  ;;  %v3807_v22 = vsel %vm1812_vm4, %v3775_v44, %v8859_v46 }
 0x5ca   : > { %v3531_v49 = vpop.permute.xlu1 %3530  ;;  %v3838_v2 = vsel %vm1845_vm5, %v3806_v20, %v3151_v41 }
 0x5cb   : > { %3428 = vrot.lane.b32.xlu0 %v2633_v7, %s4976_s15  ;;  %v3932_v57 = vsel %vm1944_vm8, %v3900_v18, %v3531_v49 }
 0x5cc   : > { %3426 = vrot.lane.b32.xlu1 %v2632_v50, %s4976_s15 }
 0x5cd   : > { %v3659_v29 = vpop.permute.xlu0 %3658 }
 0x5ce   : > { %v3964_v43 = vsel %vm1977_vm9, %v3932_v57, %v3659_v29  ;;  %v3533_v16 = vpop.permute.xlu1 %3532  ;;  %v2604_v29 = vld [vmem:[#allocation3 + $0x18a] sm:$0xff] }
 0x5cf   : > { %3174 = vrot.lane.b32.xlu0 %v2569_v34, %s4974_s13  ;;  %4770 = vmatprep.mubr.msk.f32.mxu1 %vm2022_vm10, %v3964_v43  ;;  %v3933_v52 = vsel %vm1944_vm8, %v3901_v63, %v3533_v16  ;;  %v4892_v43 = vld [vmem:[#allocation3 + $0xd8] sm:$0xff]  ;;  %v8860_v16 = vld [vmem:[#allocation97_spill] sm:$0xff] }
 0x5d0   : > { %3554 = vrot.lane.b32.xlu1 %v2569_v34, %s4977_s16  ;;  %v3744_v34 = vsel %vm223_vm0, %v4892_v43, %v8860_v16 }
 0x5d1   : > { %v3279_v59 = vpop.permute.xlu0 %3278  ;;  %v3776_v32 = vsel %vm1779_vm3, %v3744_v34, %v8861_v28 }
 0x5d2   : > { %v3153_v9 = vpop.permute.xlu1 %3152  ;;  %v3870_v48 = vsel %vm1878_vm6, %v3838_v2, %v3279_v59  ;;  %v3808_v45 = vsel %vm1812_vm4, %v3776_v32, %v8862_v56 }
 0x5d3   : > { %3682 = vrot.lane.b32.xlu0 %v2696_v10, %s4978_s17  ;;  %v3839_v26 = vsel %vm1845_vm5, %v3807_v22, %v3153_v9 }
 0x5d4   : > { %3556 = vrot.lane.b32.xlu1 %v2665_v58, %s4977_s16 }
 0x5d5   : > { %v3281_v61 = vpop.permute.xlu0 %3280 }
 0x5d6   : > { %v3661_v5 = vpop.permute.xlu1 %3660  ;;  %v3871_v41 = vsel %vm1878_vm6, %v3839_v26, %v3281_v61  ;;  %v2668_v61 = vld [vmem:[#allocation3 + $0x199] sm:$0xff] }
 0x5d7   : > { %v3965_v42 = vsel %vm1977_vm9, %v3933_v52, %v3661_v5  ;;  %3302 = vrot.lane.b32.xlu0 %v2696_v10, %s4975_s14 }
 0x5d8   : > { %3176 = vrot.lane.b32.xlu1 %v2665_v58, %s4974_s13  ;;  %4771 = vmatmul.mubr.msk.f32.gmra.mrb[14].mxu1 %vm2022_vm10, %v3965_v42  ;;  %v2669_v58 = vld [vmem:[#allocation3 + $0x1a1] sm:$0xff] }
 0x5d9   : > { %v3409_v6 = vpop.permute.xlu0 %3408  ;;  %v4893_v42 = vld [vmem:[#allocation3 + $0xe0] sm:$0xff] }
 0x5da   : > { %v3407_v19 = vpop.permute.xlu1 %3406  ;;  %v3903_v36 = vsel %vm1911_vm7, %v3871_v41, %v3409_v6  ;;  %v8863_v6 = vld [vmem:[#allocation46_spill] sm:$0xff] }
 0x5db   : > { %3304 = vrot.lane.b32.xlu0 %v2602_v12, %s4975_s14  ;;  %v3902_v35 = vsel %vm1911_vm7, %v3870_v48, %v3407_v19  ;;  %v3745_v19 = vsel %vm223_vm0, %v4893_v42, %v8863_v6 }
 0x5dc   : > { %3684 = vrot.lane.b32.xlu1 %v2602_v12, %s4978_s17  ;;  %v2701_v12 = vld [vmem:[#allocation3 + $0x1a2] sm:$0xff]  ;;  %v3777_v3 = vsel %vm1779_vm3, %v3745_v19, %v8864_v21 }
 0x5dd   : > { %v3155_v11 = vpop.permute.xlu0 %3154  ;;  %v3809_v47 = vsel %vm1812_vm4, %v3777_v3, %v8865_v54 }
 0x5de   : > { %v3535_v14 = vpop.permute.xlu1 %3534  ;;  %v3840_v37 = vsel %vm1845_vm5, %v3808_v45, %v3155_v11 }
 0x5df   : > { %3432 = vrot.lane.b32.xlu0 %v2635_v33, %s4976_s15  ;;  %v3934_v0 = vsel %vm1944_vm8, %v3902_v35, %v3535_v14 }
 0x5e0   : > { %3430 = vrot.lane.b32.xlu1 %v2634_v30, %s4976_s15 }
 0x5e1   : > { %v3663_v25 = vpop.permute.xlu0 %3662 }
 0x5e2   : > { %v3966_v27 = vsel %vm1977_vm9, %v3934_v0, %v3663_v25  ;;  %v3537_v55 = vpop.permute.xlu1 %3536 }
 0x5e3   : > { %3178 = vrot.lane.b32.xlu0 %v2571_v40, %s4974_s13  ;;  %4773 = vmatprep.mubr.msk.f32.mxu1 %vm2022_vm10, %v3966_v27  ;;  %v3935_v7 = vsel %vm1944_vm8, %v3903_v36, %v3537_v55  ;;  %v4894_v27 = vld [vmem:[#allocation3 + $0xf0] sm:$0xff]  ;;  %v8866_v55 = vld [vmem:[#allocation99_spill] sm:$0xff]  ;;  %v4895_v36 = vld [vmem:[#allocation3 + $0xf8] sm:$0xff] }
 0x5e4   : > { %3558 = vrot.lane.b32.xlu1 %v2571_v40, %s4977_s16  ;;  %v3746_v40 = vsel %vm223_vm0, %v4894_v27, %v8866_v55  ;;  %v8081_v55 = vld [vmem:[%s8296_s4] ss:$0 sm:$0xff] }
 0x5e5   : > { %v3283_v8 = vpop.permute.xlu0 %3282  ;;  %v3778_v4 = vsel %vm1779_vm3, %v3746_v40, %v8867_v62 }
 0x5e6   : > { %v3157_v51 = vpop.permute.xlu1 %3156  ;;  %v3872_v10 = vsel %vm1878_vm6, %v3840_v37, %v3283_v8  ;;  %v3810_v1 = vsel %vm1812_vm4, %v3778_v4, %v8868_v60  ;;  %v4896_v37 = vld [vmem:[#allocation3 + $0x108] sm:$0xff] }
 0x5e7   : > { %3686 = vrot.lane.b32.xlu0 %v2698_v24, %s4978_s17  ;;  %v3841_v11 = vsel %vm1845_vm5, %v3809_v47, %v3157_v51  ;;  %v8876_v47 = vld [vmem:[#allocation143_spill] sm:$0xff] }
 0x5e8   : > { %3560 = vrot.lane.b32.xlu1 %v2667_v53, %s4977_s16 }
 0x5e9   : > { %v3285_v49 = vpop.permute.xlu0 %3284 }
 0x5ea   : > { %v3665_v17 = vpop.permute.xlu1 %3664  ;;  %v3873_v2 = vsel %vm1878_vm6, %v3841_v11, %v3285_v49  ;;  %v8869_v49 = vld [vmem:[#allocation48_spill] sm:$0xff] }
 0x5eb   : > { %v3967_v50 = vsel %vm1977_vm9, %v3935_v7, %v3665_v17  ;;  %3306 = vrot.lane.b32.xlu0 %v2698_v24, %s4975_s14  ;;  %v3747_v7 = vsel %vm223_vm0, %v4895_v36, %v8869_v49  ;;  %v8870_v17 = vld [vmem:[#allocation202_spill] sm:$0xff]  ;;  %v8881_v36 = vld [vmem:[#allocation185_spill] sm:$0xff] }
 0x5ec   : > { %3180 = vrot.lane.b32.xlu1 %v2667_v53, %s4974_s13  ;;  %4774 = vmatmul.mubr.msk.f32.gmra.mrb[16].mxu1 %vm2022_vm10, %v3967_v50  ;;  %v3779_v50 = vsel %vm1779_vm3, %v3747_v7, %v8870_v17  ;;  %v8882_v7 = vld [vmem:[#allocation8_spill] sm:$0xff] }
 0x5ed   : > { %v3413_v18 = vpop.permute.xlu0 %3412 }
 0x5ee   : > { %v3411_v57 = vpop.permute.xlu1 %3410  ;;  %v3905_v14 = vsel %vm1911_vm7, %v3873_v2, %v3413_v18  ;;  %v8877_v2 = vld [vmem:[#allocation66_spill] sm:$0xff] }
 0x5ef   : > { %3308 = vrot.lane.b32.xlu0 %v2604_v29, %s4975_s14  ;;  %v3904_v23 = vsel %vm1911_vm7, %v3872_v10, %v3411_v57  ;;  %v8871_v57 = vld [vmem:[#allocation128_spill] sm:$0xff] }
 0x5f0   : > { %3688 = vrot.lane.b32.xlu1 %v2604_v29, %s4978_s17  ;;  %v3811_v29 = vsel %vm1812_vm4, %v3779_v50, %v8871_v57 }
 0x5f1   : > { %v3159_v59 = vpop.permute.xlu0 %3158 }
 0x5f2   : > { %v3539_v9 = vpop.permute.xlu1 %3538  ;;  %v3842_v8 = vsel %vm1845_vm5, %v3810_v1, %v3159_v59 }
 0x5f3   : > { %3436 = vrot.lane.b32.xlu0 %v2637_v31, %s4976_s15  ;;  %v3936_v39 = vsel %vm1944_vm8, %v3904_v23, %v3539_v9  ;;  %v8872_v9 = vld [vmem:[#allocation49_spill] sm:$0xff]  ;;  %v8873_v23 = vld [vmem:[#allocation186_spill] sm:$0xff] }
 0x5f4   : > { %3434 = vrot.lane.b32.xlu1 %v2636_v15, %s4976_s15  ;;  %v3748_v10 = vsel %vm223_vm0, %v4896_v37, %v8872_v9  ;;  %v8884_v37 = vld [vmem:[#allocation57_spill] sm:$0xff]  ;;  %s215_s15 = sand.u32 1, %s4960_s19  }
 0x5f5   : > { %v3667_v63 = vpop.permute.xlu0 %3666  ;;  %s4452_s7 = scalar_lea.sflag [#allocation5], %s215_s15 }
 0x5f6   : > { %v3968_v52 = vsel %vm1977_vm9, %v3936_v39, %v3667_v63  ;;  %v3541_v5 = vpop.permute.xlu1 %3540  ;;  %v8874_v39 = vld [vmem:[#allocation115_spill] sm:$0xff] }
 0x5f7   : > { %3564 = vrot.lane.b32.xlu0 %v2669_v58, %s4977_s16  ;;  %4776 = vmatprep.mubr.msk.f32.mxu1 %vm2022_vm10, %v3968_v52  ;;  %v3937_v48 = vsel %vm1944_vm8, %v3905_v14, %v3541_v5  ;;  %v3780_v58 = vsel %vm1779_vm3, %v3748_v10, %v8873_v23  ;;  %v8885_v23 = vld [vmem:[#allocation138_spill] sm:$0xff] }
 0x5f8   : > { %3562 = vrot.lane.b32.xlu1 %v2668_v61, %s4977_s16  ;;  %v3812_v63 = vsel %vm1812_vm4, %v3780_v58, %v8874_v39  ;;  %s4529_s16 = sshll.u32 %s215_s15, 3 }
 0x5f9   : > { %v3287_v13 = vpop.permute.xlu0 %3286  ;;  %s217_s30 = scalar_lea.vmem [#allocation4], %s4529_s16 }
 0x5fa   : > { %v3161_v20 = vpop.permute.xlu1 %3160  ;;  %v3874_v22 = vsel %vm1878_vm6, %v3842_v8, %v3287_v13  ;;  %v4897_v13 = vld [vmem:[#allocation3 + $0x110] sm:$0xff]  ;;  %s4466_s10 = sshll.u32 %s217_s30, 4  ;;  %s8252_s10 = int_to_ptr.vmem [resolvable:$true] %s4466_s10 }
 0x5fb   : > { %3692 = vrot.lane.b32.xlu0 %v2701_v12, %s4978_s17  ;;  %v3843_v16 = vsel %vm1845_vm5, %v3811_v29, %v3161_v20  ;;  %s4906_s8 = scalar_lea.vmem %s8252_s10, 128 }
 0x5fc   : > { %3690 = vrot.lane.b32.xlu1 %v2700_v38, %s4978_s17  ;;  %v8875_v38 = vld [vmem:[#allocation101_spill] sm:$0xff]  ;;  %s4606_s17 = sshll.u32 %s5031_s22, 7  ;;  %p4907_p11 = scmp.ne.s32.totalorder %s8252_s10, %s4906_s8 }
 0x5fd   : > { %v3289_v33 = vpop.permute.xlu0 %3288  ;;  %v3749_v54 = vsel %vm223_vm0, %v4897_v13, %v8875_v38  ;;  %v8886_v13 = vld [vmem:[#allocation9_spill] sm:$0xff]  ;;  %s8250_s6 = scalar_lea.hbm %s8297_s5, %s4606_s17  ;;  %s4979_s22 = smov [#allocation4]  }
 0x5fe   : > { %v3669_v30 = vpop.permute.xlu1 %3668  ;;  %v3875_v34 = vsel %vm1878_vm6, %v3843_v16, %v3289_v33  ;;  %v3781_v20 = vsel %vm1779_vm3, %v3749_v54, %v8876_v47  ;;  %v8887_v47 = vld [vmem:[#allocation10_spill] sm:$0xff]  ;;  %p4908_p12 = pnand %p4907_p11, %p5048_p5  ;;  %s4910_s9 = sshll.u32 %s4979_s22, 4  ;;  %s4911_s9 = int_to_ptr.vmem [resolvable:$false] %s4910_s9 }
 0x5ff   : > { %v3969_v35 = vsel %vm1977_vm9, %v3937_v48, %v3669_v30  ;;  %v3813_v14 = vsel %vm1812_vm4, %v3781_v20, %v8877_v2  ;;  %s4912_s23 = scalar_lea.vmem %s4911_s9, 256  ;;  %p4913_p0 = scmp.lt.s32.totalorder %s8252_s10, %s4911_s9 }
 0x600   : > { %4777 = vmatmul.mubr.msk.f32.gmra.mrb[18].mxu1 %vm2022_vm10, %v3969_v35  ;;  %p4909_p13 = pneg %p4908_p12  ;;  %p4914_p1 = scmp.lt.s32.totalorder %s4912_s23, %s4906_s8 }
 0x601   : > { %v3417_v0 = vpop.permute.xlu0 %3416 }
 0x602   : > { %v3415_v25 = vpop.permute.xlu1 %3414  ;;  %v3907_v28 = vsel %vm1911_vm7, %v3875_v34, %v3417_v0  ;;  %p4915_p2 = por %p4914_p1, %p4913_p0 }
 0x603   : > { %v3906_v51 = vsel %vm1911_vm7, %v3874_v22, %v3415_v25  ;;  %v8878_v22 = vld [vmem:[#allocation50_spill] sm:$0xff] }
 0x604   : > { %p4916_p3 = pnand %p4915_p2, %p4909_p13 }
 0x605   : > { %v3163_v44 = vpop.permute.xlu0 %3162 }
 0x606   : > { %v3543_v46 = vpop.permute.xlu1 %3542  ;;  %v3844_v52 = vsel %vm1845_vm5, %v3812_v63, %v3163_v44 }
 0x607   : > { %v3938_v24 = vsel %vm1944_vm8, %v3906_v51, %v3543_v46  ;;  %v4898_v46 = vld [vmem:[#allocation3 + $0x120] sm:$0xff] }
 0x608   : > { %v3750_v51 = vsel %vm223_vm0, %v4898_v46, %v8878_v22 }
 0x609   : > { %v3671_v26 = vpop.permute.xlu0 %3670 }
 0x60a   : > { %v3970_v53 = vsel %vm1977_vm9, %v3938_v24, %v3671_v26  ;;  %v3545_v41 = vpop.permute.xlu1 %3544  ;;  %v8879_v24 = vld [vmem:[#allocation7_spill] sm:$0xff] }
 0x60b   : > { %4779 = vmatprep.mubr.msk.f32.mxu1 %vm2022_vm10, %v3970_v53  ;;  %v3939_v31 = vsel %vm1944_vm8, %v3907_v28, %v3545_v41  ;;  %v8880_v53 = vld [vmem:[#allocation127_spill] sm:$0xff] }
 0x60c   : > { %v3782_v41 = vsel %vm1779_vm3, %v3750_v51, %v8880_v53  ;;  %v8891_v53 = vld [vmem:[#allocation109_spill] sm:$0xff] }
 0x60d   : > { %v3291_v18 = vpop.permute.xlu0 %3290  ;;  %v3814_v49 = vsel %vm1812_vm4, %v3782_v41, %v8881_v36 }
 0x60e   : > { %v3165_v43 = vpop.permute.xlu1 %3164  ;;  %v3876_v42 = vsel %vm1878_vm6, %v3844_v52, %v3291_v18 }
 0x60f   : > { %v3845_v48 = vsel %vm1845_vm5, %v3813_v14, %v3165_v43 }
 0x611   : > { %v3293_v32 = vpop.permute.xlu0 %3292 }
 0x612   : > { %v3673_v56 = vpop.permute.xlu1 %3672  ;;  %v3877_v30 = vsel %vm1878_vm6, %v3845_v48, %v3293_v32  ;;  %v8888_v48 = vld [vmem:[#allocation181_spill] sm:$0xff] }
 0x613   : > { %v3971_v45 = vsel %vm1977_vm9, %v3939_v31, %v3673_v56 }
 0x614   : > { %4780 = vmatmul.mubr.msk.f32.gmra.mrb[20].mxu1 %vm2022_vm10, %v3971_v45  ;;  %v4899_v45 = vld [vmem:[#allocation3 + $0x128] sm:$0xff] }
 0x615   : > { %v3421_v59 = vpop.permute.xlu0 %3420 }
 0x616   : > { %v3419_v15 = vpop.permute.xlu1 %3418  ;;  %v3909_v35 = vsel %vm1911_vm7, %v3877_v30, %v3421_v59  ;;  %v8883_v59 = vld [vmem:[#allocation204_spill] sm:$0xff] }
 0x617   : > { %v3908_v6 = vsel %vm1911_vm7, %v3876_v42, %v3419_v15  ;;  %v3751_v15 = vsel %vm223_vm0, %v4899_v45, %v8883_v59 }
 0x618   : > { %v3783_v9 = vsel %vm1779_vm3, %v3751_v15, %v8884_v37 }
 0x619   : > { %v3167_v61 = vpop.permute.xlu0 %3166  ;;  %v3815_v58 = vsel %vm1812_vm4, %v3783_v9, %v8885_v23 }
 0x61a   : > { %v3547_v5 = vpop.permute.xlu1 %3546  ;;  %v3846_v57 = vsel %vm1845_vm5, %v3814_v49, %v3167_v61  ;;  %v8892_v49 = vld [vmem:[#allocation165_spill] sm:$0xff] }
 0x61b   : > { %v3940_v19 = vsel %vm1944_vm8, %v3908_v6, %v3547_v5 }
 0x61d   : > { %v3675_v12 = vpop.permute.xlu0 %3674 }
 0x61e   : > { %v3972_v21 = vsel %vm1977_vm9, %v3940_v19, %v3675_v12  ;;  %v3549_v3 = vpop.permute.xlu1 %3548 }
 0x61f   : > { %4782 = vmatprep.mubr.msk.f32.mxu1 %vm2022_vm10, %v3972_v21  ;;  %v3941_v25 = vsel %vm1944_vm8, %v3909_v35, %v3549_v3  ;;  %v8889_v35 = vld [vmem:[#allocation209_spill] sm:$0xff] }
 0x621   : > { %v3295_v11 = vpop.permute.xlu0 %3294 }
 0x622   : > { %v3169_v33 = vpop.permute.xlu1 %3168  ;;  %v3878_v43 = vsel %vm1878_vm6, %v3846_v57, %v3295_v11  ;;  %v8893_v57 = vld [vmem:[#allocation77_spill] sm:$0xff] }
 0x623   : > { %v3847_v63 = vsel %vm1845_vm5, %v3815_v58, %v3169_v33  ;;  %v4900_v33 = vld [vmem:[#allocation3 + $0x138] sm:$0xff] }
 0x624   : > { %v3752_v30 = vsel %vm223_vm0, %v4900_v33, %v8888_v48  ;;  %v8899_v33 = vld [vmem:[#allocation131_spill] sm:$0xff] }
 0x625   : > { %v3297_v0 = vpop.permute.xlu0 %3296 }
 0x626   : > { %v3677_v27 = vpop.permute.xlu1 %3676  ;;  %v3879_v52 = vsel %vm1878_vm6, %v3847_v63, %v3297_v0  ;;  %v3784_v0 = vsel %vm1779_vm3, %v3752_v30, %v8889_v35  ;;  %v4902_v63 = vld [vmem:[#allocation3 + $0x150] sm:$0xff]  ;;  %v8900_v35 = vld [vmem:[#allocation62_spill] sm:$0xff] }
 0x627   : > { %v3973_v40 = vsel %vm1977_vm9, %v3941_v25, %v3677_v27  ;;  %v4751_v62 = vpop.f32.mrb[0].mxu1  ;;  %v8890_v25 = vld [vmem:[#allocation56_spill] sm:$0xff] }
 0x628   : > { %v4159_v4 = vpop.f32.mrb[1].mxu1  ;;  %4783 = vmatmul.mubr.msk.f32.gmra.mrb[22].mxu1 %vm2022_vm10, %v3973_v40  ;;  %v4165_v60 = vadd.f32 %v4751_v62, %v8081_v55  ;;  %v3816_v27 = vsel %vm1812_vm4, %v3784_v0, %v8890_v25 }
 0x629   : > { %v4160_v1 = vadd.f32 %v8081_v55, %v4159_v4  ;;  %v3425_v44 = vpop.permute.xlu0 %3424 }
 0x62a   : > { %v3423_v8 = vpop.permute.xlu1 %3422  ;;  %v4319_v17 = vadd.f32 %v4165_v60, %v8882_v7  ;;  %v3911_v42 = vsel %vm1911_vm7, %v3879_v52, %v3425_v44 }
 0x62b   : > { %v4318_v26 = vadd.f32 %v4160_v1, %v8879_v24  ;;  %v3910_v16 = vsel %vm1911_vm7, %v3878_v43, %v3423_v8 }
 0x62c   : > { %v4351_v34 = vmax.f32 %v4319_v17, 0.0 }
 0x62d   : > { %v4350_v50 = vmax.f32 %v4318_v26, 0.0  ;;  %v3171_v18 = vpop.permute.xlu0 %3170  ;;  %v4901_v26 = vld [vmem:[#allocation3 + $0x140] sm:$0xff] }
 0x62e   : > { %v3551_v29 = vpop.permute.xlu1 %3550  ;;  %v3848_v4 = vsel %vm1845_vm5, %v3816_v27, %v3171_v18  ;;  %v3753_v41 = vsel %vm223_vm0, %v4901_v26, %v8891_v53 }
 0x62f   : > { %4382 = vxpose.xlu1.b32.start [1/16] (narrow) %v4350_v50, 8  ;;  %v3942_v28 = vsel %vm1944_vm8, %v3910_v16, %v3551_v29  ;;  %v3785_v7 = vsel %vm1779_vm3, %v3753_v41, %v8892_v49 }
 0x630   : > { %v3817_v29 = vsel %vm1812_vm4, %v3785_v7, %v8893_v57  ;;  %v8904_v57 = vld [vmem:[#allocation103_spill] sm:$0xff] }
 0x631   : > { %v3679_v32 = vpop.permute.xlu0 %3678 }
 0x632   : > { %v3974_v31 = vsel %vm1977_vm9, %v3942_v28, %v3679_v32  ;;  %v3553_v56 = vpop.permute.xlu1 %3552 }
 0x633   : > { %4383 = vxpose.xlu1.b32.cont [2/16] (narrow) %v4351_v34, 8  ;;  %4785 = vmatprep.mubr.msk.f32.mxu1 %vm2022_vm10, %v3974_v31  ;;  %v3943_v21 = vsel %vm1944_vm8, %v3911_v42, %v3553_v56  ;;  %v8894_v34 = vld [vmem:[#allocation11_spill] sm:$0xff]  ;;  %v8895_v56 = vld [vmem:[#allocation12_spill] sm:$0xff] }
 0x635   : > { %v3299_v10 = vpop.permute.xlu0 %3298 }
 0x636   : > { %v3173_v39 = vpop.permute.xlu1 %3172  ;;  %v3880_v1 = vsel %vm1878_vm6, %v3848_v4, %v3299_v10 }
 0x637   : > { %v4754_v61 = vpop.f32.mrb[2].mxu1  ;;  %v3849_v16 = vsel %vm1845_vm5, %v3817_v29, %v3173_v39 }
 0x638   : > { %v4169_v5 = vpop.f32.mrb[3].mxu1  ;;  %v4175_v6 = vadd.f32 %v4754_v61, %v8081_v55  ;;  %v8896_v61 = vld [vmem:[#allocation158_spill] sm:$0xff] }
 0x639   : > { %v4170_v19 = vadd.f32 %v8081_v55, %v4169_v5  ;;  %v3301_v12 = vpop.permute.xlu0 %3300  ;;  %v3754_v52 = vsel %vm223_vm0, %v4902_v63, %v8896_v61  ;;  %v8897_v5 = vld [vmem:[#allocation113_spill] sm:$0xff] }
 0x63a   : > { %v3681_v3 = vpop.permute.xlu1 %3680  ;;  %v4321_v20 = vadd.f32 %v4175_v6, %v8887_v47  ;;  %v3881_v32 = vsel %vm1878_vm6, %v3849_v16, %v3301_v12  ;;  %v3786_v42 = vsel %vm1779_vm3, %v3754_v52, %v8897_v5  ;;  %v8898_v6 = vld [vmem:[#allocation205_spill] sm:$0xff] }
 0x63b   : > { %v4320_v38 = vadd.f32 %v4170_v19, %v8886_v13  ;;  %v3975_v54 = vsel %vm1977_vm9, %v3943_v21, %v3681_v3  ;;  %v3818_v19 = vsel %vm1812_vm4, %v3786_v42, %v8898_v6  ;;  %v8905_v16 = vld [vmem:[#allocation201_spill] sm:$0xff] }
 0x63c   : > { %4786 = vmatmul.mubr.msk.f32.gmra.mrb[24].mxu1 %vm2022_vm10, %v3975_v54  ;;  %v4353_v40 = vmax.f32 %v4321_v20, 0.0 }
 0x63d   : > { %v4352_v11 = vmax.f32 %v4320_v38, 0.0  ;;  %v3429_v2 = vpop.permute.xlu0 %3428 }
 0x63e   : > { %v3427_v14 = vpop.permute.xlu1 %3426  ;;  %v3913_v31 = vsel %vm1911_vm7, %v3881_v32, %v3429_v2 }
 0x63f   : > { %4384 = vxpose.xlu1.b32.cont [3/16] (narrow) %v4352_v11, 8  ;;  %v3912_v44 = vsel %vm1911_vm7, %v3880_v1, %v3427_v14  ;;  %v4903_v14 = vld [vmem:[#allocation3 + $0x158] sm:$0xff] }
 0x640   : > { %v3755_v48 = vsel %vm223_vm0, %v4903_v14, %v8899_v33 }
 0x641   : > { %v3175_v62 = vpop.permute.xlu0 %3174  ;;  %v3787_v0 = vsel %vm1779_vm3, %v3755_v48, %v8900_v35 }
 0x642   : > { %v3555_v60 = vpop.permute.xlu1 %3554  ;;  %v3850_v21 = vsel %vm1845_vm5, %v3818_v19, %v3175_v62  ;;  %v8901_v62 = vld [vmem:[#allocation161_spill] sm:$0xff] }
 0x643   : > { %4385 = vxpose.xlu1.b32.cont [4/16] (narrow) %v4353_v40, 8  ;;  %v3944_v8 = vsel %vm1944_vm8, %v3912_v44, %v3555_v60  ;;  %v3819_v4 = vsel %vm1812_vm4, %v3787_v0, %v8901_v62  ;;  %v8902_v44 = vld [vmem:[#allocation13_spill] sm:$0xff] }
 0x645   : > { %v3683_v46 = vpop.permute.xlu0 %3682 }
 0x646   : > { %v3976_v22 = vsel %vm1977_vm9, %v3944_v8, %v3683_v46  ;;  %v3557_v51 = vpop.permute.xlu1 %3556 }
 0x647   : > { %v4757_v24 = vpop.f32.mrb[4].mxu1  ;;  %4788 = vmatprep.mubr.msk.f32.mxu1 %vm2022_vm10, %v3976_v22  ;;  %v3945_v37 = vsel %vm1944_vm8, %v3913_v31, %v3557_v51  ;;  %v8903_v51 = vld [vmem:[#allocation14_spill] sm:$0xff] }
 0x648   : > { %v4179_v36 = vpop.f32.mrb[5].mxu1  ;;  %v4185_v17 = vadd.f32 %v4757_v24, %v8081_v55 }
 0x649   : > { %v4180_v50 = vadd.f32 %v8081_v55, %v4179_v36  ;;  %v3303_v18 = vpop.permute.xlu0 %3302 }
 0x64a   : > { %v3177_v43 = vpop.permute.xlu1 %3176  ;;  %v4323_v45 = vadd.f32 %v4185_v17, %v8895_v56  ;;  %v3882_v13 = vsel %vm1878_vm6, %v3850_v21, %v3303_v18  ;;  %v4904_v18 = vld [vmem:[#allocation3 + $0x168] sm:$0xff]  ;;  %v8907_v56 = vld [vmem:[#allocation137_spill] sm:$0xff] }
 0x64b   : > { %v4322_v28 = vadd.f32 %v4180_v50, %v8894_v34  ;;  %v3851_v1 = vsel %vm1845_vm5, %v3819_v4, %v3177_v43  ;;  %v3756_v29 = vsel %vm223_vm0, %v4904_v18, %v8904_v57  ;;  %v4905_v43 = vld [vmem:[#allocation3 + $0x170] sm:$0xff]  ;;  %v8917_v57 = vld [vmem:[#allocation22_spill] sm:$0xff] }
 0x64c   : > { %v4355_v23 = vmax.f32 %v4323_v45, 0.0  ;;  %v3757_v34 = vsel %vm223_vm0, %v4905_v43, %v8905_v16 }
 0x64d   : > { %v4354_v59 = vmax.f32 %v4322_v28, 0.0  ;;  %v3305_v15 = vpop.permute.xlu0 %3304  ;;  %v8906_v28 = vld [vmem:[#allocation183_spill] sm:$0xff]  ;;  %v3789_v45 = vsel %vm1779_vm3, %v3757_v34, %v8907_v56 }
 0x64e   : > { %v3685_v9 = vpop.permute.xlu1 %3684  ;;  %v3883_v46 = vsel %vm1878_vm6, %v3851_v1, %v3305_v15  ;;  %v3788_v32 = vsel %vm1779_vm3, %v3756_v29, %v8906_v28  ;;  %v8918_v56 = vld [vmem:[#allocation23_spill] sm:$0xff] }
 0x64f   : > { %v3977_v10 = vsel %vm1977_vm9, %v3945_v37, %v3685_v9  ;;  %4386 = vxpose.xlu1.b32.cont [5/16] (narrow) %v4354_v59, 8  ;;  %v8908_v59 = vld [vmem:[#allocation147_spill] sm:$0xff] }
 0x650   : > { %4789 = vmatmul.mubr.msk.f32.gmra.mrb[26].mxu1 %vm2022_vm10, %v3977_v10  ;;  %v3820_v15 = vsel %vm1812_vm4, %v3788_v32, %v8908_v59  ;;  %v8909_v9 = vld [vmem:[#allocation107_spill] sm:$0xff]  ;;  %v8919_v59 = vld [vmem:[#allocation24_spill] sm:$0xff] }
 0x651   : > { %v3433_v58 = vpop.permute.xlu0 %3432  ;;  %v3821_v10 = vsel %vm1812_vm4, %v3789_v45, %v8909_v9 }
 0x652   : > { %v3431_v39 = vpop.permute.xlu1 %3430  ;;  %v3915_v22 = vsel %vm1911_vm7, %v3883_v46, %v3433_v58 }
 0x653   : > { %4387 = vxpose.xlu1.b32.cont [6/16] (narrow) %v4355_v23, 8  ;;  %v3914_v38 = vsel %vm1911_vm7, %v3882_v13, %v3431_v39 }
 0x655   : > { %v3179_v12 = vpop.permute.xlu0 %3178 }
 0x656   : > { %v3559_v3 = vpop.permute.xlu1 %3558  ;;  %v3852_v23 = vsel %vm1845_vm5, %v3820_v15, %v3179_v12 }
 0x657   : > { %v3946_v54 = vsel %vm1944_vm8, %v3914_v38, %v3559_v3 }
 0x659   : > { %v3687_v47 = vpop.permute.xlu0 %3686 }
 0x65a   : > { %v3978_v20 = vsel %vm1977_vm9, %v3946_v54, %v3687_v47  ;;  %v3561_v11 = vpop.permute.xlu1 %3560  ;;  %v8910_v47 = vld [vmem:[#allocation15_spill] sm:$0xff] }
 0x65b   : > { %v4760_v2 = vpop.f32.mrb[6].mxu1  ;;  %4791 = vmatprep.mubr.msk.f32.mxu1 %vm2022_vm10, %v3978_v20  ;;  %v3947_v41 = vsel %vm1944_vm8, %v3915_v22, %v3561_v11  ;;  %v8911_v11 = vld [vmem:[#allocation16_spill] sm:$0xff]  ;;  %v8914_v22 = vld [vmem:[#allocation19_spill] sm:$0xff] }
 0x65c   : > { %v4189_v30 = vpop.f32.mrb[7].mxu1  ;;  %v4195_v25 = vadd.f32 %v4760_v2, %v8081_v55 }
 0x65d   : > { %v4190_v27 = vadd.f32 %v8081_v55, %v4189_v30  ;;  %v3307_v40 = vpop.permute.xlu0 %3306 }
 0x65e   : > { %v3181_v60 = vpop.permute.xlu1 %3180  ;;  %v4325_v24 = vadd.f32 %v4195_v25, %v8903_v51  ;;  %v3884_v58 = vsel %vm1878_vm6, %v3852_v23, %v3307_v40  ;;  %v8912_v25 = vld [vmem:[#allocation17_spill] sm:$0xff]  ;;  %v8913_v40 = vld [vmem:[#allocation18_spill] sm:$0xff] }
 0x65f   : > { %v4324_v8 = vadd.f32 %v4190_v27, %v8902_v44  ;;  %v3853_v39 = vsel %vm1845_vm5, %v3821_v10, %v3181_v60 }
 0x660   : > { %v4357_v7 = vmax.f32 %v4325_v24, 0.0  ;;  %v8915_v24 = vld [vmem:[#allocation20_spill] sm:$0xff] }
 0x661   : > { %v4356_v26 = vmax.f32 %v4324_v8, 0.0  ;;  %v3309_v53 = vpop.permute.xlu0 %3308 }
 0x662   : > { %v3689_v36 = vpop.permute.xlu1 %3688  ;;  %v3885_v63 = vsel %vm1878_vm6, %v3853_v39, %v3309_v53 }
 0x663   : > { %v3979_v49 = vsel %vm1977_vm9, %v3947_v41, %v3689_v36  ;;  %4388 = vxpose.xlu1.b32.cont [7/16] (narrow) %v4356_v26, 8 }
 0x664   : > { %4792 = vmatmul.mubr.msk.f32.gmra.mrb[28].mxu1 %vm2022_vm10, %v3979_v49 }
 0x665   : > { %v3437_v17 = vpop.permute.xlu0 %3436 }
 0x666   : > { %v3435_v50 = vpop.permute.xlu1 %3434  ;;  %v3917_v5 = vsel %vm1911_vm7, %v3885_v63, %v3437_v17  ;;  %v8920_v63 = vld [vmem:[#allocation25_spill] sm:$0xff] }
 0x667   : > { %4389 = vxpose.xlu1.b32.cont [8/16] (narrow) %v4357_v7, 8  ;;  %v3916_v61 = vsel %vm1911_vm7, %v3884_v58, %v3435_v50  ;;  %v8916_v50 = vld [vmem:[#allocation21_spill] sm:$0xff] }
 0x669   : > { %v3565_v31 = vpop.permute.xlu0 %3564 }
 0x66a   : > { %v3563_v37 = vpop.permute.xlu1 %3562  ;;  %v3949_v19 = vsel %vm1944_vm8, %v3917_v5, %v3565_v31 }
 0x66b   : > { %v3948_v42 = vsel %vm1944_vm8, %v3916_v61, %v3563_v37 }
 0x66d   : > { %v3693_v52 = vpop.permute.xlu0 %3692 }
 0x66e   : > { %v3691_v6 = vpop.permute.xlu1 %3690  ;;  %v3981_v12 = vsel %vm1977_vm9, %v3949_v19, %v3693_v52  ;;  %v8921_v52 = vld [vmem:[#allocation26_spill] sm:$0xff] }
 0x66f   : > { %v3980_v21 = vsel %vm1977_vm9, %v3948_v42, %v3691_v6  ;;  %v4763_v3 = vpop.f32.mrb[8].mxu1 }
 0x670   : > { %v4199_v13 = vpop.f32.mrb[9].mxu1  ;;  %4794 = vmatprep.mubr.msk.f32.mxu1 %vm2022_vm10, %v3980_v21  ;;  %v4205_v38 = vadd.f32 %v4763_v3, %v8081_v55 }
 0x671   : > { %v4200_v54 = vadd.f32 %v8081_v55, %v4199_v13  ;;  %4795 = vmatmul.mubr.msk.f32.gmra.mrb[30].mxu1 %vm2022_vm10, %v3981_v12  ;;  %v8922_v13 = vld [vmem:[#allocation27_spill] sm:$0xff] }
 0x672   : > { %v4327_v2 = vadd.f32 %v4205_v38, %v8911_v11 }
 0x673   : > { %v4326_v20 = vadd.f32 %v4200_v54, %v8910_v47  ;;  %v8923_v54 = vld [vmem:[#allocation28_spill] sm:$0xff] }
 0x674   : > { %v4359_v33 = vmax.f32 %v4327_v2, 0.0 }
 0x675   : > { %v4358_v14 = vmax.f32 %v4326_v20, 0.0 }
 0x677   : > { %4390 = vxpose.xlu1.b32.cont [9/16] (narrow) %v4358_v14, 8 }
 0x67b   : > { %4391 = vxpose.xlu1.b32.cont [10/16] (narrow) %v4359_v33, 8 }
 0x683   : > { %v4766_v48 = vpop.f32.mrb[10].mxu1 }
 0x684   : > { %v4209_v30 = vpop.f32.mrb[11].mxu1  ;;  %v4215_v35 = vadd.f32 %v4766_v48, %v8081_v55 }
 0x685   : > { %v4210_v0 = vadd.f32 %v8081_v55, %v4209_v30  ;;  %v8924_v30 = vld [vmem:[#allocation29_spill] sm:$0xff] }
 0x686   : > { %v4329_v62 = vadd.f32 %v4215_v35, %v8913_v40 }
 0x687   : > { %v4328_v27 = vadd.f32 %v4210_v0, %v8912_v25  ;;  %v8925_v0 = vld [vmem:[#allocation30_spill] sm:$0xff] }
 0x688   : > { %v4361_v60 = vmax.f32 %v4329_v62, 0.0 }
 0x689   : > { %v4360_v4 = vmax.f32 %v4328_v27, 0.0 }
 0x68b   : > { %4392 = vxpose.xlu1.b32.cont [11/16] (narrow) %v4360_v4, 8 }
 0x68f   : > { %4393 = vxpose.xlu1.b32.cont [12/16] (narrow) %v4361_v60, 8 }
 0x697   : > { %v4769_v1 = vpop.f32.mrb[12].mxu1 }
 0x698   : > { %v4219_v44 = vpop.f32.mrb[13].mxu1  ;;  %v4225_v8 = vadd.f32 %v4769_v1, %v8081_v55 }
 0x699   : > { %v4220_v46 = vadd.f32 %v8081_v55, %v4219_v44  ;;  %v8926_v44 = vld [vmem:[#allocation31_spill] sm:$0xff] }
 0x69a   : > { %v4331_v26 = vadd.f32 %v4225_v8, %v8915_v24 }
 0x69b   : > { %v4330_v51 = vadd.f32 %v4220_v46, %v8914_v22  ;;  %v8927_v46 = vld [vmem:[#allocation32_spill] sm:$0xff] }
 0x69c   : > { %v4363_v41 = vmax.f32 %v4331_v26, 0.0 }
 0x69d   : > { %v4362_v53 = vmax.f32 %v4330_v51, 0.0 }
 0x69f   : > { %4394 = vxpose.xlu1.b32.cont [13/16] (narrow) %v4362_v53, 8 }
 0x6a3   : > { %4395 = vxpose.xlu1.b32.cont [14/16] (narrow) %v4363_v41, 8 }
 0x6ab   : > { %v4772_v36 = vpop.f32.mrb[14].mxu1 }
 0x6ac   : > { %v4229_v49 = vpop.f32.mrb[15].mxu1  ;;  %v4235_v7 = vadd.f32 %v4772_v36, %v8081_v55 }
 0x6ad   : > { %v4230_v17 = vadd.f32 %v8081_v55, %v4229_v49  ;;  %v8928_v49 = vld [vmem:[#allocation33_spill] sm:$0xff] }
 0x6ae   : > { %v4333_v29 = vadd.f32 %v4235_v7, %v8917_v57 }
 0x6af   : > { %v4332_v18 = vadd.f32 %v4230_v17, %v8916_v50  ;;  %v8929_v17 = vld [vmem:[#allocation34_spill] sm:$0xff] }
 0x6b0   : > { %v4365_v16 = vmax.f32 %v4333_v29, 0.0 }
 0x6b1   : > { %v4364_v43 = vmax.f32 %v4332_v18, 0.0 }
 0x6b3   : > { %4396 = vxpose.xlu1.b32.cont [15/16] (narrow) %v4364_v43, 8 }
 0x6b7   : > { %4397 = vxpose.xlu1.b32.end [16/16] (narrow) %v4365_v16, 8 }
 0x6bf   : > { %v4775_v34 = vpop.f32.mrb[16].mxu1 }
 0x6c0   : > { %v4239_v28 = vpop.f32.mrb[17].mxu1  ;;  %v4245_v32 = vadd.f32 %v4775_v34, %v8081_v55 }
 0x6c1   : > { %v4240_v31 = vadd.f32 %v8081_v55, %v4239_v28  ;;  %v8930_v28 = vld [vmem:[#allocation36_spill] sm:$0xff] }
 0x6c2   : > { %v4335_v15 = vadd.f32 %v4245_v32, %v8919_v59 }
 0x6c3   : > { %v4334_v45 = vadd.f32 %v4240_v31, %v8918_v56  ;;  %v8931_v31 = vld [vmem:[#allocation37_spill] sm:$0xff] }
 0x6c4   : > { %v4367_v9 = vmax.f32 %v4335_v15, 0.0 }
 0x6c5   : > { %v4366_v37 = vmax.f32 %v4334_v45, 0.0 }
 0x6c7   : > { %4414 = vxpose.xlu0.b32.start [1/16] (narrow) %v4366_v37, 8 }
 0x6cb   : > { %4415 = vxpose.xlu0.b32.cont [2/16] (narrow) %v4367_v9, 8 }
 0x6d3   : > { %v4778_v10 = vpop.f32.mrb[18].mxu1 }
 0x6d4   : > { %v4249_v23 = vpop.f32.mrb[19].mxu1  ;;  %v4255_v58 = vadd.f32 %v4778_v10, %v8081_v55 }
 0x6d5   : > { %v4250_v39 = vadd.f32 %v8081_v55, %v4249_v23  ;;  %v8932_v23 = vld [vmem:[#allocation39_spill] sm:$0xff] }
 0x6d6   : > { %v4337_v5 = vadd.f32 %v4255_v58, %v8921_v52 }
 0x6d7   : > { %v4336_v61 = vadd.f32 %v4250_v39, %v8920_v63  ;;  %v8933_v39 = vld [vmem:[#allocation41_spill] sm:$0xff] }
 0x6d8   : > { %v4369_v6 = vmax.f32 %v4337_v5, 0.0 }
 0x6d9   : > { %v4368_v42 = vmax.f32 %v4336_v61, 0.0 }
 0x6db   : > { %4416 = vxpose.xlu0.b32.cont [3/16] (narrow) %v4368_v42, 8 }
 0x6df   : > { %4417 = vxpose.xlu0.b32.cont [4/16] (narrow) %v4369_v6, 8 }
 0x6e7   : > { %v4781_v19 = vpop.f32.mrb[20].mxu1 }
 0x6e8   : > { %v4259_v21 = vpop.f32.mrb[21].mxu1  ;;  %v4265_v3 = vadd.f32 %v4781_v19, %v8081_v55 }
 0x6e9   : > { %v4260_v12 = vadd.f32 %v8081_v55, %v4259_v21 }
 0x6ea   : > { %v4339_v47 = vadd.f32 %v4265_v3, %v8923_v54 }
 0x6eb   : > { %v4338_v38 = vadd.f32 %v4260_v12, %v8922_v13 }
 0x6ec   : > { %v4371_v11 = vmax.f32 %v4339_v47, 0.0 }
 0x6ed   : > { %v4370_v20 = vmax.f32 %v4338_v38, 0.0 }
 0x6ef   : > { %4418 = vxpose.xlu0.b32.cont [5/16] (narrow) %v4370_v20, 8 }
 0x6f3   : > { %4419 = vxpose.xlu0.b32.cont [6/16] (narrow) %v4371_v11, 8 }
 0x6fb   : > { %v4784_v2 = vpop.f32.mrb[22].mxu1  ;;  %v4398_v5 = vpop.trf.xlu1 }
 0x6fc   : > { %v4269_v14 = vpop.f32.mrb[23].mxu1  ;;  %v4275_v33 = vadd.f32 %v4784_v2, %v8081_v55 }
 0x6fd   : > { %v4270_v48 = vadd.f32 %v8081_v55, %v4269_v14 }
 0x6fe   : > { %v4341_v25 = vadd.f32 %v4275_v33, %v8925_v0 }
 0x6ff   : > { %v4340_v35 = vadd.f32 %v4270_v48, %v8924_v30 }
 0x700   : > { %v4373_v40 = vmax.f32 %v4341_v25, 0.0 }
 0x701   : > { %v4372_v27 = vmax.f32 %v4340_v35, 0.0 }
 0x703   : > { %4420 = vxpose.xlu0.b32.cont [7/16] (narrow) %v4372_v27, 8 }
 0x707   : > { %4421 = vxpose.xlu0.b32.cont [8/16] (narrow) %v4373_v40, 8 }
 0x70f   : > { %v4787_v62 = vpop.f32.mrb[24].mxu1 }
 0x710   : > { %v4279_v4 = vpop.f32.mrb[25].mxu1  ;;  %v4285_v60 = vadd.f32 %v4787_v62, %v8081_v55 }
 0x711   : > { %v4280_v1 = vadd.f32 %v8081_v55, %v4279_v4 }
 0x712   : > { %v4343_v22 = vadd.f32 %v4285_v60, %v8927_v46 }
 0x713   : > { %v4342_v8 = vadd.f32 %v4280_v1, %v8926_v44 }
 0x714   : > { %v4375_v24 = vmax.f32 %v4343_v22, 0.0 }
 0x715   : > { %v4374_v51 = vmax.f32 %v4342_v8, 0.0 }
 0x717   : > { %4422 = vxpose.xlu0.b32.cont [9/16] (narrow) %v4374_v51, 8 }
 0x71b   : > { %4423 = vxpose.xlu0.b32.cont [10/16] (narrow) %v4375_v24, 8 }
 0x723   : > { %v4790_v26 = vpop.f32.mrb[26].mxu1 }
 0x724   : > { %v4289_v53 = vpop.f32.mrb[27].mxu1  ;;  %v4295_v41 = vadd.f32 %v4790_v26, %v8081_v55 }
 0x725   : > { %v4290_v36 = vadd.f32 %v8081_v55, %v4289_v53 }
 0x726   : > { %v4345_v50 = vadd.f32 %v4295_v41, %v8929_v17 }
 0x727   : > { %v4344_v7 = vadd.f32 %v4290_v36, %v8928_v49 }
 0x728   : > { %v4377_v57 = vmax.f32 %v4345_v50, 0.0 }
 0x729   : > { %v4376_v18 = vmax.f32 %v4344_v7, 0.0 }
 0x72b   : > { %4424 = vxpose.xlu0.b32.cont [11/16] (narrow) %v4376_v18, 8 }
 0x72f   : > { %4425 = vxpose.xlu0.b32.cont [12/16] (narrow) %v4377_v57, 8 }
 0x737   : > { %v4793_v29 = vpop.f32.mrb[28].mxu1 }
 0x738   : > { %v4299_v43 = vpop.f32.mrb[29].mxu1  ;;  %v4305_v16 = vadd.f32 %v4793_v29, %v8081_v55 }
 0x739   : > { %v4300_v34 = vadd.f32 %v8081_v55, %v4299_v43 }
 0x73a   : > { %v4347_v56 = vadd.f32 %v4305_v16, %v8931_v31 }
 0x73b   : > { %v4346_v32 = vadd.f32 %v4300_v34, %v8930_v28 }
 0x73c   : > { %v4379_v59 = vmax.f32 %v4347_v56, 0.0 }
 0x73d   : > { %v4378_v45 = vmax.f32 %v4346_v32, 0.0 }
 0x73f   : > { %4426 = vxpose.xlu0.b32.cont [13/16] (narrow) %v4378_v45, 8 }
 0x743   : > { %4427 = vxpose.xlu0.b32.cont [14/16] (narrow) %v4379_v59, 8 }
 0x744   : > { %v4796_v15 = vpop.f32.mrb[30].mxu1 }
 0x745   : > { %v4309_v37 = vpop.f32.mrb[31].mxu1  ;;  %v4315_v9 = vadd.f32 %v4796_v15, %v8081_v55 }
 0x746   : > { %v4310_v10 = vadd.f32 %v8081_v55, %v4309_v37 }
 0x747   : > { %v4349_v63 = vadd.f32 %v4315_v9, %v8933_v39 }
 0x748   : > { %v4348_v58 = vadd.f32 %v4310_v10, %v8932_v23 }
 0x749   : > { %v4381_v52 = vmax.f32 %v4349_v63, 0.0 }
 0x74a   : > { %v4380_v61 = vmax.f32 %v4348_v58, 0.0 }
 0x74c   : > { %4428 = vxpose.xlu0.b32.cont [15/16] (narrow) %v4380_v61, 8 }
 0x750   : > { %4429 = vxpose.xlu0.b32.end [16/16] (narrow) %v4381_v52, 8 }
 0x794   : > { %v4430_v42 = vpop.trf.xlu0 }
 0x795   : > { %v4448_v6 = vcombine.low %v4398_v5, %v4430_v42 }
 0x797   : > { %4450 = vst [vmem:[%s217_s30] sm:$0xff] %v4448_v6 }
 0x798   : > { %4919 = shalt.err (!%p4916_p3)
}
 0x799   : > { %s4920_s25 = scalar_lea.hbm %s8250_s6, 128  ;;  %s4924_s14 = scalar_lea.hbm %s8297_s5, 256 }
 0x79a   : > { %p4921_p4 = scmp.ne.s32.totalorder %s8250_s6, %s4920_s25  ;;  %p4925_p9 = scmp.lt.u32.totalorder %s8250_s6, %s8297_s5 }
 0x79b   : > { %p4926_p10 = scmp.lt.u32.totalorder %s4924_s14, %s4920_s25  ;;  %p4928_p12 = scmp.lt.u32.totalorder %s4920_s25, %s8250_s6 }
 0x79c   : > { %p4922_p7 = pnand %p4921_p4, %p5048_p5 }
 0x79d   : > { %p4927_p11 = por %p4926_p10, %p4925_p9 }
 0x79e   : > { %p4923_p8 = pneg %p4922_p7 }
 0x79f   : > { %p4929_p13 = por %p4928_p12, %p4927_p11 }
 0x7a1   : > { %p4930_p0 = pnand %p4929_p13, %p4923_p8 }
 0x7a3   : > { %4933 = shalt.err (!%p4930_p0)
}
 0x7a4   : > { %4813 = dma.vmem_to_hbm [thread:$0]  (%p5048_p5), %s8252_s10, 128, %s8250_s6, %s4452_s7  }
 0x7a5 PF: > { %p4819_p1 = scmp.ge.s32.totalorder %s4968_s21, 2  ;;  %s4478_s17 = sand.u32 1, %s4956_s18  }
 0x7a6   : > { %s4479_s30 = scalar_lea.sflag [#allocation5], %s4478_s17 }
 0x7a7   : > { %p4816_p2 = pnand %p4819_p1, %p5052_p6 }
 0x7a9   : > { %4951 = dma.done.wait (!%p4816_p2), %s4479_s30, 128  }
 0x7aa   : > { %4953 = vsyncadd (!%p4816_p2), %s4479_s30, 4294967168  ;;  %p15_p3 = scmp.ge.s32.totalorder %s5035_s24, 4   ;;  %s8934_s18 = smov %s4960_s19 }
 0x7ab   : > { %s8935_s19 = smov %s4964_s20  ;;  %s8936_s20 = smov %s5046_s27 }
 0x7ac   : > { %s8937_s21 = smov %s5035_s24  ;;  %17 = sbr.rel (!%p15_p3) target bundleno = 3 (0x3), region = 79 }
 0x7b3   :  { %4484 = vsyncpa [#allocation5], 1 }
 0x7b4   :  { %4486 = vsyncpa [#allocation5 + $0x1], 1 }

</bundles_post_ra>
